<compile_context>
chip_gen: v6e
topology: v6e:2x2x1
jax: 0.10.0
libtpu: 0.0.40
codegen_flags: <defaults>
</compile_context>

<pallas_src>
import functools

import jax
import jax.numpy as jnp
from jax.experimental import pallas as pl
from jax.experimental.pallas import tpu as pltpu


def _round_up(a, b):
    return (a + b - 1) // b * b


def _bottleneck_ir_kernel(*refs, stride, identity_sc):
    if identity_sc:
        (x_ref, s1_ref, b1_ref, w1_ref, a_ref, w2_ref, s2_ref, b2_ref,
         out_ref, pad1_ref, pad2_ref) = refs
        ws_ref = ss_ref = bs_ref = None
    else:
        (x_ref, s1_ref, b1_ref, w1_ref, a_ref, w2_ref, s2_ref, b2_ref,
         ws_ref, ss_ref, bs_ref, out_ref, pad1_ref, pad2_ref) = refs

    _, H, W, Cin = x_ref.shape
    Hp1, Wp1, _ = pad1_ref.shape
    Hp2, Wp2, D = pad2_ref.shape
    Ho = out_ref.shape[1]
    s = stride
    f32 = jnp.float32
    bf16 = jnp.bfloat16

    x = x_ref[0].astype(f32)                               # (H, W, Cin)

    # ---- res branch: folded BatchNorm2d(in_channel), f32 on the VPU ----
    xb = x * s1_ref[...] + b1_ref[...]

    # ---- padded conv1 input: zero only the halo ring, write the interior ----
    pad1_ref[0:1, :, :] = jnp.zeros((1, Wp1, Cin), f32)
    pad1_ref[H + 1:Hp1, :, :] = jnp.zeros((Hp1 - (H + 1), Wp1, Cin), f32)
    pad1_ref[1:H + 1, 0:1, :] = jnp.zeros((H, 1, Cin), f32)
    pad1_ref[1:H + 1, W + 1:Wp1, :] = jnp.zeros((H, Wp1 - (W + 1), Cin), f32)
    pad1_ref[1:H + 1, 1:W + 1, :] = xb

    # ---- conv1: 3x3 stride 1 pad 1 as one fused (M1, 9*Cin)@(9*Cin, D) ----
    # Padded width Wp1 % 8 == 0 -> the flatten is layout preserving and each
    # tap is just a flat row-offset slice (no strided-slice copy).
    M1 = H * Wp1
    p1 = pad1_ref[...].reshape(Hp1 * Wp1, Cin)
    taps1 = []
    for dy in range(3):
        for dx in range(3):
            off = dy * Wp1 + dx
            taps1.append(p1[off:off + M1, :].astype(bf16))
    im2col1 = jnp.concatenate(taps1, axis=-1)              # (M1, 9*Cin) bf16
    y1 = jnp.dot(im2col1, w1_ref[...], preferred_element_type=f32)

    # ---- PReLU(depth), f32 ----
    y1 = jnp.where(y1 >= 0.0, y1, a_ref[...] * y1)

    # ---- padded conv2 input (halo-only zeroing again) ----
    y1v = y1.reshape(H, Wp1, D)[:, :W, :]
    pad2_ref[0:1, :, :] = jnp.zeros((1, Wp2, D), f32)
    pad2_ref[H + 1:Hp2, :, :] = jnp.zeros((Hp2 - (H + 1), Wp2, D), f32)
    pad2_ref[1:H + 1, 0:1, :] = jnp.zeros((H, 1, D), f32)
    pad2_ref[1:H + 1, W + 1:Wp2, :] = jnp.zeros((H, Wp2 - (W + 1), D), f32)
    pad2_ref[1:H + 1, 1:W + 1, :] = y1v

    # ---- conv2: 3x3, stride s, pad 1; row stride applied IN-KERNEL ----
    # Leading-dim phase split (no sublane-strided access): pad2 row s*i + dy ==
    # phase (dy % s), row-group (i + dy // s).  Only Ho output rows computed.
    M2 = Ho * Wp2
    p2 = pad2_ref[...].reshape(Hp2 // s, s, Wp2, D)
    taps2 = []
    for dy in range(3):
        ph, g0 = dy % s, dy // s
        slab = p2[g0:g0 + Ho + 1, ph, :, :].reshape((Ho + 1) * Wp2, D)
        for dx in range(3):
            taps2.append(slab[dx:dx + M2, :].astype(bf16))
    im2col2 = jnp.concatenate(taps2, axis=-1)              # (M2, 9*D) bf16
    y2 = jnp.dot(im2col2, w2_ref[...], preferred_element_type=f32)

    # ---- folded BatchNorm2d(depth) ----
    y2 = y2 * s2_ref[...] + b2_ref[...]
    y2v = y2.reshape(Ho, Wp2, D)[:, :W, :]                 # (Ho, W, D)

    # ---- shortcut at strided rows (columns subsampled by the wrapper) ----
    Hr = Ho * s
    if Hr > H:
        xs = jnp.concatenate([x, jnp.zeros((Hr - H, W, Cin), f32)], axis=0)
    else:
        xs = x
    xs = xs.reshape(Ho, s, W, Cin)[:, 0, :, :]             # rows 0, s, 2s, ...
    if identity_sc:
        # in_channel == depth: MaxPool2d(1, s) == strided identity, no matmul/BN.
        sc = xs
    else:
        scf = jnp.dot(xs.reshape(Ho * W, Cin).astype(bf16), ws_ref[...],
                      preferred_element_type=f32)
        scf = scf * ss_ref[...] + bs_ref[...]
        sc = scf.reshape(Ho, W, D)

    out_ref[0] = (y2v + sc).astype(out_ref.dtype)


def _fold_bn(gamma, beta, mean, var, eps=1e-5):
    sc = gamma / jnp.sqrt(var + eps)
    return sc, beta - mean * sc


def bottleneck_ir_forward(x_nchw, params, stride):
    """Forward pass of bottleneck_IR.  x_nchw: (N, Cin, H, W) float32."""
    N, Cin, H, W = x_nchw.shape
    D = params['w1'].shape[0]                  # torch conv weight (D, Cin, 3, 3)
    Ho = (H - 1) // stride + 1

    x = jnp.transpose(x_nchw, (0, 2, 3, 1)).astype(jnp.float32)   # NHWC

    s1, b1 = _fold_bn(*params['bn1'])          # over Cin
    s2, b2 = _fold_bn(*params['bn2'])          # over D

    # torch (out, in, kh, kw) -> (kh, kw, in, out) -> (9*in, out), bf16 for MXU
    w1r = jnp.transpose(params['w1'], (2, 3, 1, 0)).reshape(9 * Cin, D) \
             .astype(jnp.bfloat16)
    w2r = jnp.transpose(params['w2'], (2, 3, 1, 0)).reshape(9 * D, D) \
             .astype(jnp.bfloat16)
    alpha = params['prelu'].reshape(1, D).astype(jnp.float32)

    identity_sc = params.get('w_sc') is None

    Wp1 = _round_up(W + 2, 8)                  # padded width, sublane aligned
    Hp1 = H + 3
    Wp2 = _round_up(W + 2, 8)
    Hp2 = stride * (Ho + 3)                    # divisible by stride, >= H + 2

    inputs = [x,
              s1.reshape(1, Cin).astype(jnp.float32),
              b1.reshape(1, Cin).astype(jnp.float32),
              w1r, alpha, w2r,
              s2.reshape(1, D).astype(jnp.float32),
              b2.reshape(1, D).astype(jnp.float32)]
    in_specs = [
        pl.BlockSpec((1, H, W, Cin), lambda n: (n, 0, 0, 0)),
        pl.BlockSpec((1, Cin), lambda n: (0, 0)),
        pl.BlockSpec((1, Cin), lambda n: (0, 0)),
        pl.BlockSpec((9 * Cin, D), lambda n: (0, 0)),
        pl.BlockSpec((1, D), lambda n: (0, 0)),
        pl.BlockSpec((9 * D, D), lambda n: (0, 0)),
        pl.BlockSpec((1, D), lambda n: (0, 0)),
        pl.BlockSpec((1, D), lambda n: (0, 0)),
    ]
    if not identity_sc:
        ws = jnp.transpose(params['w_sc'], (2, 3, 1, 0)).reshape(Cin, D) \
                .astype(jnp.bfloat16)
        ss, bs = _fold_bn(*params['bn_sc'])
        inputs += [ws,
                   ss.reshape(1, D).astype(jnp.float32),
                   bs.reshape(1, D).astype(jnp.float32)]
        in_specs += [pl.BlockSpec((Cin, D), lambda n: (0, 0)),
                     pl.BlockSpec((1, D), lambda n: (0, 0)),
                     pl.BlockSpec((1, D), lambda n: (0, 0))]

    kernel = functools.partial(_bottleneck_ir_kernel,
                               stride=stride, identity_sc=identity_sc)

    out = pl.pallas_call(
        kernel,
        out_shape=jax.ShapeDtypeStruct((N, Ho, W, D), jnp.float32),
        grid=(N,),
        in_specs=in_specs,
        out_specs=pl.BlockSpec((1, Ho, W, D), lambda n: (n, 0, 0, 0)),
        scratch_shapes=[
            pltpu.VMEM((Hp1, Wp1, Cin), jnp.float32),
            pltpu.VMEM((Hp2, Wp2, D), jnp.float32),
        ],
        compiler_params=pltpu.CompilerParams(
            dimension_semantics=("parallel",),
            vmem_limit_bytes=64 * 1024 * 1024),
    )(*inputs)

    # Column stride applied here: the kernel already produced only the strided
    # output ROWS; keeping every `stride`-th column is pure indexing glue.
    out = out[:, :, ::stride, :]
    return jnp.transpose(out, (0, 3, 1, 2))                # back to NCHW


def reference_forward(x, params, stride):
    """Pure-JAX reference mirroring the PyTorch module (eval-mode BN)."""
    eps = 1e-5
    dn = ('NCHW', 'OIHW', 'NCHW')
    hp = jax.lax.Precision.HIGHEST

    def bn(y, p):
        g, be, m, v = p
        return (y - m[None, :, None, None]) / jnp.sqrt(v[None, :, None, None] + eps) \
            * g[None, :, None, None] + be[None, :, None, None]

    y = bn(x, params['bn1'])
    y = jax.lax.conv_general_dilated(y, params['w1'], (1, 1), ((1, 1), (1, 1)),
                                     dimension_numbers=dn, precision=hp)
    a = params['prelu'][None, :, None, None]
    y = jnp.where(y >= 0, y, a * y)
    y = jax.lax.conv_general_dilated(y, params['w2'], (stride, stride),
                                     ((1, 1), (1, 1)),
                                     dimension_numbers=dn, precision=hp)
    y = bn(y, params['bn2'])

    if params.get('w_sc') is not None:
        sc = jax.lax.conv_general_dilated(x, params['w_sc'], (stride, stride),
                                          ((0, 0), (0, 0)),
                                          dimension_numbers=dn, precision=hp)
        sc = bn(sc, params['bn_sc'])
    else:
        sc = x[:, :, ::stride, ::stride]
    return y + sc


if __name__ == "__main__":
    key = jax.random.PRNGKey(0)

    def bn_params(k, c):
        k1, k2, k3, k4 = jax.random.split(k, 4)
        gamma = 1.0 + 0.1 * jax.random.normal(k1, (c,), jnp.float32)
        beta = 0.1 * jax.random.normal(k2, (c,), jnp.float32)
        mean = 0.1 * jax.random.normal(k3, (c,), jnp.float32)
        var = jnp.abs(jax.random.normal(k4, (c,), jnp.float32)) + 0.5
        return (gamma, beta, mean, var)

    def make_params(k, cin, depth):
        ks = jax.random.split(k, 6)
        p = {
            'bn1': bn_params(ks[0], cin),
            'w1': 0.2 * jax.random.normal(ks[1], (depth, cin, 3, 3), jnp.float32),
            'prelu': jnp.full((depth,), 0.25, jnp.float32),
            'w2': 0.2 * jax.random.normal(ks[2], (depth, depth, 3, 3), jnp.float32),
            'bn2': bn_params(ks[3], depth),
        }
        if cin != depth:
            p['w_sc'] = 0.2 * jax.random.normal(ks[4], (depth, cin, 1, 1),
                                                jnp.float32)
            p['bn_sc'] = bn_params(ks[5], depth)
        else:
            p['w_sc'] = None
        return p

    configs = [
        # (N, Cin, D, H, W, stride)
        (2, 64, 128, 16, 16, 2),   # conv shortcut, downsampling block
        (2, 64, 64, 16, 16, 2),    # identity shortcut (MaxPool2d(1, 2))
        (2, 64, 128, 16, 16, 1),   # conv shortcut, stride-1 block
    ]

    for idx, (N, Cin, D, H, W, stride) in enumerate(configs):
        kx, kp = jax.random.split(jax.random.fold_in(key, idx))
        x = jax.random.normal(kx, (N, Cin, H, W), jnp.float32)
        params = make_params(kp, Cin, D)

        fwd = jax.jit(functools.partial(bottleneck_ir_forward,
                                        params=params, stride=stride))
        out = jax.block_until_ready(fwd(x))

        Ho = (H - 1) // stride + 1
        Wo = (W - 1) // stride + 1
        assert out.shape == (N, D, Ho, Wo), (out.shape, (N, D, Ho, Wo))

        ref = reference_forward(x, params, stride)
        rel_err = float(jnp.max(jnp.abs(out - ref)) /
                        (jnp.max(jnp.abs(ref)) + 1e-6))
        assert rel_err < 4e-2, f"config {idx}: mismatch vs reference rel_err={rel_err}"

    print("KERNEL_OK")
</pallas_src>

<mosaic_0001>
module attributes {stable_mosaic.version = 11 : i64} {
  func.func @_bottleneck_ir_kernel(%arg0: i32, %arg1: memref<1x16x16x64xf32, #tpu.memory_space<vmem>>, %arg2: memref<1x64xf32, #tpu.memory_space<vmem>>, %arg3: memref<1x64xf32, #tpu.memory_space<vmem>>, %arg4: memref<576x128xbf16, #tpu.memory_space<vmem>>, %arg5: memref<1x128xf32, #tpu.memory_space<vmem>>, %arg6: memref<1152x128xbf16, #tpu.memory_space<vmem>>, %arg7: memref<1x128xf32, #tpu.memory_space<vmem>>, %arg8: memref<1x128xf32, #tpu.memory_space<vmem>>, %arg9: memref<64x128xbf16, #tpu.memory_space<vmem>>, %arg10: memref<1x128xf32, #tpu.memory_space<vmem>>, %arg11: memref<1x128xf32, #tpu.memory_space<vmem>>, %arg12: memref<1x8x16x128xf32, #tpu.memory_space<vmem>>, %arg13: memref<19x24x64xf32, #tpu.memory_space<vmem>>, %arg14: memref<22x24x128xf32, #tpu.memory_space<vmem>>) attributes {dimension_semantics = [#tpu.dimension_semantics<parallel>], iteration_bounds = array<i64: 2>, scalar_prefetch = 0 : i64, scratch_operands = 2 : i64, tpu.core_type = #tpu.core_type<tc>, window_params = [{transform_indices = @transform_0, window_bounds = array<i64: 1, 16, 16, 64>}, {pipeline_mode = #tpu.pipeline_mode<synchronous>, transform_indices = @transform_1, window_bounds = array<i64: 1, 64>}, {pipeline_mode = #tpu.pipeline_mode<synchronous>, transform_indices = @transform_2, window_bounds = array<i64: 1, 64>}, {pipeline_mode = #tpu.pipeline_mode<synchronous>, transform_indices = @transform_3, window_bounds = array<i64: 576, 128>}, {pipeline_mode = #tpu.pipeline_mode<synchronous>, transform_indices = @transform_4, window_bounds = array<i64: 1, 128>}, {pipeline_mode = #tpu.pipeline_mode<synchronous>, transform_indices = @transform_5, window_bounds = array<i64: 1152, 128>}, {pipeline_mode = #tpu.pipeline_mode<synchronous>, transform_indices = @transform_6, window_bounds = array<i64: 1, 128>}, {pipeline_mode = #tpu.pipeline_mode<synchronous>, transform_indices = @transform_7, window_bounds = array<i64: 1, 128>}, {pipeline_mode = #tpu.pipeline_mode<synchronous>, transform_indices = @transform_8, window_bounds = array<i64: 64, 128>}, {pipeline_mode = #tpu.pipeline_mode<synchronous>, transform_indices = @transform_9, window_bounds = array<i64: 1, 128>}, {pipeline_mode = #tpu.pipeline_mode<synchronous>, transform_indices = @transform_10, window_bounds = array<i64: 1, 128>}, {transform_indices = @transform_11, window_bounds = array<i64: 1, 8, 16, 128>}]} {
    %c0 = arith.constant 0 : index
    %c0_0 = arith.constant 0 : index
    %c0_1 = arith.constant 0 : index
    %c0_2 = arith.constant 0 : index
    %0 = vector.load %arg1[%c0, %c0_0, %c0_1, %c0_2] : memref<1x16x16x64xf32, #tpu.memory_space<vmem>>, vector<1x16x16x64xf32>
    %1 = vector.shape_cast %0 : vector<1x16x16x64xf32> to vector<16x16x64xf32>
    %c0_3 = arith.constant 0 : index
    %c0_4 = arith.constant 0 : index
    %2 = vector.load %arg2[%c0_3, %c0_4] : memref<1x64xf32, #tpu.memory_space<vmem>>, vector<1x64xf32>
    %3 = vector.shape_cast %2 : vector<1x64xf32> to vector<1x1x64xf32>
    %4 = vector.broadcast %3 : vector<1x1x64xf32> to vector<16x16x64xf32>
    %5 = arith.mulf %1, %4 : vector<16x16x64xf32>
    %c0_5 = arith.constant 0 : index
    %c0_6 = arith.constant 0 : index
    %6 = vector.load %arg3[%c0_5, %c0_6] : memref<1x64xf32, #tpu.memory_space<vmem>>, vector<1x64xf32>
    %7 = vector.shape_cast %6 : vector<1x64xf32> to vector<1x1x64xf32>
    %8 = vector.broadcast %7 : vector<1x1x64xf32> to vector<16x16x64xf32>
    %9 = arith.addf %5, %8 : vector<16x16x64xf32>
    %cst = arith.constant 0.000000e+00 : f32
    %10 = vector.broadcast %cst : f32 to vector<1x24x64xf32>
    %c0_7 = arith.constant 0 : index
    %c0_8 = arith.constant 0 : index
    %c0_9 = arith.constant 0 : index
    %11 = vector.load %arg13[%c0_7, %c0_8, %c0_9] : memref<19x24x64xf32, #tpu.memory_space<vmem>>, vector<1x24x64xf32>
    tpu.vector_store %arg13[%c0_7, %c0_8, %c0_9], %10 {strides = array<i32>} : memref<19x24x64xf32, #tpu.memory_space<vmem>>, vector<1x24x64xf32>,
    %cst_10 = arith.constant 0.000000e+00 : f32
    %12 = vector.broadcast %cst_10 : f32 to vector<2x24x64xf32>
    %c17 = arith.constant 17 : index
    %c0_11 = arith.constant 0 : index
    %c0_12 = arith.constant 0 : index
    %13 = vector.load %arg13[%c17, %c0_11, %c0_12] : memref<19x24x64xf32, #tpu.memory_space<vmem>>, vector<2x24x64xf32>
    tpu.vector_store %arg13[%c17, %c0_11, %c0_12], %12 {strides = array<i32>} : memref<19x24x64xf32, #tpu.memory_space<vmem>>, vector<2x24x64xf32>,
    %cst_13 = arith.constant 0.000000e+00 : f32
    %14 = vector.broadcast %cst_13 : f32 to vector<16x1x64xf32>
    %c1 = arith.constant 1 : index
    %c0_14 = arith.constant 0 : index
    %c0_15 = arith.constant 0 : index
    %15 = vector.load %arg13[%c1, %c0_14, %c0_15] : memref<19x24x64xf32, #tpu.memory_space<vmem>>, vector<16x1x64xf32>
    tpu.vector_store %arg13[%c1, %c0_14, %c0_15], %14 {strides = array<i32>} : memref<19x24x64xf32, #tpu.memory_space<vmem>>, vector<16x1x64xf32>,
    %cst_16 = arith.constant 0.000000e+00 : f32
    %16 = vector.broadcast %cst_16 : f32 to vector<16x7x64xf32>
    %c1_17 = arith.constant 1 : index
    %c17_18 = arith.constant 17 : index
    %c0_19 = arith.constant 0 : index
    %17 = vector.load %arg13[%c1_17, %c17_18, %c0_19] : memref<19x24x64xf32, #tpu.memory_space<vmem>>, vector<16x7x64xf32>
    tpu.vector_store %arg13[%c1_17, %c17_18, %c0_19], %16 {strides = array<i32>} : memref<19x24x64xf32, #tpu.memory_space<vmem>>, vector<16x7x64xf32>,
    %c1_20 = arith.constant 1 : index
    %c1_21 = arith.constant 1 : index
    %c0_22 = arith.constant 0 : index
    %18 = vector.load %arg13[%c1_20, %c1_21, %c0_22] : memref<19x24x64xf32, #tpu.memory_space<vmem>>, vector<16x16x64xf32>
    tpu.vector_store %arg13[%c1_20, %c1_21, %c0_22], %9 {strides = array<i32>} : memref<19x24x64xf32, #tpu.memory_space<vmem>>, vector<16x16x64xf32>,
    %c0_23 = arith.constant 0 : index
    %c0_24 = arith.constant 0 : index
    %c0_25 = arith.constant 0 : index
    %19 = vector.load %arg13[%c0_23, %c0_24, %c0_25] : memref<19x24x64xf32, #tpu.memory_space<vmem>>, vector<19x24x64xf32>
    %20 = vector.shape_cast %19 : vector<19x24x64xf32> to vector<456x64xf32>
    %21 = vector.extract_strided_slice %20 {offsets = [0, 0], sizes = [384, 64], strides = [1, 1]} : vector<456x64xf32> to vector<384x64xf32>
    %22 = arith.truncf %21 : vector<384x64xf32> to vector<384x64xbf16>
    %23 = vector.extract_strided_slice %20 {offsets = [1, 0], sizes = [384, 64], strides = [1, 1]} : vector<456x64xf32> to vector<384x64xf32>
    %24 = arith.truncf %23 : vector<384x64xf32> to vector<384x64xbf16>
    %25 = vector.extract_strided_slice %20 {offsets = [2, 0], sizes = [384, 64], strides = [1, 1]} : vector<456x64xf32> to vector<384x64xf32>
    %26 = arith.truncf %25 : vector<384x64xf32> to vector<384x64xbf16>
    %27 = vector.extract_strided_slice %20 {offsets = [24, 0], sizes = [384, 64], strides = [1, 1]} : vector<456x64xf32> to vector<384x64xf32>
    %28 = arith.truncf %27 : vector<384x64xf32> to vector<384x64xbf16>
    %29 = vector.extract_strided_slice %20 {offsets = [25, 0], sizes = [384, 64], strides = [1, 1]} : vector<456x64xf32> to vector<384x64xf32>
    %30 = arith.truncf %29 : vector<384x64xf32> to vector<384x64xbf16>
    %31 = vector.extract_strided_slice %20 {offsets = [26, 0], sizes = [384, 64], strides = [1, 1]} : vector<456x64xf32> to vector<384x64xf32>
    %32 = arith.truncf %31 : vector<384x64xf32> to vector<384x64xbf16>
    %33 = vector.extract_strided_slice %20 {offsets = [48, 0], sizes = [384, 64], strides = [1, 1]} : vector<456x64xf32> to vector<384x64xf32>
    %34 = arith.truncf %33 : vector<384x64xf32> to vector<384x64xbf16>
    %35 = vector.extract_strided_slice %20 {offsets = [49, 0], sizes = [384, 64], strides = [1, 1]} : vector<456x64xf32> to vector<384x64xf32>
    %36 = arith.truncf %35 : vector<384x64xf32> to vector<384x64xbf16>
    %37 = vector.extract_strided_slice %20 {offsets = [50, 0], sizes = [384, 64], strides = [1, 1]} : vector<456x64xf32> to vector<384x64xf32>
    %38 = arith.truncf %37 : vector<384x64xf32> to vector<384x64xbf16>
    %39 = tpu.concatenate %22, %24, %26, %28, %30, %32, %34, %36, %38 in 1 : vector<384x64xbf16>, vector<384x64xbf16>, vector<384x64xbf16>, vector<384x64xbf16>, vector<384x64xbf16>, vector<384x64xbf16>, vector<384x64xbf16>, vector<384x64xbf16>, vector<384x64xbf16> -> vector<384x576xbf16>
    %c0_26 = arith.constant 0 : index
    %c0_27 = arith.constant 0 : index
    %40 = vector.load %arg4[%c0_26, %c0_27] : memref<576x128xbf16, #tpu.memory_space<vmem>>, vector<576x128xbf16>
    %cst_28 = arith.constant dense<0.000000e+00> : vector<384x128xf32>
    %41 = tpu.matmul %39, %40, %cst_28 {dimension_numbers = #tpu.dot_dimension_numbers<[1], [0], [0], [1], [0, 0, 1, 1], [], []>} : vector<384x576xbf16>, vector<576x128xbf16>, vector<384x128xf32> -> vector<384x128xf32>
    %cst_29 = arith.constant 0.000000e+00 : f32
    %42 = vector.broadcast %cst_29 : f32 to vector<384x128xf32>
    %43 = arith.cmpf oge, %41, %42 : vector<384x128xf32>
    %c0_30 = arith.constant 0 : index
    %c0_31 = arith.constant 0 : index
    %44 = vector.load %arg5[%c0_30, %c0_31] : memref<1x128xf32, #tpu.memory_space<vmem>>, vector<1x128xf32>
    %45 = vector.broadcast %44 : vector<1x128xf32> to vector<384x128xf32>
    %46 = arith.mulf %45, %41 : vector<384x128xf32>
    %47 = arith.select %43, %41, %46 : vector<384x128xi1>, vector<384x128xf32>
    %48 = vector.shape_cast %47 : vector<384x128xf32> to vector<16x24x128xf32>
    %49 = vector.extract_strided_slice %48 {offsets = [0, 0, 0], sizes = [16, 16, 128], strides = [1, 1, 1]} : vector<16x24x128xf32> to vector<16x16x128xf32>
    %cst_32 = arith.constant 0.000000e+00 : f32
    %50 = vector.broadcast %cst_32 : f32 to vector<1x24x128xf32>
    %c0_33 = arith.constant 0 : index
    %c0_34 = arith.constant 0 : index
    %c0_35 = arith.constant 0 : index
    %51 = vector.load %arg14[%c0_33, %c0_34, %c0_35] : memref<22x24x128xf32, #tpu.memory_space<vmem>>, vector<1x24x128xf32>
    tpu.vector_store %arg14[%c0_33, %c0_34, %c0_35], %50 {strides = array<i32>} : memref<22x24x128xf32, #tpu.memory_space<vmem>>, vector<1x24x128xf32>,
    %cst_36 = arith.constant 0.000000e+00 : f32
    %52 = vector.broadcast %cst_36 : f32 to vector<5x24x128xf32>
    %c17_37 = arith.constant 17 : index
    %c0_38 = arith.constant 0 : index
    %c0_39 = arith.constant 0 : index
    %53 = vector.load %arg14[%c17_37, %c0_38, %c0_39] : memref<22x24x128xf32, #tpu.memory_space<vmem>>, vector<5x24x128xf32>
    tpu.vector_store %arg14[%c17_37, %c0_38, %c0_39], %52 {strides = array<i32>} : memref<22x24x128xf32, #tpu.memory_space<vmem>>, vector<5x24x128xf32>,
    %cst_40 = arith.constant 0.000000e+00 : f32
    %54 = vector.broadcast %cst_40 : f32 to vector<16x1x128xf32>
    %c1_41 = arith.constant 1 : index
    %c0_42 = arith.constant 0 : index
    %c0_43 = arith.constant 0 : index
    %55 = vector.load %arg14[%c1_41, %c0_42, %c0_43] : memref<22x24x128xf32, #tpu.memory_space<vmem>>, vector<16x1x128xf32>
    tpu.vector_store %arg14[%c1_41, %c0_42, %c0_43], %54 {strides = array<i32>} : memref<22x24x128xf32, #tpu.memory_space<vmem>>, vector<16x1x128xf32>,
    %cst_44 = arith.constant 0.000000e+00 : f32
    %56 = vector.broadcast %cst_44 : f32 to vector<16x7x128xf32>
    %c1_45 = arith.constant 1 : index
    %c17_46 = arith.constant 17 : index
    %c0_47 = arith.constant 0 : index
    %57 = vector.load %arg14[%c1_45, %c17_46, %c0_47] : memref<22x24x128xf32, #tpu.memory_space<vmem>>, vector<16x7x128xf32>
    tpu.vector_store %arg14[%c1_45, %c17_46, %c0_47], %56 {strides = array<i32>} : memref<22x24x128xf32, #tpu.memory_space<vmem>>, vector<16x7x128xf32>,
    %c1_48 = arith.constant 1 : index
    %c1_49 = arith.constant 1 : index
    %c0_50 = arith.constant 0 : index
    %58 = vector.load %arg14[%c1_48, %c1_49, %c0_50] : memref<22x24x128xf32, #tpu.memory_space<vmem>>, vector<16x16x128xf32>
    tpu.vector_store %arg14[%c1_48, %c1_49, %c0_50], %49 {strides = array<i32>} : memref<22x24x128xf32, #tpu.memory_space<vmem>>, vector<16x16x128xf32>,
    %c0_51 = arith.constant 0 : index
    %c0_52 = arith.constant 0 : index
    %c0_53 = arith.constant 0 : index
    %59 = vector.load %arg14[%c0_51, %c0_52, %c0_53] : memref<22x24x128xf32, #tpu.memory_space<vmem>>, vector<22x24x128xf32>
    %60 = vector.shape_cast %59 : vector<22x24x128xf32> to vector<11x2x24x128xf32>
    %61 = vector.extract_strided_slice %60 {offsets = [0, 0, 0, 0], sizes = [9, 1, 24, 128], strides = [1, 1, 1, 1]} : vector<11x2x24x128xf32> to vector<9x1x24x128xf32>
    %62 = vector.shape_cast %61 : vector<9x1x24x128xf32> to vector<9x24x128xf32>
    %63 = vector.shape_cast %62 : vector<9x24x128xf32> to vector<216x128xf32>
    %64 = vector.extract_strided_slice %63 {offsets = [0, 0], sizes = [192, 128], strides = [1, 1]} : vector<216x128xf32> to vector<192x128xf32>
    %65 = arith.truncf %64 : vector<192x128xf32> to vector<192x128xbf16>
    %66 = vector.extract_strided_slice %63 {offsets = [1, 0], sizes = [192, 128], strides = [1, 1]} : vector<216x128xf32> to vector<192x128xf32>
    %67 = arith.truncf %66 : vector<192x128xf32> to vector<192x128xbf16>
    %68 = vector.extract_strided_slice %63 {offsets = [2, 0], sizes = [192, 128], strides = [1, 1]} : vector<216x128xf32> to vector<192x128xf32>
    %69 = arith.truncf %68 : vector<192x128xf32> to vector<192x128xbf16>
    %70 = vector.extract_strided_slice %60 {offsets = [0, 1, 0, 0], sizes = [9, 1, 24, 128], strides = [1, 1, 1, 1]} : vector<11x2x24x128xf32> to vector<9x1x24x128xf32>
    %71 = vector.shape_cast %70 : vector<9x1x24x128xf32> to vector<9x24x128xf32>
    %72 = vector.shape_cast %71 : vector<9x24x128xf32> to vector<216x128xf32>
    %73 = vector.extract_strided_slice %72 {offsets = [0, 0], sizes = [192, 128], strides = [1, 1]} : vector<216x128xf32> to vector<192x128xf32>
    %74 = arith.truncf %73 : vector<192x128xf32> to vector<192x128xbf16>
    %75 = vector.extract_strided_slice %72 {offsets = [1, 0], sizes = [192, 128], strides = [1, 1]} : vector<216x128xf32> to vector<192x128xf32>
    %76 = arith.truncf %75 : vector<192x128xf32> to vector<192x128xbf16>
    %77 = vector.extract_strided_slice %72 {offsets = [2, 0], sizes = [192, 128], strides = [1, 1]} : vector<216x128xf32> to vector<192x128xf32>
    %78 = arith.truncf %77 : vector<192x128xf32> to vector<192x128xbf16>
    %79 = vector.extract_strided_slice %60 {offsets = [1, 0, 0, 0], sizes = [9, 1, 24, 128], strides = [1, 1, 1, 1]} : vector<11x2x24x128xf32> to vector<9x1x24x128xf32>
    %80 = vector.shape_cast %79 : vector<9x1x24x128xf32> to vector<9x24x128xf32>
    %81 = vector.shape_cast %80 : vector<9x24x128xf32> to vector<216x128xf32>
    %82 = vector.extract_strided_slice %81 {offsets = [0, 0], sizes = [192, 128], strides = [1, 1]} : vector<216x128xf32> to vector<192x128xf32>
    %83 = arith.truncf %82 : vector<192x128xf32> to vector<192x128xbf16>
    %84 = vector.extract_strided_slice %81 {offsets = [1, 0], sizes = [192, 128], strides = [1, 1]} : vector<216x128xf32> to vector<192x128xf32>
    %85 = arith.truncf %84 : vector<192x128xf32> to vector<192x128xbf16>
    %86 = vector.extract_strided_slice %81 {offsets = [2, 0], sizes = [192, 128], strides = [1, 1]} : vector<216x128xf32> to vector<192x128xf32>
    %87 = arith.truncf %86 : vector<192x128xf32> to vector<192x128xbf16>
    %88 = tpu.concatenate %65, %67, %69, %74, %76, %78, %83, %85, %87 in 1 : vector<192x128xbf16>, vector<192x128xbf16>, vector<192x128xbf16>, vector<192x128xbf16>, vector<192x128xbf16>, vector<192x128xbf16>, vector<192x128xbf16>, vector<192x128xbf16>, vector<192x128xbf16> -> vector<192x1152xbf16>
    %c0_54 = arith.constant 0 : index
    %c0_55 = arith.constant 0 : index
    %89 = vector.load %arg6[%c0_54, %c0_55] : memref<1152x128xbf16, #tpu.memory_space<vmem>>, vector<1152x128xbf16>
    %cst_56 = arith.constant dense<0.000000e+00> : vector<192x128xf32>
    %90 = tpu.matmul %88, %89, %cst_56 {dimension_numbers = #tpu.dot_dimension_numbers<[1], [0], [0], [1], [0, 0, 1, 1], [], []>} : vector<192x1152xbf16>, vector<1152x128xbf16>, vector<192x128xf32> -> vector<192x128xf32>
    %c0_57 = arith.constant 0 : index
    %c0_58 = arith.constant 0 : index
    %91 = vector.load %arg7[%c0_57, %c0_58] : memref<1x128xf32, #tpu.memory_space<vmem>>, vector<1x128xf32>
    %92 = vector.broadcast %91 : vector<1x128xf32> to vector<192x128xf32>
    %93 = arith.mulf %90, %92 : vector<192x128xf32>
    %c0_59 = arith.constant 0 : index
    %c0_60 = arith.constant 0 : index
    %94 = vector.load %arg8[%c0_59, %c0_60] : memref<1x128xf32, #tpu.memory_space<vmem>>, vector<1x128xf32>
    %95 = vector.broadcast %94 : vector<1x128xf32> to vector<192x128xf32>
    %96 = arith.addf %93, %95 : vector<192x128xf32>
    %97 = vector.shape_cast %96 : vector<192x128xf32> to vector<8x24x128xf32>
    %98 = vector.extract_strided_slice %97 {offsets = [0, 0, 0], sizes = [8, 16, 128], strides = [1, 1, 1]} : vector<8x24x128xf32> to vector<8x16x128xf32>
    %99 = vector.shape_cast %1 : vector<16x16x64xf32> to vector<8x2x16x64xf32>
    %100 = vector.extract_strided_slice %99 {offsets = [0, 0, 0, 0], sizes = [8, 1, 16, 64], strides = [1, 1, 1, 1]} : vector<8x2x16x64xf32> to vector<8x1x16x64xf32>
    %101 = vector.shape_cast %100 : vector<8x1x16x64xf32> to vector<8x16x64xf32>
    %102 = vector.shape_cast %101 : vector<8x16x64xf32> to vector<128x64xf32>
    %103 = arith.truncf %102 : vector<128x64xf32> to vector<128x64xbf16>
    %c0_61 = arith.constant 0 : index
    %c0_62 = arith.constant 0 : index
    %104 = vector.load %arg9[%c0_61, %c0_62] : memref<64x128xbf16, #tpu.memory_space<vmem>>, vector<64x128xbf16>
    %cst_63 = arith.constant dense<0.000000e+00> : vector<128x128xf32>
    %105 = tpu.matmul %103, %104, %cst_63 {dimension_numbers = #tpu.dot_dimension_numbers<[1], [0], [0], [1], [0, 0, 1, 1], [], []>} : vector<128x64xbf16>, vector<64x128xbf16>, vector<128x128xf32> -> vector<128x128xf32>
    %c0_64 = arith.constant 0 : index
    %c0_65 = arith.constant 0 : index
    %106 = vector.load %arg10[%c0_64, %c0_65] : memref<1x128xf32, #tpu.memory_space<vmem>>, vector<1x128xf32>
    %107 = vector.broadcast %106 : vector<1x128xf32> to vector<128x128xf32>
    %108 = arith.mulf %105, %107 : vector<128x128xf32>
    %c0_66 = arith.constant 0 : index
    %c0_67 = arith.constant 0 : index
    %109 = vector.load %arg11[%c0_66, %c0_67] : memref<1x128xf32, #tpu.memory_space<vmem>>, vector<1x128xf32>
    %110 = vector.broadcast %109 : vector<1x128xf32> to vector<128x128xf32>
    %111 = arith.addf %108, %110 : vector<128x128xf32>
    %112 = vector.shape_cast %111 : vector<128x128xf32> to vector<8x16x128xf32>
    %113 = arith.addf %98, %112 : vector<8x16x128xf32>
    %c0_68 = arith.constant 0 : index
    %c0_69 = arith.constant 0 : index
    %c0_70 = arith.constant 0 : index
    %c0_71 = arith.constant 0 : index
    %114 = vector.load %arg12[%c0_68, %c0_69, %c0_70, %c0_71] : memref<1x8x16x128xf32, #tpu.memory_space<vmem>>, vector<1x8x16x128xf32>
    %115 = vector.shape_cast %114 : vector<1x8x16x128xf32> to vector<8x16x128xf32>
    %116 = vector.shape_cast %113 : vector<8x16x128xf32> to vector<1x8x16x128xf32>
    tpu.vector_store %arg12[%c0_68, %c0_69, %c0_70, %c0_71], %116 {strides = array<i32>} : memref<1x8x16x128xf32, #tpu.memory_space<vmem>>, vector<1x8x16x128xf32>,
    return
  }
  func.func @transform_0(%arg0: i32) -> (i32, i32, i32, i32) {
    %c0_i32 = arith.constant 0 : i32
    %c0_i32_0 = arith.constant 0 : i32
    %c0_i32_1 = arith.constant 0 : i32
    %c0_i32_2 = arith.constant 0 : i32
    return %arg0, %c0_i32, %c0_i32_0, %c0_i32_1 : i32, i32, i32, i32
  }
  func.func @transform_1(%arg0: i32) -> (i32, i32) {
    %c0_i32 = arith.constant 0 : i32
    %c0_i32_0 = arith.constant 0 : i32
    %c0_i32_1 = arith.constant 0 : i32
    return %c0_i32, %c0_i32_0 : i32, i32
  }
  func.func @transform_2(%arg0: i32) -> (i32, i32) {
    %c0_i32 = arith.constant 0 : i32
    %c0_i32_0 = arith.constant 0 : i32
    %c0_i32_1 = arith.constant 0 : i32
    return %c0_i32, %c0_i32_0 : i32, i32
  }
  func.func @transform_3(%arg0: i32) -> (i32, i32) {
    %c0_i32 = arith.constant 0 : i32
    %c0_i32_0 = arith.constant 0 : i32
    %c0_i32_1 = arith.constant 0 : i32
    return %c0_i32, %c0_i32_0 : i32, i32
  }
  func.func @transform_4(%arg0: i32) -> (i32, i32) {
    %c0_i32 = arith.constant 0 : i32
    %c0_i32_0 = arith.constant 0 : i32
    %c0_i32_1 = arith.constant 0 : i32
    return %c0_i32, %c0_i32_0 : i32, i32
  }
  func.func @transform_5(%arg0: i32) -> (i32, i32) {
    %c0_i32 = arith.constant 0 : i32
    %c0_i32_0 = arith.constant 0 : i32
    %c0_i32_1 = arith.constant 0 : i32
    return %c0_i32, %c0_i32_0 : i32, i32
  }
  func.func @transform_6(%arg0: i32) -> (i32, i32) {
    %c0_i32 = arith.constant 0 : i32
    %c0_i32_0 = arith.constant 0 : i32
    %c0_i32_1 = arith.constant 0 : i32
    return %c0_i32, %c0_i32_0 : i32, i32
  }
  func.func @transform_7(%arg0: i32) -> (i32, i32) {
    %c0_i32 = arith.constant 0 : i32
    %c0_i32_0 = arith.constant 0 : i32
    %c0_i32_1 = arith.constant 0 : i32
    return %c0_i32, %c0_i32_0 : i32, i32
  }
  func.func @transform_8(%arg0: i32) -> (i32, i32) {
    %c0_i32 = arith.constant 0 : i32
    %c0_i32_0 = arith.constant 0 : i32
    %c0_i32_1 = arith.constant 0 : i32
    return %c0_i32, %c0_i32_0 : i32, i32
  }
  func.func @transform_9(%arg0: i32) -> (i32, i32) {
    %c0_i32 = arith.constant 0 : i32
    %c0_i32_0 = arith.constant 0 : i32
    %c0_i32_1 = arith.constant 0 : i32
    return %c0_i32, %c0_i32_0 : i32, i32
  }
  func.func @transform_10(%arg0: i32) -> (i32, i32) {
    %c0_i32 = arith.constant 0 : i32
    %c0_i32_0 = arith.constant 0 : i32
    %c0_i32_1 = arith.constant 0 : i32
    return %c0_i32, %c0_i32_0 : i32, i32
  }
  func.func @transform_11(%arg0: i32) -> (i32, i32, i32, i32) {
    %c0_i32 = arith.constant 0 : i32
    %c0_i32_0 = arith.constant 0 : i32
    %c0_i32_1 = arith.constant 0 : i32
    %c0_i32_2 = arith.constant 0 : i32
    return %arg0, %c0_i32, %c0_i32_0, %c0_i32_1 : i32, i32, i32, i32
  }
}

</mosaic_0001>

<bundles_post_ra>
// kernel: bottleneck_ir_forward.1
= control target key start
LH: loop header
LB: loop body
LE: loop exit
PB: predicated region body
PF: predicated region fallthrough
CT: control target
= control target key end

     0   :  { %s8406_s0 = inlined_call_operand.hbm [shape: f32[2,16,16,64], index: 0, kind: input, shape index: {}]   ;;  %s8407_s1 = inlined_call_operand.vmem [shape: f32[1,64], index: 1, kind: input, shape index: {}]   ;;  %s8408_s2 = inlined_call_operand.vmem [shape: f32[1,64], index: 2, kind: input, shape index: {}]   ;;  %s8409_s3 = inlined_call_operand.hbm [shape: bf16[576,128], index: 3, kind: input, shape index: {}]   ;;  %s8410_s4 = inlined_call_operand.vmem [shape: f32[1,128], index: 4, kind: input, shape index: {}]   ;;  %s8411_s5 = inlined_call_operand.hbm [shape: bf16[1152,128], index: 5, kind: input, shape index: {}]   ;;  %s8412_s6 = inlined_call_operand.vmem [shape: f32[1,128], index: 6, kind: input, shape index: {}]   ;;  %s8413_s7 = inlined_call_operand.vmem [shape: f32[1,128], index: 7, kind: input, shape index: {}]   ;;  %s8414_s8 = inlined_call_operand.hbm [shape: bf16[64,128], index: 8, kind: input, shape index: {}]   ;;  %s8415_s9 = inlined_call_operand.vmem [shape: f32[1,128], index: 9, kind: input, shape index: {}]   ;;  %s8416_s10 = inlined_call_operand.vmem [shape: f32[1,128], index: 10, kind: input, shape index: {}]   ;;  %s8417_s11 = inlined_call_operand.vmem [shape: f32[2,8,16,128], index: 11, kind: output, shape index: {}]  }
   0x1   :  { %8450 = sst [smem:[#allocation30_spill]] %s8409_s3 }
   0x2   :  { %16 = vsyncpa [#allocation5], 0 }
   0x3   :  { %18 = vsyncpa [#allocation5 + $0x1], 0 }
   0x4   :  { %19 = vsyncpa [#allocation7], 0 }
   0x5   :  { %20 = vsyncpa [#allocation10], 0  ;;  %s6186_s17 = smov 0   ;;  %s6188_s18 = smov 0  }
   0x6   :  { %s6190_s19 = smov 0   ;;  %s6192_s20 = smov 0  }
   0x7 LB: > { %s6205_s21 = sadd.s32 4294967295, %s6113_s20   ;;  %p46_p0 = scmp.ne.s32.totalorder %s6105_s18, %s6101_s17  ;;  %s6113_s20 = sphi %s6192_s20, %s8503_s20   ;;  %s6109_s19 = sphi %s6190_s19, %s8502_s19   ;;  %s6105_s18 = sphi %s6188_s18, %s8501_s18   ;;  %s6101_s17 = sphi %s6186_s17, %s8500_s17  }
   0x8   : > { %p8418_p1 = scmp.eq.s32.totalorder %s6205_s21, 0  ;;  %p5055_p2 = scmp.ge.s32.totalorder %s6113_s20, 1 }
   0x9   : > { %p293_p3 = scmp.lt.s32.totalorder %s6113_s20, 3  ;;  %s6115_s24 = smov [#allocation6]  }
   0xa   : > { %p6213_p4 = por %p8418_p1, %p46_p0  ;;  %s311_s25 = sshll.u32 %s6115_s24, 4  ;;  %s312_s25 = int_to_ptr.vmem [resolvable:$true] %s311_s25 }
   0xb   : > { %p6217_p5 = pnand %p5055_p2, %p293_p3  ;;  %s6116_s27 = smov [#allocation8]  }
   0xc   : > { %s8451_s22 = scalar_select %p6213_p4, 1, 0 }
   0xd   : > { %s8452_s23 = scalar_select %p6217_p5, 1, 0 }
   0xe   : > { %p5771_p6 = pneg %p6217_p5  ;;  %s327_s28 = sshll.u32 %s6116_s27, 4  ;;  %s328_s28 = int_to_ptr.vmem [resolvable:$true] %s327_s28 }
   0xf   : > { %s6117_s29 = smov [#allocation9]   ;;  %s5976_s12 = scalar_lea.vmem %s312_s25, 4608 }
  0x10   : > { %p6225_p7 = pnand %p5771_p6, %p8418_p1  ;;  %s346_s30 = sshll.u32 %s6117_s29, 4  ;;  %s347_s30 = int_to_ptr.vmem [resolvable:$true] %s346_s30 }
  0x11   : > { %p5977_p9 = scmp.ne.s32.totalorder %s312_s25, %s5976_s12  ;;  %p5984_p12 = scmp.lt.s32.totalorder %s312_s25, %s312_s25 }
  0x12   : > { %p5967_p8 = pneg %p6225_p7  ;;  %p5985_p13 = scmp.lt.s32.totalorder %s5976_s12, %s5976_s12 }
  0x14   : > { %p5979_p10 = pnand %p5977_p9, %p5967_p8  ;;  %p5986_p0 = por %p5985_p13, %p5984_p12 }
  0x16   : > { %p5980_p11 = pneg %p5979_p10 }
  0x18   : > { %p5987_p2 = pnand %p5986_p0, %p5980_p11 }
  0x1a   : > { %5990 = shalt.err (!%p5987_p2)
}
  0x1b   : > { %s6118_s13 = smov 64   ;;  %s6119_s14 = smov 4  }
  0x1c   : > { %s8454_s3 = sld [smem:[#allocation30_spill]]  ;;  %s6002_s17 = scalar_lea.vmem %s328_s28, 9216 }
  0x1d   : > { %p6003_p3 = scmp.ne.s32.totalorder %s328_s28, %s6002_s17  ;;  %p6010_p10 = scmp.lt.s32.totalorder %s328_s28, %s328_s28 }
  0x1e   : > { %p6011_p1 = scmp.lt.s32.totalorder %s6002_s17, %s6002_s17 }
  0x1f   : > { %p6005_p6 = pnand %p6003_p3, %p5967_p8 }
  0x20   : > { %p6012_p12 = por %p6011_p1, %p6010_p10 }
  0x21   : > { %p6006_p9 = pneg %p6005_p6 }
  0x22   : > { %5774 = dma.hbm_to_vmem [thread:$0]  (!%p6225_p7), %s8454_s3, 4608, %s312_s25, [#allocation7], %s6118_s13, %s6118_s13, %s6119_s14  }
  0x23   : > { %p6013_p11 = pnand %p6012_p12, %p6006_p9 }
  0x25   : > { %6016 = shalt.err (!%p6013_p11)
}
  0x26   : > { %5777 = dma.hbm_to_vmem [thread:$0]  (!%p6225_p7), %s8411_s5, 9216, %s328_s28, [#allocation7], %s6118_s13, %s6118_s13, %s6119_s14  }
  0x27   : > { %s6028_s25 = scalar_lea.vmem %s347_s30, 512  ;;  %p6036_p3 = scmp.lt.s32.totalorder %s347_s30, %s347_s30 }
  0x28   : > { %p6029_p13 = scmp.ne.s32.totalorder %s347_s30, %s6028_s25  ;;  %p6037_p6 = scmp.lt.s32.totalorder %s6028_s25, %s6028_s25 }
  0x2a   : > { %p6031_p0 = pnand %p6029_p13, %p5967_p8  ;;  %p6038_p4 = por %p6037_p6, %p6036_p3 }
  0x2c   : > { %p6032_p2 = pneg %p6031_p0 }
  0x2e   : > { %p6039_p1 = pnand %p6038_p4, %p6032_p2 }
  0x30   : > { %6042 = shalt.err (!%p6039_p1)
}
  0x31   : > { %5780 = dma.hbm_to_vmem [thread:$0]  (!%p6225_p7), %s8414_s8, 512, %s347_s30, [#allocation10], %s6118_s13, %s6118_s13, %s6119_s14  }
  0x32   : > { %s6256_s28 = sadd.s32 1, %s6113_s20   ;;  %s33_s16 = sadd.s32 1, %s6109_s19 }
  0x33   : > { %s30_s15 = ssub.s32 %s6113_s20, %s6256_s28  ;;  %p40_p8 = scmp.ne.s32.totalorder %s6109_s19, %s6105_s18 }
  0x34   : > { %p31_p4 = scmp.eq.s32.totalorder %s30_s15, 0  ;;  %p41_p9 = scmp.eq.s32.totalorder %s6113_s20, 0 }
  0x35   : > { %p5788_p10 = scmp.lt.s32.totalorder %s6113_s20, 2  ;;  %s366_s17 = sand.u32 1, %s6109_s19  }
  0x36   : > { %s6266_s26 = scalar_select %p31_p4, %s6109_s19, %s33_s16  }
  0x37   : > { %p42_p12 = por %p41_p9, %p40_p8  ;;  %s5060_s24 = sshll.u32 %s366_s17, 8 }
  0x38   : > { %s5223_s27 = sshll.u32 %s6113_s20, 12  ;;  %s370_s30 = scalar_lea.vmem [#allocation4], %s5060_s24 }
  0x39   : > { %s6273_s12 = scalar_lea.hbm %s8406_s0, %s5223_s27  ;;  %s377_s13 = sshll.u32 %s370_s30, 4  ;;  %s6275_s13 = int_to_ptr.vmem [resolvable:$true] %s377_s13 }
  0x3a   : > { %p6277_p7 = pnand %p5788_p10, %p42_p12  ;;  %s6281_s15 = scalar_lea.sflag [#allocation5], %s366_s17 }
  0x3b   : > { %s6043_s20 = scalar_lea.hbm %s6273_s12, 4096  ;;  %s6048_s24 = scalar_lea.hbm %s8406_s0, 8192 }
  0x3c   : > { %p6044_p11 = scmp.ne.s32.totalorder %s6273_s12, %s6043_s20  ;;  %p6045_p13 = pneg %p6277_p7 }
  0x3d   : > { %p6049_p3 = scmp.lt.s32.totalorder %s6273_s12, %s8406_s0  ;;  %p6050_p6 = scmp.lt.s32.totalorder %s6048_s24, %s6043_s20 }
  0x3e   : > { %p6046_p0 = pnand %p6045_p13, %p6044_p11 }
  0x3f   : > { %p6051_p1 = por %p6050_p6, %p6049_p3 }
  0x40   : > { %p6047_p2 = pneg %p6046_p0 }
  0x42   : > { %p6052_p4 = pnand %p6051_p1, %p6047_p2 }
  0x44   : > { %6055 = shalt.err (!%p6052_p4)
}
  0x45   : > { %s6056_s17 = scalar_lea.vmem %s6275_s13, 4096  ;;  %s6120_s30 = smov [#allocation4]  }
  0x46   : > { %p6057_p8 = scmp.ne.s32.totalorder %s6275_s13, %s6056_s17  ;;  %s6061_s3 = sshll.u32 %s6120_s30, 4  ;;  %s6062_s3 = int_to_ptr.vmem [resolvable:$false] %s6061_s3 }
  0x47   : > { %s6063_s16 = scalar_lea.vmem %s6062_s3, 8192  ;;  %p6064_p12 = scmp.lt.s32.totalorder %s6275_s13, %s6062_s3 }
  0x48   : > { %p6059_p9 = pnand %p6057_p8, %p6045_p13  ;;  %p6065_p11 = scmp.lt.s32.totalorder %s6063_s16, %s6056_s17 }
  0x4a   : > { %p6060_p10 = pneg %p6059_p9  ;;  %p6066_p0 = por %p6065_p11, %p6064_p12 }
  0x4c   : > { %p6067_p5 = pnand %p6066_p0, %p6060_p10 }
  0x4e   : > { %6070 = shalt.err (!%p6067_p5)
}
  0x4f   : > { %s6121_s20 = smov 128   ;;  %s6122_s27 = smov 8  }
  0x50   : > { %5784 = dma.hbm_to_vmem [thread:$0]  (!%p6277_p7), %s6273_s12, 4096, %s6275_s13, %s6281_s15, %s6121_s20, %s6121_s20, %s6122_s27  }
  0x51   : > { %p8456_p13 = scmp.ne.s32.totalorder %s8452_s23, 0 }
  0x53   : > { %389 = sbr.rel (%p8456_p13) target bundleno = 1149 (0x47d), region = 64 }
  0x58   : > { %s391_s24 = sand.u32 1, %s6105_s18   ;;  %p8457_p2 = scmp.ne.s32.totalorder %s8451_s22, 0 }
  0x59   : > { %s5064_s25 = sshll.u32 %s391_s24, 8  ;;  %s392_s3 = scalar_lea.sflag [#allocation5], %s391_s24 }
  0x5a   : > { %s6305_s29 = scalar_lea.vmem [#allocation4], %s5064_s25 }
  0x5b   : > { %6088 = dma.done.wait (%p8457_p2), %s392_s3, 4096  }
  0x5c   : > { %6090 = vsyncadd (%p8457_p2), %s392_s3, 4294963200  ;;  %p8458_p5 = scmp.eq.s32.totalorder %s6205_s21, 0 }
  0x5e   : > { %6092 = dma.done.wait (%p8458_p5), [#allocation7], 13824   ;;  %p8459_p7 = pmov %p8458_p5 }
  0x5f   : > { %p8460_p3 = pmov %p8458_p5 }
  0x60   : > { %6094 = vsyncadd (%p8459_p7), [#allocation7], 4294953472 }
  0x61   : > { %6096 = dma.done.wait (%p8460_p3), [#allocation10], 512   ;;  %p8461_p6 = pmov %p8460_p3 }
  0x62   : > { %vm562_vm0 = vcmask 523264   ;;  %vm574_vm1 = vcmask 516096   ;;  %v6123_v0 = vmov 0.0   ;;  %vm591_vm2 = vcmask 522240   ;;  %v452_v2 = vld [vmem:[%s6305_s29] sm:$0xff]  ;;  %v453_v3 = vld [vmem:[%s6305_s29 + $0x8] sm:$0xff] }
  0x63   : > { %6098 = vsyncadd (%p8461_p6), [#allocation10], 4294966784  ;;  %2835 = vst [vmem:[#allocation3 + $0x1a0] sm:$0xff] %v6123_v0  ;;  %v6124_v1 = vmov 0   ;;  %v6437_v4 = vld [vmem:[%s8407_s1] ss:$0 sm:$0xff] }
  0x64   : > { %563 = vst.msk [vmem:[#allocation2] sm:$0xff] %vm562_vm0, %v6123_v0  ;;  %564 = vst.msk [vmem:[#allocation2 + $0x8] sm:$0xff] %vm562_vm0, %v6123_v0  ;;  %2100 = vmatprep.subr.bf16.mxu0 %v6124_v1  ;;  %2309 = vmatprep.subr.bf16.mxu1 %v6124_v1  ;;  %v491_v5 = vmul.f32 %v6437_v4, %v452_v2  ;;  %v492_v6 = vmul.f32 %v6437_v4, %v453_v3  ;;  %v6444_v7 = vld [vmem:[%s8408_s2] ss:$0 sm:$0xff]  ;;  %v454_v8 = vld [vmem:[%s6305_s29 + $0x10] sm:$0xff]  ;;  %s6125_s14 = smov 64  }
  0x65   : > { %565 = vst.msk [vmem:[#allocation2 + $0x10] sm:$0xff] %vm562_vm0, %v6123_v0  ;;  %567 = vst.msk [vmem:[#allocation2 + $0x198] sm:$0xff] %vm562_vm0, %v6123_v0  ;;  %v493_v9 = vmul.f32 %v6437_v4, %v454_v8  ;;  %v455_v12 = vld [vmem:[%s6305_s29 + $0x18] sm:$0xff]  ;;  %v456_v17 = vld [vmem:[%s6305_s29 + $0x20] sm:$0xff]  ;;  %vm749_vm3 = vsmask.f32 7424 }
  0x66   : > { %568 = vst.msk [vmem:[#allocation2 + $0x1a0] sm:$0xff] %vm562_vm0, %v6123_v0  ;;  %569 = vst.msk [vmem:[#allocation2 + $0x1a8] sm:$0xff] %vm562_vm0, %v6123_v0  ;;  %v530_v13 = vadd.f32 %v6444_v7, %v491_v5  ;;  %v531_v14 = vadd.f32 %v6444_v7, %v492_v6  ;;  %v494_v16 = vmul.f32 %v6437_v4, %v455_v12  ;;  %v457_v18 = vld [vmem:[%s6305_s29 + $0x28] sm:$0xff]  ;;  %v458_v19 = vld [vmem:[%s6305_s29 + $0x30] sm:$0xff]  ;;  %vm1019_vm4 = vcmask 1046528   ;;  %p446_p1 = scmp.lt.s32.totalorder %s6205_s21, 1 }
  0x67   : > { %570 = vst.msk [vmem:[#allocation2 + $0x1b0] sm:$0xff] %vm562_vm0, %v6123_v0  ;;  %2850 = vst [vmem:[#allocation3 + $0x18] sm:$0x1] %v6123_v0  ;;  %v532_v20 = vadd.f32 %v6444_v7, %v493_v9  ;;  %v495_v21 = vmul.f32 %v6437_v4, %v456_v17  ;;  %v496_v22 = vmul.f32 %v6437_v4, %v457_v18  ;;  %v459_v24 = vld [vmem:[%s6305_s29 + $0x38] sm:$0xff]  ;;  %v460_v25 = vld [vmem:[%s6305_s29 + $0x40] sm:$0xff] }
  0x68   : > { %2851 = vst [vmem:[#allocation3 + $0x30] sm:$0x1] %v6123_v0  ;;  %2852 = vst [vmem:[#allocation3 + $0x48] sm:$0x1] %v6123_v0  ;;  %v497_v23 = vmul.f32 %v6437_v4, %v458_v19  ;;  %v461_v26 = vld [vmem:[%s6305_s29 + $0x48] sm:$0xff]  ;;  %v533_v29 = vadd.f32 %v6444_v7, %v494_v16  ;;  %v498_v30 = vmul.f32 %v6437_v4, %v459_v24  ;;  %v462_v31 = vld [vmem:[%s6305_s29 + $0x50] sm:$0xff] }
  0x69   : > { %2853 = vst [vmem:[#allocation3 + $0x60] sm:$0x1] %v6123_v0  ;;  %2854 = vst [vmem:[#allocation3 + $0x78] sm:$0x1] %v6123_v0  ;;  %v463_v32 = vld [vmem:[%s6305_s29 + $0x58] sm:$0xff]  ;;  %v464_v33 = vld [vmem:[%s6305_s29 + $0x60] sm:$0xff]  ;;  %v534_v34 = vadd.f32 %v6444_v7, %v495_v21  ;;  %v535_v35 = vadd.f32 %v6444_v7, %v496_v22  ;;  %v499_v37 = vmul.f32 %v6437_v4, %v460_v25 }
  0x6a   : > { %2855 = vst [vmem:[#allocation3 + $0x90] sm:$0x1] %v6123_v0  ;;  %2856 = vst [vmem:[#allocation3 + $0xa8] sm:$0x1] %v6123_v0  ;;  %v536_v36 = vadd.f32 %v6444_v7, %v497_v23  ;;  %v465_v38 = vld [vmem:[%s6305_s29 + $0x68] sm:$0xff]  ;;  %v466_v39 = vld [vmem:[%s6305_s29 + $0x70] sm:$0xff]  ;;  %v537_v42 = vadd.f32 %v6444_v7, %v498_v30  ;;  %v500_v43 = vmul.f32 %v6437_v4, %v461_v26 }
  0x6b   : > { %2857 = vst [vmem:[#allocation3 + $0xc0] sm:$0x1] %v6123_v0  ;;  %2858 = vst [vmem:[#allocation3 + $0xd8] sm:$0x1] %v6123_v0  ;;  %v640_v10 = vld [vmem:[#allocation2] sm:$0xff]  ;;  %v641_v11 = vld [vmem:[#allocation2 + $0x8] sm:$0xff]  ;;  %v501_v44 = vmul.f32 %v6437_v4, %v462_v31  ;;  %v538_v49 = vadd.f32 %v6444_v7, %v499_v37  ;;  %v502_v50 = vmul.f32 %v6437_v4, %v463_v32 }
  0x6c   : > { %2859 = vst [vmem:[#allocation3 + $0xf0] sm:$0x1] %v6123_v0  ;;  %2860 = vst [vmem:[#allocation3 + $0x108] sm:$0x1] %v6123_v0  ;;  %v6451_v15 = vpack.c.bf16 %v641_v11, %v640_v10  ;;  %v467_v40 = vld [vmem:[%s6305_s29 + $0x78] sm:$0xff]  ;;  %v468_v45 = vld [vmem:[%s6305_s29 + $0x80] sm:$0xff]  ;;  %v503_v51 = vmul.f32 %v6437_v4, %v464_v33  ;;  %v504_v52 = vmul.f32 %v6437_v4, %v465_v38 }
  0x6d   : > { %2861 = vst [vmem:[#allocation3 + $0x120] sm:$0x1] %v6123_v0  ;;  %2862 = vst [vmem:[#allocation3 + $0x138] sm:$0x1] %v6123_v0  ;;  %v469_v46 = vld [vmem:[%s6305_s29 + $0x88] sm:$0xff]  ;;  %v470_v47 = vld [vmem:[%s6305_s29 + $0x90] sm:$0xff]  ;;  %v539_v54 = vadd.f32 %v6444_v7, %v500_v43  ;;  %v540_v55 = vadd.f32 %v6444_v7, %v501_v44  ;;  %v505_v56 = vmul.f32 %v6437_v4, %v466_v39 }
  0x6e   : > { %2863 = vst [vmem:[#allocation3 + $0x150] sm:$0x1] %v6123_v0  ;;  %2864 = vst [vmem:[#allocation3 + $0x168] sm:$0x1] %v6123_v0  ;;  %v751_v27 = vshrl.u32 %v6451_v15, 16  ;;  %v753_v28 = vshll.u32 %v6451_v15, 16  ;;  %v541_v58 = vadd.f32 %v6444_v7, %v502_v50  ;;  %v542_v59 = vadd.f32 %v6444_v7, %v503_v51 }
  0x6f   : > { %2865 = vst [vmem:[#allocation3 + $0x180] sm:$0x1] %v6123_v0  ;;  %2866 = vst [vmem:[#allocation3 + $0x29] sm:$0x7f] %v6123_v0  ;;  %v642_v48 = vld [vmem:[#allocation2 + $0x10] sm:$0xff]  ;;  %v5835_v57 = vld [vmem:[#allocation6 + $0x30] sm:$0xff]   ;;  %v543_v60 = vadd.f32 %v6444_v7, %v504_v52  ;;  %v506_v61 = vmul.f32 %v6437_v4, %v467_v40  ;;  %v544_v63 = vadd.f32 %v6444_v7, %v505_v56 }
  0x70   : > { %2867 = vst [vmem:[#allocation3 + $0x41] sm:$0x7f] %v6123_v0  ;;  %2868 = vst [vmem:[#allocation3 + $0x59] sm:$0x7f] %v6123_v0  ;;  %v755_v41 = vrot.slane %v753_v28, 1  ;;  %v5834_v53 = vld [vmem:[#allocation6 + $0x38] sm:$0xff]   ;;  %v508_v2 = vmul.f32 %v6437_v4, %v469_v46  ;;  %v509_v3 = vmul.f32 %v6437_v4, %v470_v47 }
  0x71   : > { %2869 = vst [vmem:[#allocation3 + $0x71] sm:$0x7f] %v6123_v0  ;;  %2870 = vst [vmem:[#allocation3 + $0x89] sm:$0x7f] %v6123_v0  ;;  %2101 = vmatpush1.bf16.msra.mxu0 %v5834_v53  ;;  %v471_v62 = vld [vmem:[%s6305_s29 + $0x98] sm:$0xff]  ;;  %v545_v10 = vadd.f32 %v6444_v7, %v506_v61  ;;  %v5836_v23 = vld [vmem:[#allocation6 + $0x28] sm:$0xff]  }
  0x72   : > { %2871 = vst [vmem:[#allocation3 + $0xa1] sm:$0x7f] %v6123_v0  ;;  %2872 = vst [vmem:[#allocation3 + $0xb9] sm:$0x7f] %v6123_v0  ;;  %2102 = vmatprep.subr.bf16.mxu0 %v6124_v1  ;;  %v756_v9 = vor.u32 %v755_v41, %v751_v27  ;;  %v510_v11 = vmul.f32 %v6437_v4, %v471_v62  ;;  %v548_v21 = vadd.f32 %v6444_v7, %v509_v3  ;;  %v5837_v40 = vld [vmem:[#allocation6 + $0x20] sm:$0xff]   ;;  %v5838_v51 = vld [vmem:[#allocation6 + $0x18] sm:$0xff]  }
  0x73   : > { %2873 = vst [vmem:[#allocation3 + $0xd1] sm:$0x7f] %v6123_v0  ;;  %2874 = vst [vmem:[#allocation3 + $0xe9] sm:$0x7f] %v6123_v0  ;;  %v5839_v62 = vld [vmem:[#allocation6 + $0x10] sm:$0xff]   ;;  %s8505_s21 = smov (!%p446_p1, %s6205_s21), 1 }
  0x74   : > { %2875 = vst [vmem:[#allocation3 + $0x101] sm:$0x7f] %v6123_v0  ;;  %2876 = vst [vmem:[#allocation3 + $0x119] sm:$0x7f] %v6123_v0  ;;  %v549_v22 = vadd.f32 %v6444_v7, %v510_v11  ;;  %s5224_s12 = sshll.u32 %s8505_s21, 7 }
  0x75   : > { %2877 = vst [vmem:[#allocation3 + $0x131] sm:$0x7f] %v6123_v0  ;;  %2878 = vst [vmem:[#allocation3 + $0x149] sm:$0x7f] %v6123_v0  ;;  %2103 = vmatpush1.bf16.msra.mxu0 %v5835_v57  ;;  %s8302_s21 = scalar_lea.vmem %s8417_s11, %s5224_s12 }
  0x76   : > { %2879 = vst [vmem:[#allocation3 + $0x161] sm:$0x7f] %v6123_v0  ;;  %2880 = vst [vmem:[#allocation3 + $0x179] sm:$0x7f] %v6123_v0  ;;  %2104 = vmatprep.subr.bf16.mxu0 %v6124_v1 }
  0x77   : > { %2881 = vst [vmem:[#allocation3 + $0x191] sm:$0x7f] %v6123_v0  ;;  %575 = vst.msk [vmem:[#allocation2 + $0x18] sm:$0x1] %vm574_vm1, %v6123_v0 }
  0x78   : > { %576 = vst.msk [vmem:[#allocation2 + $0x30] sm:$0x1] %vm574_vm1, %v6123_v0  ;;  %577 = vst.msk [vmem:[#allocation2 + $0x48] sm:$0x1] %vm574_vm1, %v6123_v0 }
  0x79   : > { %578 = vst.msk [vmem:[#allocation2 + $0x60] sm:$0x1] %vm574_vm1, %v6123_v0  ;;  %579 = vst.msk [vmem:[#allocation2 + $0x78] sm:$0x1] %vm574_vm1, %v6123_v0  ;;  %2105 = vmatpush1.bf16.msra.mxu0 %v5836_v23 }
  0x7a   : > { %580 = vst.msk [vmem:[#allocation2 + $0x90] sm:$0x1] %vm574_vm1, %v6123_v0  ;;  %581 = vst.msk [vmem:[#allocation2 + $0xa8] sm:$0x1] %vm574_vm1, %v6123_v0  ;;  %2106 = vmatprep.subr.bf16.mxu0 %v6124_v1 }
  0x7b   : > { %582 = vst.msk [vmem:[#allocation2 + $0xc0] sm:$0x1] %vm574_vm1, %v6123_v0  ;;  %583 = vst.msk [vmem:[#allocation2 + $0xd8] sm:$0x1] %vm574_vm1, %v6123_v0 }
  0x7c   : > { %584 = vst.msk [vmem:[#allocation2 + $0xf0] sm:$0x1] %vm574_vm1, %v6123_v0  ;;  %585 = vst.msk [vmem:[#allocation2 + $0x108] sm:$0x1] %vm574_vm1, %v6123_v0 }
  0x7d   : > { %586 = vst.msk [vmem:[#allocation2 + $0x120] sm:$0x1] %vm574_vm1, %v6123_v0  ;;  %587 = vst.msk [vmem:[#allocation2 + $0x138] sm:$0x1] %vm574_vm1, %v6123_v0  ;;  %2107 = vmatpush1.bf16.msra.mxu0 %v5837_v40  ;;  %v5848_v40 = vld [vmem:[#allocation6 + $0xb8] sm:$0xff]  }
  0x7e   : > { %588 = vst.msk [vmem:[#allocation2 + $0x150] sm:$0x1] %vm574_vm1, %v6123_v0  ;;  %589 = vst.msk [vmem:[#allocation2 + $0x168] sm:$0x1] %vm574_vm1, %v6123_v0  ;;  %2108 = vmatprep.subr.bf16.mxu0 %v6124_v1  ;;  %2310 = vmatpush1.bf16.msra.mxu1 %v5848_v40 }
  0x7f   : > { %590 = vst.msk [vmem:[#allocation2 + $0x180] sm:$0x1] %vm574_vm1, %v6123_v0  ;;  %2311 = vmatprep.subr.bf16.mxu1 %v6124_v1 }
  0x80   : > { %592 = vst.msk [vmem:[#allocation2 + $0x29] sm:$0x7f] %vm591_vm2, %v6123_v0  ;;  %593 = vst.msk [vmem:[#allocation2 + $0x41] sm:$0x7f] %vm591_vm2, %v6123_v0 }
  0x81   : > { %594 = vst.msk [vmem:[#allocation2 + $0x59] sm:$0x7f] %vm591_vm2, %v6123_v0  ;;  %595 = vst.msk [vmem:[#allocation2 + $0x71] sm:$0x7f] %vm591_vm2, %v6123_v0  ;;  %2109 = vmatpush1.bf16.msra.mxu0 %v5838_v51  ;;  %v5850_v51 = vld [vmem:[#allocation6 + $0xb0] sm:$0xff]  }
  0x82   : > { %596 = vst.msk [vmem:[#allocation2 + $0x89] sm:$0x7f] %vm591_vm2, %v6123_v0  ;;  %597 = vst.msk [vmem:[#allocation2 + $0xa1] sm:$0x7f] %vm591_vm2, %v6123_v0  ;;  %2110 = vmatprep.subr.bf16.mxu0 %v6124_v1  ;;  %2312 = vmatpush1.bf16.msra.mxu1 %v5850_v51 }
  0x83   : > { %598 = vst.msk [vmem:[#allocation2 + $0xb9] sm:$0x7f] %vm591_vm2, %v6123_v0  ;;  %599 = vst.msk [vmem:[#allocation2 + $0xd1] sm:$0x7f] %vm591_vm2, %v6123_v0  ;;  %2313 = vmatprep.subr.bf16.mxu1 %v6124_v1 }
  0x84   : > { %600 = vst.msk [vmem:[#allocation2 + $0xe9] sm:$0x7f] %vm591_vm2, %v6123_v0  ;;  %601 = vst.msk [vmem:[#allocation2 + $0x101] sm:$0x7f] %vm591_vm2, %v6123_v0 }
  0x85   : > { %602 = vst.msk [vmem:[#allocation2 + $0x119] sm:$0x7f] %vm591_vm2, %v6123_v0  ;;  %603 = vst.msk [vmem:[#allocation2 + $0x131] sm:$0x7f] %vm591_vm2, %v6123_v0  ;;  %2111 = vmatpush1.bf16.msra.mxu0 %v5839_v62 }
  0x86   : > { %604 = vst.msk [vmem:[#allocation2 + $0x149] sm:$0x7f] %vm591_vm2, %v6123_v0  ;;  %605 = vst.msk [vmem:[#allocation2 + $0x161] sm:$0x7f] %vm591_vm2, %v6123_v0  ;;  %2112 = vmatprep.subr.bf16.mxu0 %v6124_v1 }
  0x87   : > { %606 = vst.msk [vmem:[#allocation2 + $0x179] sm:$0x7f] %vm591_vm2, %v6123_v0  ;;  %607 = vst.msk [vmem:[#allocation2 + $0x191] sm:$0x7f] %vm591_vm2, %v6123_v0  ;;  %v507_v0 = vmul.f32 %v6437_v4, %v468_v45 }
  0x88   : > { %608 = vst.msk [vmem:[#allocation2 + $0x19] sm:$0xff] %vm562_vm0, %v530_v13  ;;  %609 = vst.msk [vmem:[#allocation2 + $0x21] sm:$0xff] %vm562_vm0, %v531_v14 }
  0x89   : > { %610 = vst.msk [vmem:[#allocation2 + $0x31] sm:$0xff] %vm562_vm0, %v532_v20  ;;  %611 = vst.msk [vmem:[#allocation2 + $0x39] sm:$0xff] %vm562_vm0, %v533_v29  ;;  %v546_v17 = vadd.f32 %v6444_v7, %v507_v0  ;;  %v547_v20 = vadd.f32 %v6444_v7, %v508_v2 }
  0x8a   : > { %612 = vst.msk [vmem:[#allocation2 + $0x49] sm:$0xff] %vm562_vm0, %v534_v34  ;;  %613 = vst.msk [vmem:[#allocation2 + $0x51] sm:$0xff] %vm562_vm0, %v535_v35 }
  0x8b   : > { %614 = vst.msk [vmem:[#allocation2 + $0x61] sm:$0xff] %vm562_vm0, %v536_v36  ;;  %615 = vst.msk [vmem:[#allocation2 + $0x69] sm:$0xff] %vm562_vm0, %v537_v42 }
  0x8c   : > { %616 = vst.msk [vmem:[#allocation2 + $0x79] sm:$0xff] %vm562_vm0, %v538_v49  ;;  %617 = vst.msk [vmem:[#allocation2 + $0x81] sm:$0xff] %vm562_vm0, %v539_v54 }
  0x8d   : > { %618 = vst.msk [vmem:[#allocation2 + $0x91] sm:$0xff] %vm562_vm0, %v540_v55  ;;  %619 = vst.msk [vmem:[#allocation2 + $0x99] sm:$0xff] %vm562_vm0, %v541_v58 }
  0x8e   : > { %620 = vst.msk [vmem:[#allocation2 + $0xa9] sm:$0xff] %vm562_vm0, %v542_v59  ;;  %621 = vst.msk [vmem:[#allocation2 + $0xb1] sm:$0xff] %vm562_vm0, %v543_v60 }
  0x8f   : > { %v643_v5 = vld [vmem:[#allocation2 + $0x18] sm:$0xff]  ;;  %v644_v6 = vld [vmem:[#allocation2 + $0x20] sm:$0xff]  ;;  %v645_v8 = vld [vmem:[#allocation2 + $0x28] sm:$0xff]  ;;  %622 = vst.msk [vmem:[#allocation2 + $0xc1] sm:$0xff] %vm562_vm0, %v544_v63 }
  0x90   : > { %v6517_v12 = vpack.c.bf16 %v644_v6, %v643_v5  ;;  %v6519_v13 = vpack.c.bf16 %v643_v5, %v642_v48  ;;  %v646_v14 = vld [vmem:[#allocation2 + $0x30] sm:$0xff]  ;;  %v6521_v16 = vpack.c.bf16 %v645_v8, %v644_v6  ;;  %v647_v19 = vld [vmem:[#allocation2 + $0x38] sm:$0xff]  ;;  %623 = vst.msk [vmem:[#allocation2 + $0xc9] sm:$0xff] %vm562_vm0, %v545_v10  ;;  %v648_v27 = vld [vmem:[#allocation2 + $0x40] sm:$0xff] }
  0x91   : > { %v6525_v18 = vpack.c.bf16 %v646_v14, %v645_v8  ;;  %v6536_v28 = vpack.c.bf16 %v647_v19, %v646_v14  ;;  %v649_v29 = vld [vmem:[#allocation2 + $0x48] sm:$0xff]  ;;  %v651_v30 = vld [vmem:[#allocation2 + $0x58] sm:$0xff]  ;;  %624 = vst.msk [vmem:[#allocation2 + $0xd9] sm:$0xff] %vm562_vm0, %v546_v17  ;;  %625 = vst.msk [vmem:[#allocation2 + $0xe1] sm:$0xff] %vm562_vm0, %v547_v20  ;;  %v6556_v45 = vpack.c.bf16 %v648_v27, %v647_v19 }
  0x92   : > { %1093 = vrot.lane.b32.xlu0 %v6517_v12, %s6125_s14  ;;  %v758_v24 = vshll.u32 %v6519_v13, 16  ;;  %v762_v25 = vshrl.u32 %v6519_v13, 16  ;;  %v766_v26 = vshll.u32 %v6521_v16, 16  ;;  %v770_v31 = vshrl.u32 %v6521_v16, 16  ;;  %626 = vst.msk [vmem:[#allocation2 + $0xf1] sm:$0xff] %vm562_vm0, %v548_v21  ;;  %627 = vst.msk [vmem:[#allocation2 + $0xf9] sm:$0xff] %vm562_vm0, %v549_v22 }
  0x93   : > { %1095 = vrot.lane.b32.xlu1 %v6525_v18, %s6125_s14  ;;  %v6543_v32 = vpack.c.bf16 %v649_v29, %v648_v27  ;;  %v774_v35 = vshll.u32 %v6536_v28, 16  ;;  %v650_v36 = vld [vmem:[#allocation2 + $0x50] sm:$0xff]  ;;  %v778_v37 = vshrl.u32 %v6536_v28, 16  ;;  %v653_v46 = vld [vmem:[#allocation2 + $0x68] sm:$0xff]  ;;  %v652_v49 = vld [vmem:[#allocation2 + $0x60] sm:$0xff] }
  0x94   : > { %v760_v33 = vrot.slane %v758_v24, 1  ;;  %v768_v34 = vrot.slane %v766_v26, 1  ;;  %v6551_v39 = vpack.c.bf16 %v651_v30, %v650_v36  ;;  %v6563_v55 = vpack.c.bf16 %v653_v46, %v652_v49  ;;  %v655_v57 = vld [vmem:[#allocation2 + $0x78] sm:$0xff]  ;;  %v654_v58 = vld [vmem:[#allocation2 + $0x70] sm:$0xff]  ;;  %v657_v59 = vld [vmem:[#allocation2 + $0x88] sm:$0xff] }
  0x95   : > { %v782_v38 = vshll.u32 %v6543_v32, 16  ;;  %v776_v44 = vrot.slane %v774_v35, 1  ;;  %v786_v50 = vshrl.u32 %v6543_v32, 16  ;;  %v6568_v56 = vpack.c.bf16 %v650_v36, %v649_v29  ;;  %v656_v6 = vld [vmem:[#allocation2 + $0x80] sm:$0xff]  ;;  %v6592_v21 = vld [vmem:[#allocation2 + $0x98] sm:$0xff]  ;;  %v658_v23 = vld [vmem:[#allocation2 + $0x90] sm:$0xff] }
  0x96   : > { %v761_v41 = vsel %vm749_vm3, %v756_v9, %v760_v33  ;;  %v764_v42 = vor.u32 %v762_v25, %v760_v33  ;;  %v772_v43 = vor.u32 %v770_v31, %v768_v34  ;;  %v790_v54 = vshll.u32 %v6551_v39, 16  ;;  %v5840_v10 = vld [vmem:[#allocation6 + $0x8] sm:$0xff]   ;;  %v472_v25 = vld [vmem:[%s6305_s29 + $0xa0] sm:$0xff]  ;;  %v6602_v33 = vld [vmem:[#allocation2 + $0xa8] sm:$0xff] }
  0x97   : > { %946 = vrot.lane.b32.xlu0 %v761_v41, %s6125_s14  ;;  %v784_v48 = vrot.slane %v782_v38, 1  ;;  %v780_v53 = vor.u32 %v778_v37, %v776_v44  ;;  %v794_v61 = vshrl.u32 %v6551_v39, 16  ;;  %v798_v2 = vshll.u32 %v6563_v55, 16  ;;  %2113 = vmatpush1.bf16.msra.mxu0 %v5840_v10  ;;  %v5841_v26 = vld [vmem:[#allocation6] sm:$0xff]   ;;  %v660_v35 = vld [vmem:[#allocation2 + $0xa0] sm:$0xff]  ;;  %v474_v38 = vld [vmem:[%s6305_s29 + $0xb0] sm:$0xff] }
  0x98   : > { %v769_v47 = vsel %vm749_vm3, %v764_v42, %v768_v34  ;;  %v777_v52 = vsel %vm749_vm3, %v772_v43, %v776_v44  ;;  %v792_v0 = vrot.slane %v790_v54, 1  ;;  %v6574_v3 = vpack.c.bf16 %v655_v57, %v654_v58  ;;  %2114 = vmatprep.subr.bf16.mxu0 %v6124_v1  ;;  %v473_v36 = vld [vmem:[%s6305_s29 + $0xa8] sm:$0xff]  ;;  %v6616_v43 = vld [vmem:[#allocation2 + $0xb8] sm:$0xff]  ;;  %v5842_v44 = vld [vmem:[#allocation6 + $0x78] sm:$0xff]  }
  0x99   : > { %948 = vrot.lane.b32.xlu1 %v769_v47, %s6125_s14  ;;  %v788_v60 = vor.u32 %v786_v50, %v784_v48  ;;  %v785_v63 = vsel %vm749_vm3, %v780_v53, %v784_v48  ;;  %v6579_v5 = vpack.c.bf16 %v652_v49, %v651_v30  ;;  %v6581_v8 = vpack.c.bf16 %v657_v59, %v656_v6  ;;  %v475_v50 = vld [vmem:[%s6305_s29 + $0xb8] sm:$0xff]  ;;  %v6627_v54 = vld [vmem:[#allocation2 + $0xc8] sm:$0xff] }
  0x9a   : > { %v802_v9 = vshrl.u32 %v6563_v55, 16  ;;  %v796_v14 = vor.u32 %v794_v61, %v792_v0  ;;  %v800_v17 = vrot.slane %v798_v2, 1  ;;  %v806_v19 = vshll.u32 %v6574_v3, 16  ;;  %v662_v53 = vld [vmem:[#allocation2 + $0xb0] sm:$0xff]  ;;  %v6638_v2 = vld [vmem:[#allocation2 + $0xc0] sm:$0xff] }
  0x9b   : > { %1097 = vrot.lane.b32.xlu0 %v6556_v45, %s6125_s14  ;;  %v793_v11 = vsel %vm749_vm3, %v788_v60, %v792_v0  ;;  %v6590_v20 = vpack.c.bf16 %v654_v58, %v653_v46  ;;  %v814_v22 = vshll.u32 %v6581_v8, 16  ;;  %v810_v24 = vshrl.u32 %v6574_v3, 16  ;;  %2115 = vmatpush1.bf16.msra.mxu0 %v5841_v26  ;;  %v5843_v58 = vld [vmem:[#allocation6 + $0x70] sm:$0xff]   ;;  %v476_v60 = vld [vmem:[%s6305_s29 + $0xc0] sm:$0xff] }
  0x9c   : > { %v801_v27 = vsel %vm749_vm3, %v796_v14, %v800_v17  ;;  %v804_v29 = vor.u32 %v802_v9, %v800_v17  ;;  %v808_v30 = vrot.slane %v806_v19, 1  ;;  %v6600_v31 = vpack.c.bf16 %v6592_v21, %v658_v23  ;;  %2116 = vmatprep.subr.bf16.mxu0 %v6124_v1  ;;  %v478_v0 = vld [vmem:[%s6305_s29 + $0xd0] sm:$0xff] }
  0x9d   : > { %950 = vrot.lane.b32.xlu1 %v777_v52, %s6125_s14  ;;  %v6607_v34 = vpack.c.bf16 %v656_v6, %v655_v57  ;;  %v816_v37 = vrot.slane %v814_v22, 1  ;;  %v818_v41 = vshrl.u32 %v6581_v8, 16  ;;  %v6614_v42 = vpack.c.bf16 %v6602_v33, %v660_v35 }
  0x9e   : > { %v809_v46 = vsel %vm749_vm3, %v804_v29, %v808_v30  ;;  %v812_v47 = vor.u32 %v810_v24, %v808_v30  ;;  %v822_v48 = vshll.u32 %v6600_v31, 16  ;;  %v511_v49 = vmul.f32 %v6437_v4, %v472_v25  ;;  %v5844_v29 = vld [vmem:[#allocation6 + $0x68] sm:$0xff]  }
  0x9f   : > { %1099 = vrot.lane.b32.xlu0 %v6568_v56, %s6125_s14  ;;  %v6625_v52 = vpack.c.bf16 %v658_v23, %v657_v59  ;;  %v512_v57 = vmul.f32 %v6437_v4, %v473_v36  ;;  %v826_v61 = vshrl.u32 %v6600_v31, 16  ;;  %v830_v59 = vshll.u32 %v6614_v42, 16  ;;  %2117 = vmatpush2.bf16.msra.mxu0 %v5842_v44  ;;  %v5852_v23 = vld [vmem:[#allocation6 + $0xa8] sm:$0xff]  }
  0xa0   : > { %v550_v62 = vadd.f32 %v6444_v7, %v511_v49  ;;  %v513_v9 = vmul.f32 %v6437_v4, %v474_v38  ;;  %v514_v10 = vmul.f32 %v6437_v4, %v475_v50  ;;  %v817_v14 = vsel %vm749_vm3, %v812_v47, %v816_v37  ;;  %2118 = vmatprep.subr.bf16.mxu0 %v6124_v1  ;;  %v482_v47 = vld [vmem:[%s6305_s29 + $0xf0] sm:$0xff]  ;;  %v6677_v50 = vld [vmem:[#allocation2 + $0xd8] sm:$0xff] }
  0xa1   : > { %952 = vrot.lane.b32.xlu1 %v785_v63, %s6125_s14  ;;  %v477_v63 = vld [vmem:[%s6305_s29 + $0xc8] sm:$0xff]  ;;  %v551_v6 = vadd.f32 %v6444_v7, %v512_v57  ;;  %v820_v17 = vor.u32 %v818_v41, %v816_v37  ;;  %v824_v19 = vrot.slane %v822_v48, 1  ;;  %v6646_v22 = vpack.c.bf16 %v6616_v43, %v662_v53  ;;  %v480_v37 = vld [vmem:[%s6305_s29 + $0xe0] sm:$0xff]  ;;  %2314 = vmatpush1.bf16.msra.mxu1 %v5852_v23  ;;  %v669_v23 = vld [vmem:[#allocation2 + $0xe8] sm:$0xff] }
  0xa2   : > { %628 = vst.msk [vmem:[#allocation2 + $0x109] sm:$0xff] %vm562_vm0, %v550_v62  ;;  %v6653_v24 = vpack.c.bf16 %v660_v35, %v6592_v21  ;;  %v552_v25 = vadd.f32 %v6444_v7, %v513_v9  ;;  %v553_v26 = vadd.f32 %v6444_v7, %v514_v10  ;;  %v834_v30 = vshrl.u32 %v6614_v42, 16  ;;  %2315 = vmatprep.subr.bf16.mxu1 %v6124_v1 }
  0xa3   : > { %1101 = vrot.lane.b32.xlu0 %v6579_v5, %s6125_s14  ;;  %629 = vst.msk [vmem:[#allocation2 + $0x111] sm:$0xff] %vm562_vm0, %v551_v6  ;;  %v6662_v36 = vpack.c.bf16 %v6627_v54, %v6638_v2  ;;  %v516_v21 = vmul.f32 %v6437_v4, %v477_v63  ;;  %v517_v35 = vmul.f32 %v6437_v4, %v478_v0  ;;  %v832_v40 = vrot.slane %v830_v59, 1  ;;  %v483_v63 = vld [vmem:[%s6305_s29 + $0xf8] sm:$0xff] }
  0xa4   : > { %v828_v38 = vor.u32 %v826_v61, %v824_v19  ;;  %630 = vst.msk [vmem:[#allocation2 + $0x121] sm:$0xff] %vm562_vm0, %v552_v25  ;;  %631 = vst.msk [vmem:[#allocation2 + $0x129] sm:$0xff] %vm562_vm0, %v553_v26  ;;  %2119 = vmatpush2.bf16.msra.mxu0 %v5843_v58  ;;  %v825_v48 = vsel %vm749_vm3, %v820_v17, %v824_v19  ;;  %v838_v49 = vshll.u32 %v6646_v22, 16  ;;  %v5854_v58 = vld [vmem:[#allocation6 + $0xa0] sm:$0xff]   ;;  %v666_v0 = vld [vmem:[#allocation2 + $0xd0] sm:$0xff]  ;;  %v842_v9 = vshrl.u32 %v6646_v22, 16 }
  0xa5   : > { %954 = vrot.lane.b32.xlu1 %v793_v11, %s6125_s14  ;;  %v479_v11 = vld [vmem:[%s6305_s29 + $0xd8] sm:$0xff]  ;;  %v555_v51 = vadd.f32 %v6444_v7, %v516_v21  ;;  %2120 = vmatprep.subr.bf16.mxu0 %v6124_v1  ;;  %v556_v57 = vadd.f32 %v6444_v7, %v517_v35  ;;  %v519_v62 = vmul.f32 %v6437_v4, %v480_v37  ;;  %v846_v59 = vshll.u32 %v6662_v36, 16  ;;  %v668_v35 = vld [vmem:[#allocation2 + $0xe0] sm:$0xff] }
  0xa6   : > { %v518_v44 = vmul.f32 %v6437_v4, %v479_v11  ;;  %v6701_v10 = vpack.c.bf16 %v6677_v50, %v666_v0  ;;  %v5845_v11 = vld [vmem:[#allocation6 + $0x60] sm:$0xff]   ;;  %v836_v17 = vor.u32 %v834_v30, %v832_v40  ;;  %v840_v19 = vrot.slane %v838_v49, 1  ;;  %2316 = vmatpush1.bf16.msra.mxu1 %v5854_v58  ;;  %v5855_v26 = vld [vmem:[#allocation6 + $0x98] sm:$0xff]   ;;  %v5847_v49 = vld [vmem:[#allocation6 + $0x50] sm:$0xff]  }
  0xa7   : > { %1103 = vrot.lane.b32.xlu0 %v6590_v20, %s6125_s14  ;;  %633 = vst.msk [vmem:[#allocation2 + $0x141] sm:$0xff] %vm562_vm0, %v555_v51  ;;  %634 = vst.msk [vmem:[#allocation2 + $0x151] sm:$0xff] %vm562_vm0, %v556_v57  ;;  %2317 = vmatprep.subr.bf16.mxu1 %v6124_v1  ;;  %v848_v21 = vrot.slane %v846_v59, 1  ;;  %v6720_v37 = vpack.c.bf16 %v669_v23, %v668_v35  ;;  %v670_v58 = vld [vmem:[#allocation2 + $0xf0] sm:$0xff]  ;;  %v5858_v59 = vld [vmem:[#allocation6 + $0x80] sm:$0xff]  }
  0xa8   : > { %v557_v61 = vadd.f32 %v6444_v7, %v518_v44  ;;  %2121 = vmatpush2.bf16.msra.mxu0 %v5844_v29  ;;  %v6712_v29 = vpack.c.bf16 %v6638_v2, %v6616_v43  ;;  %v841_v43 = vsel %vm749_vm3, %v836_v17, %v840_v19  ;;  %v844_v2 = vor.u32 %v842_v9, %v840_v19  ;;  %v672_v17 = vld [vmem:[#allocation2 + $0x100] sm:$0xff] }
  0xa9   : > { %956 = vrot.lane.b32.xlu1 %v801_v27, %s6125_s14  ;;  %v515_v27 = vmul.f32 %v6437_v4, %v476_v60  ;;  %v6685_v60 = vpack.c.bf16 %v662_v53, %v6602_v33  ;;  %v521_v33 = vmul.f32 %v6437_v4, %v482_v47  ;;  %v833_v53 = vsel %vm749_vm3, %v828_v38, %v832_v40  ;;  %v5846_v38 = vld [vmem:[#allocation6 + $0x58] sm:$0xff]   ;;  %v671_v47 = vld [vmem:[#allocation2 + $0xf8] sm:$0xff]  ;;  %v6749_v9 = vld [vmem:[#allocation2 + $0x108] sm:$0xff] }
  0xaa   : > { %635 = vst.msk [vmem:[#allocation2 + $0x159] sm:$0xff] %vm562_vm0, %v557_v61  ;;  %2122 = vmatprep.subr.bf16.mxu0 %v6124_v1  ;;  %v854_v40 = vshll.u32 %v6701_v10, 16  ;;  %2318 = vmatpush1.bf16.msra.mxu1 %v5855_v26  ;;  %v849_v51 = vsel %vm749_vm3, %v844_v2, %v848_v21  ;;  %v862_v61 = vshll.u32 %v6720_v37, 16  ;;  %v5851_v26 = vld [vmem:[#allocation6 + $0x40] sm:$0xff]   ;;  %v674_v2 = vld [vmem:[#allocation2 + $0x110] sm:$0xff] }
  0xab   : > { %1105 = vrot.lane.b32.xlu0 %v6607_v34, %s6125_s14  ;;  %v554_v41 = vadd.f32 %v6444_v7, %v515_v27  ;;  %v522_v27 = vmul.f32 %v6437_v4, %v483_v63  ;;  %v560_v30 = vadd.f32 %v6444_v7, %v521_v33  ;;  %2319 = vmatprep.subr.bf16.mxu1 %v6124_v1 }
  0xac   : > { %2123 = vmatpush2.bf16.msra.mxu0 %v5845_v11  ;;  %v856_v57 = vrot.slane %v854_v40, 1  ;;  %v6744_v63 = vpack.c.bf16 %v671_v47, %v670_v58  ;;  %v1338_v11 = vrot.slane %v6517_v12, 1 }
  0xad   : > { %958 = vrot.lane.b32.xlu1 %v809_v46, %s6125_s14  ;;  %v481_v46 = vld [vmem:[%s6305_s29 + $0xe8] sm:$0xff]  ;;  %632 = vst.msk [vmem:[#allocation2 + $0x139] sm:$0xff] %vm562_vm0, %v554_v41  ;;  %638 = vst.msk [vmem:[#allocation2 + $0x181] sm:$0xff] %vm562_vm0, %v560_v30  ;;  %2124 = vmatprep.subr.bf16.mxu0 %v6124_v1  ;;  %v5856_v41 = vld [vmem:[#allocation6 + $0x90] sm:$0xff]   ;;  %v561_v44 = vadd.f32 %v6444_v7, %v522_v27 }
  0xae   : > { %v520_v6 = vmul.f32 %v6437_v4, %v481_v46  ;;  %v850_v4 = vshrl.u32 %v6662_v36, 16  ;;  %v6730_v46 = vpack.c.bf16 %v666_v0, %v6627_v54  ;;  %2320 = vmatpush1.bf16.msra.mxu1 %v5856_v41  ;;  %v5857_v54 = vld [vmem:[#allocation6 + $0x88] sm:$0xff]   ;;  %v870_v19 = vshll.u32 %v6744_v63, 16  ;;  %v6761_v27 = vld [vmem:[#allocation6 + $0x118] sm:$0xff]   ;;  %v6767_v30 = vld [vmem:[#allocation2 + $0x118] sm:$0xff] }
  0xaf   : > { %1107 = vrot.lane.b32.xlu0 %v6625_v52, %s6125_s14  ;;  %639 = vst.msk [vmem:[#allocation2 + $0x189] sm:$0xff] %vm562_vm0, %v561_v44  ;;  %2321 = vmatprep.subr.bf16.mxu1 %v6124_v1  ;;  %v5849_v0 = vld [vmem:[#allocation6 + $0x48] sm:$0xff]   ;;  %v874_v40 = vshrl.u32 %v6744_v63, 16  ;;  %v1343_v41 = vrot.slane %v6568_v56, 1 }
  0xb0   : > { %v559_v25 = vadd.f32 %v6444_v7, %v520_v6  ;;  %2125 = vmatpush2.bf16.msra.mxu0 %v5846_v38 }
  0xb1   : > { %960 = vrot.lane.b32.xlu1 %v817_v14, %s6125_s14  ;;  %v558_v14 = vadd.f32 %v6444_v7, %v519_v62  ;;  %v852_v7 = vor.u32 %v850_v4, %v848_v21  ;;  %2126 = vmatprep.subr.bf16.mxu0 %v6124_v1  ;;  %v6742_v62 = vpack.c.bf16 %v668_v35, %v6677_v50  ;;  %v1341_v35 = vrot.slane %v6556_v45, 1  ;;  %v5859_v4 = vld [vmem:[#allocation6 + $0xf8] sm:$0xff]  }
  0xb2   : > { %637 = vst.msk [vmem:[#allocation2 + $0x171] sm:$0xff] %vm562_vm0, %v559_v25  ;;  %2322 = vmatpush1.bf16.msra.mxu1 %v5857_v54  ;;  %v6754_v50 = vpack.c.bf16 %v670_v58, %v669_v23  ;;  %v866_v25 = vshrl.u32 %v6720_v37, 16  ;;  %v6765_v23 = vpack.c.bf16 %v6749_v9, %v672_v17  ;;  %v5860_v58 = vld [vmem:[#allocation6 + $0xf0] sm:$0xff]  }
  0xb3   : > { %1109 = vrot.lane.b32.xlu0 %v6653_v24, %s6125_s14  ;;  %636 = vst.msk [vmem:[#allocation2 + $0x169] sm:$0xff] %vm562_vm0, %v558_v14  ;;  %v857_v6 = vsel %vm749_vm3, %v852_v7, %v856_v57  ;;  %v1339_v14 = vrot.slane %v6525_v18, 1  ;;  %2323 = vmatprep.subr.bf16.mxu1 %v6124_v1  ;;  %v6784_v7 = vpack.c.bf16 %v672_v17, %v671_v47  ;;  %v1142_v47 = vshrl.u32 %v6517_v12, 16 }
  0xb4   : > { %2127 = vmatpush2.bf16.msra.mxu0 %v5847_v49  ;;  %8462 = vst [vmem:[#allocation14_spill] sm:$0xff] %v6754_v50  ;;  %v1149_v17 = vshll.u32 %v6525_v18, 16  ;;  %v678_v49 = vld [vmem:[#allocation2 + $0x130] sm:$0xff] }
  0xb5   : > { %962 = vrot.lane.b32.xlu1 %v825_v48, %s6125_s14  ;;  %v858_v48 = vshrl.u32 %v6701_v10, 16  ;;  %2128 = vmatprep.subr.bf16.mxu0 %v6124_v1  ;;  %v1340_v38 = vsel %vm1019_vm4, %v1338_v11, %v1339_v14  ;;  %8463 = vst [vmem:[#allocation15_spill] sm:$0xff] %v6784_v7 }
  0xb6   : > { %2324 = vmatpush1.bf16.msra.mxu1 %v5858_v59  ;;  %v882_v59 = vshrl.u32 %v6765_v23, 16 }
  0xb7   : > { %1111 = vrot.lane.b32.xlu0 %v6685_v60, %s6125_s14  ;;  %v860_v33 = vor.u32 %v858_v48, %v856_v57  ;;  %2325 = vmatprep.subr.bf16.mxu1 %v6124_v1  ;;  %v6779_v48 = vpack.c.bf16 %v6767_v30, %v674_v2  ;;  %v878_v57 = vshll.u32 %v6765_v23, 16 }
  0xb8   : > { %2129 = vmatpush2.bf16.msra.mxu0 %v5849_v0  ;;  %v676_v0 = vld [vmem:[#allocation2 + $0x120] sm:$0xff] }
  0xb9   : > { %964 = vrot.lane.b32.xlu1 %v833_v53, %s6125_s14  ;;  %v864_v53 = vrot.slane %v862_v61, 1  ;;  %2130 = vmatprep.subr.bf16.mxu0 %v6124_v1  ;;  %v6787_v61 = vld [vmem:[#allocation2 + $0x128] sm:$0xff]  ;;  %v886_v11 = vshll.u32 %v6779_v48, 16 }
  0xba   : > { %2326 = vmatpush2.bf16.msra.mxu1 %v5859_v4  ;;  %v890_v4 = vshrl.u32 %v6779_v48, 16 }
  0xbb   : > { %1113 = vrot.lane.b32.xlu0 %v6712_v29, %s6125_s14  ;;  %v865_v21 = vsel %vm749_vm3, %v860_v33, %v864_v53  ;;  %v868_v44 = vor.u32 %v866_v25, %v864_v53  ;;  %2327 = vmatprep.subr.bf16.mxu1 %v6124_v1  ;;  %v6802_v25 = vpack.c.bf16 %v6787_v61, %v676_v0 }
  0xbc   : > { %2131 = vmatpush2.bf16.msra.mxu0 %v5851_v26 }
  0xbd   : > { %966 = vrot.lane.b32.xlu1 %v841_v43, %s6125_s14  ;;  %v872_v43 = vrot.slane %v870_v19, 1  ;;  %5637 = vmatprep.subr.bf16.mxu0 %v6761_v27  ;;  %v880_v19 = vrot.slane %v878_v57, 1  ;;  %8464 = vst [vmem:[#allocation16_spill] sm:$0xff] %v6802_v25  ;;  %v6814_v57 = vld [vmem:[#allocation2 + $0x138] sm:$0xff] }
  0xbe   : > { %2328 = vmatpush2.bf16.msra.mxu1 %v5860_v58  ;;  %v1165_v58 = vshll.u32 %v6568_v56, 16 }
  0xbf   : > { %1115 = vrot.lane.b32.xlu0 %v6730_v46, %s6125_s14  ;;  %v873_v33 = vsel %vm749_vm3, %v868_v44, %v872_v43  ;;  %v876_v53 = vor.u32 %v874_v40, %v872_v43  ;;  %v1151_v43 = vrot.slane %v1149_v17, 1  ;;  %v1157_v40 = vshll.u32 %v6556_v45, 16  ;;  %2329 = vmatprep.subr.bf16.mxu1 %v6124_v1 }
  0xc0   : > { %v6812_v44 = vpack.c.bf16 %v674_v2, %v6749_v9  ;;  %v894_v9 = vshll.u32 %v6802_v25, 16 }
  0xc1   : > { %968 = vrot.lane.b32.xlu1 %v849_v51, %s6125_s14  ;;  %v1159_v51 = vrot.slane %v1157_v40, 1  ;;  %v881_v17 = vsel %vm749_vm3, %v876_v53, %v880_v19  ;;  %v1169_v40 = vshrl.u32 %v6568_v56, 16  ;;  %v1344_v53 = vsel %vm1019_vm4, %v1341_v35, %v1343_v41 }
  0xc2   : > { %8465 = vst [vmem:[#allocation17_spill] sm:$0xff] %v6812_v44 }
  0xc3   : > { %1117 = vrot.lane.b32.xlu0 %v6742_v62, %s6125_s14 }
  0xc5   : > { %970 = vrot.lane.b32.xlu1 %v857_v6, %s6125_s14  ;;  %v1144_v6 = vshll.u32 %v6517_v12, 16  ;;  %v1342_v12 = vsel %vm1019_vm4, %v1339_v14, %v1341_v35  ;;  %v5862_v14 = vld [vmem:[#allocation6 + $0xe0] sm:$0xff]   ;;  %v681_v35 = vld [vmem:[#allocation2 + $0x148] sm:$0xff] }
  0xc7   : > { %1119 = vrot.lane.b32.xlu0 %v6754_v50, %s6125_s14  ;;  %v1146_v26 = vrot.slane %v1144_v6, 1  ;;  %v1161_v6 = vshrl.u32 %v6556_v45, 16  ;;  %v6847_v45 = vpack.c.bf16 %v676_v0, %v6767_v30  ;;  %v1177_v30 = vshrl.u32 %v6579_v5, 16 }
  0xc8   : > { %v1181_v0 = vshll.u32 %v6590_v20, 16 }
  0xc9   : > { %972 = vrot.lane.b32.xlu1 %v865_v21, %s6125_s14  ;;  %v1153_v21 = vshrl.u32 %v6525_v18, 16  ;;  %v1147_v18 = vor.u32 %v1146_v26, %v1142_v47  ;;  %v1163_v26 = vor.u32 %v1161_v6, %v1159_v51  ;;  %v896_v6 = vrot.slane %v894_v9, 1 }
  0xcb   : > { %1387 = vrot.lane.b32.xlu0 %v1340_v38, %s6125_s14  ;;  %v5861_v38 = vld [vmem:[#allocation6 + $0xe8] sm:$0xff]   ;;  %v1155_v54 = vor.u32 %v1153_v21, %v1151_v43  ;;  %v6823_v2 = vsel %vm749_vm3, %v1147_v18, %v1151_v43  ;;  %v1167_v21 = vrot.slane %v1165_v58, 1  ;;  %v5863_v58 = vld [vmem:[#allocation6 + $0xd8] sm:$0xff]  }
  0xcc   : > { %2330 = vmatpush2.bf16.msra.mxu1 %v5861_v38 }
  0xcd   : > { %1121 = vrot.lane.b32.xlu1 %v6784_v7, %s6125_s14  ;;  %v6826_v47 = vsel %vm749_vm3, %v1155_v54, %v1159_v51  ;;  %2331 = vmatprep.subr.bf16.mxu1 %v6124_v1  ;;  %v1173_v54 = vshll.u32 %v6579_v5, 16  ;;  %v6840_v51 = vpack.c.bf16 %v6814_v57, %v678_v49  ;;  %v6843_v38 = vsel %vm749_vm3, %v1163_v26, %v1167_v21 }
  0xce   : > { %v1171_v43 = vor.u32 %v1169_v40, %v1167_v21  ;;  %v5864_v21 = vld [vmem:[#allocation6 + $0xd0] sm:$0xff]  }
  0xcf   : > { %974 = vrot.lane.b32.xlu0 %v873_v33, %s6125_s14  ;;  %v888_v33 = vrot.slane %v886_v11, 1  ;;  %v898_v11 = vshrl.u32 %v6802_v25, 16  ;;  %8466 = vst [vmem:[#allocation18_spill] sm:$0xff] %v6840_v51  ;;  %v1175_v18 = vrot.slane %v1173_v54, 1  ;;  %v6869_v54 = vpack.c.bf16 %v678_v49, %v6787_v61 }
  0xd0   : > { %2332 = vmatpush2.bf16.msra.mxu1 %v5862_v14  ;;  %v8467_v14 = vrot.slane %v6579_v5, 1  ;;  %v1183_v25 = vrot.slane %v1181_v0, 1  ;;  %v8469_v49 = vrot.slane %v6590_v20, 1  ;;  %v682_v0 = vld [vmem:[#allocation2 + $0x150] sm:$0xff] }
  0xd1   : > { %1389 = vrot.lane.b32.xlu1 %v1342_v12, %s6125_s14  ;;  %v884_v12 = vor.u32 %v882_v59, %v880_v19  ;;  %v680_v59 = vld [vmem:[#allocation2 + $0x140] sm:$0xff]  ;;  %2333 = vmatprep.subr.bf16.mxu1 %v6124_v1  ;;  %v6852_v19 = vsel %vm749_vm3, %v1171_v43, %v1175_v18  ;;  %v892_v40 = vor.u32 %v890_v4, %v888_v33 }
  0xd2   : > { %v1346_v9 = vsel %vm1019_vm4, %v1343_v41, %v8467_v14  ;;  %v1179_v43 = vor.u32 %v1177_v30, %v1175_v18  ;;  %v8470_v61 = vmov %v8467_v14  ;;  %v5867_v14 = vld [vmem:[#allocation6 + $0xc0] sm:$0xff]  }
  0xd3   : > { %1123 = vrot.lane.b32.xlu0 %v6812_v44, %s6125_s14  ;;  %v889_v26 = vsel %vm749_vm3, %v884_v12, %v888_v33  ;;  %v906_v12 = vshrl.u32 %v6840_v51, 16  ;;  %v897_v41 = vsel %vm749_vm3, %v892_v40, %v896_v6  ;;  %v683_v33 = vld [vmem:[#allocation2 + $0x158] sm:$0xff]  ;;  %v1348_v18 = vsel %vm1019_vm4, %v8470_v61, %v8469_v49 }
  0xd4   : > { %2334 = vmatpush2.bf16.msra.mxu1 %v5863_v58  ;;  %v6875_v56 = vsel %vm749_vm3, %v1179_v43, %v1183_v25  ;;  %v5865_v58 = vld [vmem:[#allocation6 + $0xc8] sm:$0xff]   ;;  %v1189_v40 = vshll.u32 %v6607_v34, 16  ;;  %v6894_v43 = vpack.c.bf16 %v683_v33, %v682_v0  ;;  %v1351_v61 = vrot.slane %v6625_v52, 1 }
  0xd5   : > { %976 = vrot.lane.b32.xlu1 %v881_v17, %s6125_s14  ;;  %v902_v17 = vshll.u32 %v6840_v51, 16  ;;  %2335 = vmatprep.subr.bf16.mxu1 %v6124_v1 }
  0xd6   : > { %8472 = vst [vmem:[#allocation21_spill] sm:$0xff] %v6894_v43 }
  0xd7   : > { %1391 = vrot.lane.b32.xlu0 %v1344_v53, %s6125_s14  ;;  %v6865_v53 = vpack.c.bf16 %v681_v35, %v680_v59  ;;  %v904_v30 = vrot.slane %v902_v17, 1  ;;  %v8474_v17 = vmov %v8469_v49  ;;  %v6912_v49 = vpack.c.bf16 %v682_v0, %v681_v35 }
  0xd8   : > { %2336 = vmatpush2.bf16.msra.mxu1 %v5864_v21  ;;  %v6889_v21 = vpack.c.bf16 %v680_v59, %v6814_v57  ;;  %v8473_v59 = vrot.slane %v6607_v34, 1 }
  0xd9   : > { %1125 = vrot.lane.b32.xlu1 %v6847_v45, %s6125_s14  ;;  %8468 = vst [vmem:[#allocation19_spill] sm:$0xff] %v6865_v53  ;;  %v910_v4 = vshll.u32 %v6865_v53, 16  ;;  %2337 = vmatprep.subr.bf16.mxu1 %v6124_v1 }
  0xda   : > { %8471 = vst [vmem:[#allocation20_spill] sm:$0xff] %v6889_v21 }
  0xdb   : > { %978 = vrot.lane.b32.xlu0 %v889_v26, %s6125_s14  ;;  %v900_v26 = vor.u32 %v898_v11, %v896_v6  ;;  %v6897_v11 = vrot.slane %v1189_v40, 1 }
  0xdc   : > { %2338 = vmatpush2.bf16.msra.mxu1 %v5865_v58  ;;  %v908_v58 = vor.u32 %v906_v12, %v904_v30 }
  0xdd   : > { %1393 = vrot.lane.b32.xlu1 %v1346_v9, %s6125_s14  ;;  %v1185_v9 = vshrl.u32 %v6590_v20, 16  ;;  %2339 = vmatprep.subr.bf16.mxu1 %v6124_v1  ;;  %v905_v6 = vsel %vm749_vm3, %v900_v26, %v904_v30  ;;  %v912_v1 = vrot.slane %v910_v4, 1  ;;  %v684_v26 = vld [vmem:[#allocation2 + $0x160] sm:$0xff]  ;;  %v1353_v20 = vrot.slane %v6653_v24, 1  ;;  %v687_v4 = vld [vmem:[#allocation2 + $0x178] sm:$0xff] }
  0xde   : > { %v8476_v30 = vmov %v8473_v59 }
  0xdf   : > { %1127 = vrot.lane.b32.xlu0 %v6869_v54, %s6125_s14  ;;  %v1187_v5 = vor.u32 %v1185_v9, %v1183_v25  ;;  %v685_v25 = vld [vmem:[#allocation2 + $0x168] sm:$0xff]  ;;  %v914_v9 = vshrl.u32 %v6865_v53, 16  ;;  %v913_v12 = vsel %vm749_vm3, %v908_v58, %v912_v1  ;;  %v1352_v0 = vsel %vm1019_vm4, %v8476_v30, %v1351_v61 }
  0xe0   : > { %2340 = vmatpush2.bf16.msra.mxu1 %v5867_v14  ;;  %v6919_v40 = vpack.c.bf16 %v685_v25, %v684_v26 }
  0xe1   : > { %980 = vrot.lane.b32.xlu1 %v897_v41, %s6125_s14  ;;  %v6904_v57 = vsel %vm749_vm3, %v1187_v5, %v6897_v11  ;;  %v1350_v41 = vsel %vm1019_vm4, %v8474_v17, %v8473_v59  ;;  %v916_v14 = vor.u32 %v914_v9, %v912_v1  ;;  %v686_v5 = vld [vmem:[#allocation2 + $0x170] sm:$0xff]  ;;  %v922_v59 = vshrl.u32 %v6894_v43, 16 }
  0xe2   : > { %8475 = vst [vmem:[#allocation22_spill] sm:$0xff] %v6919_v40  ;;  %v926_v17 = vshll.u32 %v6919_v40, 16  ;;  %v1354_v1 = vsel %vm1019_vm4, %v1351_v61, %v1353_v20  ;;  %v930_v30 = vshrl.u32 %v6919_v40, 16  ;;  %v690_v40 = vld [vmem:[#allocation2 + $0x190] sm:$0xff] }
  0xe3   : > { %1395 = vrot.lane.b32.xlu0 %v1348_v18, %s6125_s14  ;;  %v918_v18 = vshll.u32 %v6894_v43, 16 }
  0xe4   : > { %v928_v9 = vrot.slane %v926_v17, 1 }
  0xe5   : > { %1129 = vrot.lane.b32.xlu1 %v6889_v21, %s6125_s14  ;;  %v920_v35 = vrot.slane %v918_v18, 1 }
  0xe7   : > { %982 = vrot.lane.b32.xlu0 %v905_v6, %s6125_s14  ;;  %v6928_v6 = vpack.c.bf16 %v684_v26, %v683_v33  ;;  %v921_v58 = vsel %vm749_vm3, %v916_v14, %v920_v35  ;;  %v924_v18 = vor.u32 %v922_v59, %v920_v35  ;;  %v1355_v33 = vrot.slane %v6685_v60, 1  ;;  %v688_v26 = vld [vmem:[#allocation2 + $0x180] sm:$0xff] }
  0xe8   : > { %v6946_v14 = vpack.c.bf16 %v688_v26, %v688_v26  ;;  %v932_v35 = vor.u32 %v930_v30, %v928_v9 }
  0xe9   : > { %1397 = vrot.lane.b32.xlu1 %v1350_v41, %s6125_s14  ;;  %v6933_v41 = vpack.c.bf16 %v687_v4, %v686_v5  ;;  %v929_v43 = vsel %vm749_vm3, %v924_v18, %v928_v9  ;;  %v1356_v61 = vsel %vm1019_vm4, %v1353_v20, %v1355_v33  ;;  %v1020_v18 = vrot.slane %v6451_v15, 1 }
  0xea   : > { %8479 = vst [vmem:[#allocation25_spill] sm:$0xff] %v6946_v14  ;;  %v942_v17 = vshll.u32 %v6946_v14, 16  ;;  %v1021_v9 = vrot.slane %v6519_v13, 1  ;;  %v1023_v14 = vrot.slane %v6521_v16, 1 }
  0xeb   : > { %1131 = vrot.lane.b32.xlu0 %v6912_v49, %s6125_s14  ;;  %8477 = vst [vmem:[#allocation23_spill] sm:$0xff] %v6933_v41 }
  0xed   : > { %984 = vrot.lane.b32.xlu1 %v913_v12, %s6125_s14  ;;  %v6941_v12 = vpack.c.bf16 %v686_v5, %v685_v25  ;;  %v6953_v25 = vpack.c.bf16 %v688_v26, %v687_v4  ;;  %v1357_v5 = vrot.slane %v6712_v29, 1 }
  0xef   : > { %1399 = vrot.lane.b32.xlu0 %v1352_v0, %s6125_s14  ;;  %8478 = vst [vmem:[#allocation24_spill] sm:$0xff] %v6941_v12  ;;  %v934_v0 = vshll.u32 %v6933_v41, 16  ;;  %v1358_v4 = vsel %vm1019_vm4, %v1355_v33, %v1357_v5 }
  0xf1   : > { %1133 = vrot.lane.b32.xlu1 %v6928_v6, %s6125_s14  ;;  %v936_v59 = vrot.slane %v934_v0, 1 }
  0xf3   : > { %986 = vrot.lane.b32.xlu0 %v921_v58, %s6125_s14  ;;  %v689_v58 = vld [vmem:[#allocation2 + $0x188] sm:$0xff]  ;;  %v937_v20 = vsel %vm749_vm3, %v932_v35, %v936_v59  ;;  %v1361_v35 = vrot.slane %v6742_v62, 1 }
  0xf4   : > { %v6968_v0 = vpack.c.bf16 %v690_v40, %v689_v58 }
  0xf5   : > { %1401 = vrot.lane.b32.xlu1 %v1354_v1, %s6125_s14  ;;  %v938_v1 = vshrl.u32 %v6933_v41, 16  ;;  %v1363_v41 = vrot.slane %v6754_v50, 1 }
  0xf7   : > { %1135 = vrot.lane.b32.xlu0 %v6941_v12, %s6125_s14  ;;  %v6965_v30 = vor.u32 %v938_v1, %v936_v59  ;;  %v1365_v59 = vrot.slane %v6784_v7, 1  ;;  %v1367_v1 = vrot.slane %v6812_v44, 1  ;;  %v1364_v50 = vsel %vm1019_vm4, %v1361_v35, %v1363_v41 }
  0xf9   : > { %988 = vrot.lane.b32.xlu1 %v929_v43, %s6125_s14  ;;  %v944_v43 = vrot.slane %v942_v17, 1  ;;  %v1022_v17 = vsel %vm1019_vm4, %v1020_v18, %v1021_v9  ;;  %v1024_v18 = vsel %vm1019_vm4, %v1021_v9, %v1023_v14  ;;  %v1369_v9 = vrot.slane %v6847_v45, 1 }
  0xfb   : > { %1403 = vrot.lane.b32.xlu0 %v1356_v61, %s6125_s14  ;;  %v1359_v61 = vrot.slane %v6730_v46, 1  ;;  %v945_v33 = vsel %vm749_vm3, %v6965_v30, %v944_v43 }
  0xfd   : > { %1137 = vrot.lane.b32.xlu1 %v6953_v25, %s6125_s14  ;;  %v1360_v53 = vsel %vm1019_vm4, %v1357_v5, %v1359_v61  ;;  %v1362_v43 = vsel %vm1019_vm4, %v1359_v61, %v1361_v35  ;;  %v5866_v5 = vld [vmem:[#allocation6 + $0x110] sm:$0xff]   ;;  %v1368_v35 = vsel %vm1019_vm4, %v1365_v59, %v1367_v1 }
  0xff   : > { %990 = vrot.lane.b32.xlu0 %v937_v20, %s6125_s14 }
 0x101   : > { %1405 = vrot.lane.b32.xlu1 %v1358_v4, %s6125_s14 }
 0x103   : > { %1139 = vrot.lane.b32.xlu0 %v6968_v0, %s6125_s14 }
 0x104   : > { %v1094_v20 = vpop.permute.xlu0 %1093 }
 0x105   : > { %v1558_v4 = vsel %vm562_vm0, %v1022_v17, %v1094_v20  ;;  %v1096_v51 = vpop.permute.xlu1 %1095  ;;  %992 = vrot.lane.b32.xlu1 %v945_v33, %s6125_s14  ;;  %v1025_v33 = vrot.slane %v6536_v28, 1  ;;  %v1366_v20 = vsel %vm1019_vm4, %v1363_v41, %v1365_v59  ;;  %v5868_v41 = vld [vmem:[#allocation6 + $0x108] sm:$0xff]  }
 0x106   : > { %2132 = vmatprep.mubr.bf16.mxu0 %v1558_v4  ;;  %v1562_v44 = vsel %vm562_vm0, %v1024_v18, %v1096_v51  ;;  %v7000_v51 = vld [vmem:[#allocation2 + $0x198] sm:$0xff] }
 0x107   : > { %1407 = vrot.lane.b32.xlu0 %v1360_v53, %s6125_s14  ;;  %v6996_v53 = vpack.c.bf16 %v689_v58, %v688_v26  ;;  %v1026_v4 = vsel %vm1019_vm4, %v1023_v14, %v1025_v33  ;;  %v1370_v26 = vsel %vm1019_vm4, %v1367_v1, %v1369_v9  ;;  %v1375_v14 = vrot.slane %v6912_v49, 1 }
 0x109   : > { %v947_v7 = vpop.permute.xlu0 %946  ;;  %1409 = vrot.lane.b32.xlu1 %v1362_v43, %s6125_s14  ;;  %8480 = vst [vmem:[#allocation26_spill] sm:$0xff] %v6996_v53 }
 0x10a   : > { %v1485_v17 = vsel %vm562_vm0, %v6451_v15, %v947_v7  ;;  %v1371_v15 = vrot.slane %v6869_v54, 1 }
 0x10b   : > { %2133 = vmatmul.mubr.bf16.vlgmr.msra.gmra.mxu0 %v1485_v17  ;;  %v949_v61 = vpop.permute.xlu1 %948  ;;  %1411 = vrot.lane.b32.xlu0 %v1364_v50, %s6125_s14  ;;  %v1373_v50 = vrot.slane %v6889_v21, 1  ;;  %v693_v17 = vld [vmem:[#allocation2 + $0x1a8] sm:$0xff]  ;;  %v1377_v21 = vrot.slane %v6928_v6, 1 }
 0x10c   : > { %5638 = vmatpush3.bf16.msra.mxu0 %v6761_v27  ;;  %2140 = vmatprep.mubr.bf16.mxu0 %v1562_v44  ;;  %v7009_v27 = vpack.c.bf16 %v7000_v51, %v690_v40  ;;  %v1436_v44 = vshll.u32 %v6996_v53, 16  ;;  %v1488_v59 = vsel %vm562_vm0, %v6519_v13, %v949_v61  ;;  %v1372_v18 = vsel %vm1019_vm4, %v1369_v9, %v1371_v15  ;;  %v692_v40 = vld [vmem:[#allocation2 + $0x1a0] sm:$0xff] }
 0x10d   : > { %v1098_v7 = vpop.permute.xlu0 %1097  ;;  %1413 = vrot.lane.b32.xlu1 %v1366_v20, %s6125_s14  ;;  %5639 = vmatprep.subr.bf16.mxu0 %v5866_v5  ;;  %v1027_v20 = vrot.slane %v6543_v32, 1  ;;  %v1440_v9 = vshrl.u32 %v6996_v53, 16 }
 0x10e   : > { %v1566_v1 = vsel %vm562_vm0, %v1026_v4, %v1098_v7  ;;  %v1444_v61 = vshll.u32 %v7009_v27, 16  ;;  %v1376_v4 = vsel %vm1019_vm4, %v1373_v50, %v1375_v14 }
 0x10f   : > { %v951_v58 = vpop.permute.xlu1 %950  ;;  %1415 = vrot.lane.b32.xlu0 %v1368_v35, %s6125_s14  ;;  %v1374_v35 = vsel %vm1019_vm4, %v1371_v15, %v1373_v50 }
 0x110   : > { %5640 = vmatpush3.bf16.msra.mxu0 %v5866_v5  ;;  %v1438_v5 = vrot.slane %v1436_v44, 1  ;;  %v7032_v44 = vsel %vm1019_vm4, %v1025_v33, %v1027_v20  ;;  %v1446_v50 = vrot.slane %v1444_v61, 1 }
 0x111   : > { %v1100_v43 = vpop.permute.xlu0 %1099  ;;  %1417 = vrot.lane.b32.xlu1 %v1370_v26, %s6125_s14  ;;  %5641 = vmatprep.subr.bf16.mxu0 %v5868_v41  ;;  %v7028_v26 = vpack.c.bf16 %v693_v17, %v692_v40  ;;  %v1491_v40 = vsel %vm562_vm0, %v6521_v16, %v951_v58  ;;  %v1448_v17 = vshrl.u32 %v7009_v27, 16 }
 0x113   : > { %2141 = vmatmul.mubr.bf16.gmra.mxu0 %v1488_v59  ;;  %v953_v13 = vpop.permute.xlu1 %952  ;;  %1419 = vrot.lane.b32.xlu0 %v1372_v18, %s6125_s14  ;;  %8481 = vst [vmem:[#allocation27_spill] sm:$0xff] %v7028_v26  ;;  %v694_v59 = vld [vmem:[#allocation2 + $0x1b0] sm:$0xff]  ;;  %v1378_v18 = vsel %vm1019_vm4, %v1375_v14, %v1377_v21  ;;  %v1452_v33 = vshll.u32 %v7028_v26, 16  ;;  %v5869_v14 = vld [vmem:[#allocation6 + $0x100] sm:$0xff]   ;;  %v1450_v61 = vor.u32 %v1448_v17, %v1446_v50 }
 0x114   : > { %2147 = vmatprep.mubr.bf16.mxu0 %v1566_v1  ;;  %v1494_v7 = vsel %vm562_vm0, %v6536_v28, %v953_v13  ;;  %5642 = vmatpush3.bf16.msra.mxu0 %v5868_v41  ;;  %v1379_v1 = vrot.slane %v6941_v12, 1  ;;  %v1439_v28 = vsel %vm749_vm3, %v6965_v30, %v1438_v5  ;;  %v1442_v41 = vor.u32 %v1440_v9, %v1438_v5 }
 0x115   : > { %v1102_v15 = vpop.permute.xlu0 %1101  ;;  %2341 = vmatprep.mubr.bf16.mxu1 %v1494_v7  ;;  %1421 = vrot.lane.b32.xlu1 %v1374_v35, %s6125_s14  ;;  %v7043_v35 = vpack.c.bf16 %v694_v59, %v694_v59  ;;  %v1570_v12 = vsel %vm562_vm0, %v7032_v44, %v1100_v43  ;;  %v1029_v30 = vrot.slane %v6551_v39, 1  ;;  %v1381_v9 = vrot.slane %v6953_v25, 1 }
 0x116   : > { %v1380_v5 = vsel %vm1019_vm4, %v1377_v21, %v1379_v1  ;;  %5643 = vmatprep.subr.bf16.mxu0 %v5869_v14  ;;  %v1447_v58 = vsel %vm749_vm3, %v1442_v41, %v1446_v50  ;;  %v1456_v43 = vshrl.u32 %v7028_v26, 16 }
 0x117   : > { %v955_v53 = vpop.permute.xlu1 %954  ;;  %1423 = vrot.lane.b32.xlu0 %v1376_v4, %s6125_s14  ;;  %8482 = vst [vmem:[#allocation28_spill] sm:$0xff] %v7043_v35  ;;  %v1454_v4 = vrot.slane %v1452_v33, 1  ;;  %v1460_v59 = vshll.u32 %v7043_v35, 16  ;;  %v7057_v21 = vsel %vm1019_vm4, %v1027_v20, %v1029_v30 }
 0x118   : > { %5644 = vmatpush3.bf16.msra.mxu0 %v5869_v14  ;;  %v1574_v20 = vsel %vm562_vm0, %v7057_v21, %v1102_v15 }
 0x119   : > { %v1104_v13 = vpop.permute.xlu0 %1103  ;;  %1425 = vrot.lane.b32.xlu1 %v1378_v18, %s6125_s14  ;;  %v1455_v50 = vsel %vm749_vm3, %v1450_v61, %v1454_v4  ;;  %v1458_v17 = vor.u32 %v1456_v43, %v1454_v4  ;;  %v1462_v33 = vrot.slane %v1460_v59, 1 }
 0x11b   : > { %2148 = vmatmul.mubr.bf16.gmra.mxu0 %v1491_v40  ;;  %v957_v16 = vpop.permute.xlu1 %956  ;;  %1464 = vrot.lane.b32.xlu0 %v1439_v28, %s6125_s14  ;;  %v1382_v40 = vsel %vm1019_vm4, %v1379_v1, %v1381_v9  ;;  %v1383_v28 = vrot.slane %v6968_v0, 1  ;;  %v1031_v1 = vrot.slane %v6563_v55, 1 }
 0x11c   : > { %2154 = vmatprep.mubr.bf16.mxu0 %v1570_v12  ;;  %v7063_v12 = vpack.c.bf16 %v7000_v51, %v7000_v51 }
 0x11d   : > { %v1106_v18 = vpop.permute.xlu0 %1105  ;;  %1427 = vrot.lane.b32.xlu1 %v1380_v5, %s6125_s14  ;;  %v1384_v5 = vsel %vm1019_vm4, %v1381_v9, %v1383_v28  ;;  %v7077_v15 = vsel %vm1019_vm4, %v1029_v30, %v1031_v1 }
 0x11e   : > { %8483 = vst [vmem:[#allocation29_spill] sm:$0xff] %v7063_v12  ;;  %v1385_v51 = vrot.slane %v7063_v12, 1  ;;  %v1578_v59 = vsel %vm562_vm0, %v7077_v15, %v1104_v13  ;;  %v1035_v13 = vrot.slane %v6581_v8, 1 }
 0x11f   : > { %v959_v41 = vpop.permute.xlu1 %958  ;;  %1466 = vrot.lane.b32.xlu0 %v1447_v58, %s6125_s14  ;;  %v1463_v58 = vsel %vm749_vm3, %v1458_v17, %v1462_v33  ;;  %v1500_v33 = vsel %vm562_vm0, %v6551_v39, %v957_v16 }
 0x120   : > { %v1386_v4 = vsel %vm1019_vm4, %v1383_v28, %v1385_v51  ;;  %v1503_v39 = vsel %vm562_vm0, %v6563_v55, %v959_v41 }
 0x121   : > { %v1108_v14 = vpop.permute.xlu0 %1107  ;;  %1429 = vrot.lane.b32.xlu1 %v1382_v40, %s6125_s14  ;;  %v1033_v40 = vrot.slane %v6574_v3, 1 }
 0x123   : > { %2155 = vmatmul.mubr.bf16.gmra.mxu0 %v1494_v7  ;;  %v961_v35 = vpop.permute.xlu1 %960  ;;  %1468 = vrot.lane.b32.xlu0 %v1455_v50, %s6125_s14  ;;  %v1497_v7 = vsel %vm562_vm0, %v6543_v32, %v955_v53  ;;  %v7088_v28 = vsel %vm1019_vm4, %v1031_v1, %v1033_v40  ;;  %v7100_v51 = vsel %vm1019_vm4, %v1033_v40, %v1035_v13 }
 0x124   : > { %2162 = vmatprep.mubr.bf16.mxu0 %v1574_v20  ;;  %v1582_v53 = vsel %vm562_vm0, %v7088_v28, %v1106_v18  ;;  %v1586_v18 = vsel %vm562_vm0, %v7100_v51, %v1108_v14  ;;  %v1506_v41 = vsel %vm562_vm0, %v6574_v3, %v961_v35 }
 0x125   : > { %v1110_v61 = vpop.permute.xlu0 %1109  ;;  %1431 = vrot.lane.b32.xlu1 %v1384_v5, %s6125_s14 }
 0x127   : > { %v963_v43 = vpop.permute.xlu1 %962  ;;  %1470 = vrot.lane.b32.xlu0 %v1463_v58, %s6125_s14  ;;  %v1037_v58 = vrot.slane %v6600_v31, 1 }
 0x128   : > { %v1509_v35 = vsel %vm562_vm0, %v6581_v8, %v963_v43 }
 0x129   : > { %v1112_v9 = vpop.permute.xlu0 %1111  ;;  %1433 = vrot.lane.b32.xlu1 %v1386_v4, %s6125_s14 }
 0x12b   : > { %2163 = vmatmul.mubr.bf16.gmra.mxu0 %v1497_v7  ;;  %v965_v50 = vpop.permute.xlu1 %964 }
 0x12c   : > { %2169 = vmatprep.mubr.bf16.mxu0 %v1578_v59  ;;  %v1512_v8 = vsel %vm562_vm0, %v6600_v31, %v965_v50 }
 0x12d   : > { %v1114_v30 = vpop.permute.xlu0 %1113 }
 0x12f   : > { %v967_v17 = vpop.permute.xlu1 %966 }
 0x130   : > { %v1515_v31 = vsel %vm562_vm0, %v6614_v42, %v967_v17 }
 0x131   : > { %v1116_v32 = vpop.permute.xlu0 %1115 }
 0x133   : > { %2170 = vmatmul.mubr.bf16.gmra.mxu0 %v1500_v33  ;;  %v7095_v20 = vpop.permute.xlu1 %968 }
 0x134   : > { %2176 = vmatprep.mubr.bf16.mxu0 %v1582_v53  ;;  %v7116_v53 = vsel %vm1019_vm4, %v1035_v13, %v1037_v58 }
 0x135   : > { %v7097_v5 = vpop.permute.xlu0 %1117  ;;  %v1590_v26 = vsel %vm562_vm0, %v7116_v53, %v1110_v61 }
 0x137   : > { %v7102_v1 = vpop.permute.xlu1 %970 }
 0x139   : > { %v7106_v16 = vpop.permute.xlu0 %1119 }
 0x13b   : > { %2177 = vmatmul.mubr.bf16.gmra.mxu0 %v1503_v39  ;;  %v7111_v4 = vpop.permute.xlu1 %972 }
 0x13c   : > { %2184 = vmatprep.mubr.bf16.mxu0 %v1586_v18  ;;  %v1039_v18 = vrot.slane %v6614_v42, 1  ;;  %v1518_v42 = vsel %vm562_vm0, %v6646_v22, %v7095_v20 }
 0x13d   : > { %v1388_v59 = vpop.permute.xlu0 %1387 }
 0x13e   : > { %v1654_v40 = vsel %vm562_vm0, %v6823_v2, %v1388_v59 }
 0x13f   : > { %2342 = vmatmul.mubr.bf16.vlgmr.msra.gmra.mxu1 %v1654_v40  ;;  %v7118_v55 = vpop.permute.xlu1 %1121  ;;  %v1041_v40 = vrot.slane %v6646_v22, 1 }
 0x140   : > { %2349 = vmatprep.mubr.bf16.mxu1 %v1497_v7  ;;  %v7132_v7 = vsel %vm1019_vm4, %v1037_v58, %v1039_v18  ;;  %v1043_v58 = vrot.slane %v6662_v36, 1 }
 0x141   : > { %v7122_v14 = vpop.permute.xlu0 %974  ;;  %v1594_v59 = vsel %vm562_vm0, %v7132_v7, %v1112_v9 }
 0x143   : > { %2185 = vmatmul.mubr.bf16.gmra.mxu0 %v1506_v41  ;;  %v1390_v12 = vpop.permute.xlu1 %1389 }
 0x144   : > { %v1658_v2 = vsel %vm562_vm0, %v6826_v47, %v1390_v12  ;;  %2191 = vmatprep.mubr.bf16.mxu0 %v1590_v26 }
 0x145   : > { %v7129_v13 = vpop.permute.xlu0 %1123 }
 0x147   : > { %2350 = vmatmul.mubr.bf16.gmra.mxu1 %v1658_v2  ;;  %v7134_v3 = vpop.permute.xlu1 %976 }
 0x148   : > { %2356 = vmatprep.mubr.bf16.mxu1 %v1500_v33  ;;  %v7148_v33 = vsel %vm1019_vm4, %v1039_v18, %v1041_v40 }
 0x149   : > { %v1392_v61 = vpop.permute.xlu0 %1391  ;;  %v1598_v9 = vsel %vm562_vm0, %v7148_v33, %v1114_v30 }
 0x14a   : > { %v1662_v26 = vsel %vm562_vm0, %v6843_v38, %v1392_v61  ;;  %v1045_v61 = vrot.slane %v6701_v10, 1 }
 0x14b   : > { %2192 = vmatmul.mubr.bf16.gmra.mxu0 %v1509_v35  ;;  %v7141_v47 = vpop.permute.xlu1 %1125 }
 0x14c   : > { %2198 = vmatprep.mubr.bf16.mxu0 %v1594_v59 }
 0x14d   : > { %v7145_v12 = vpop.permute.xlu0 %978 }
 0x14f   : > { %2357 = vmatmul.mubr.bf16.gmra.mxu1 %v1662_v26  ;;  %v1394_v43 = vpop.permute.xlu1 %1393  ;;  %v1193_v26 = vshrl.u32 %v6607_v34, 16  ;;  %v5871_v34 = vld [vmem:[#allocation8 + $0x38] sm:$0xff]  }
 0x150   : > { %2363 = vmatprep.mubr.bf16.mxu1 %v1503_v39  ;;  %v1666_v38 = vsel %vm562_vm0, %v6852_v19, %v1394_v43  ;;  %v7162_v39 = vsel %vm1019_vm4, %v1041_v40, %v1043_v58  ;;  %v1047_v43 = vrot.slane %v6720_v37, 1 }
 0x151   : > { %v7155_v2 = vpop.permute.xlu0 %1127  ;;  %v1602_v30 = vsel %vm562_vm0, %v7162_v39, %v1116_v32  ;;  %v1195_v22 = vor.u32 %v1193_v26, %v6897_v11 }
 0x153   : > { %2199 = vmatmul.mubr.bf16.gmra.mxu0 %v1512_v8  ;;  %v7159_v18 = vpop.permute.xlu1 %980 }
 0x154   : > { %2206 = vmatprep.mubr.bf16.mxu0 %v1598_v9 }
 0x155   : > { %v1396_v50 = vpop.permute.xlu0 %1395 }
 0x156   : > { %v1670_v19 = vsel %vm562_vm0, %v6875_v56, %v1396_v50  ;;  %v1197_v56 = vshll.u32 %v6625_v52, 16  ;;  %v1521_v50 = vsel %vm562_vm0, %v6662_v36, %v7102_v1 }
 0x157   : > { %2364 = vmatmul.mubr.bf16.gmra.mxu1 %v1666_v38  ;;  %v7169_v59 = vpop.permute.xlu1 %1129  ;;  %v5870_v38 = vld [vmem:[#allocation8 + $0x78] sm:$0xff]  }
 0x158   : > { %2371 = vmatprep.mubr.bf16.mxu1 %v1506_v41  ;;  %v7176_v41 = vsel %vm1019_vm4, %v1043_v58, %v1045_v61  ;;  %v1199_v20 = vrot.slane %v1197_v56, 1  ;;  %5253 = vmatprep.subr.bf16.mxu1 %v5870_v38  ;;  %v1209_v38 = vshrl.u32 %v6653_v24, 16 }
 0x159   : > { %v7173_v40 = vpop.permute.xlu0 %982  ;;  %v1606_v32 = vsel %vm562_vm0, %v7176_v41, %v7097_v5  ;;  %v7195_v5 = vsel %vm1019_vm4, %v1045_v61, %v1047_v43  ;;  %v1205_v61 = vshll.u32 %v6653_v24, 16  ;;  %5254 = vmatpush3.bf16.msra.mxu1 %v5871_v34  ;;  %v1527_v24 = vsel %vm562_vm0, %v6720_v37, %v7122_v14 }
 0x15a   : > { %v1200_v11 = vsel %vm749_vm3, %v1195_v22, %v1199_v20 }
 0x15b   : > { %2207 = vmatmul.mubr.bf16.gmra.mxu0 %v1515_v31  ;;  %v1398_v17 = vpop.permute.xlu1 %1397  ;;  %v1207_v26 = vrot.slane %v1205_v61, 1  ;;  %v1217_v61 = vshrl.u32 %v6685_v60, 16 }
 0x15c   : > { %2213 = vmatprep.mubr.bf16.mxu0 %v1602_v30 }
 0x15d   : > { %v7187_v9 = vpop.permute.xlu0 %1131 }
 0x15f   : > { %2372 = vmatmul.mubr.bf16.gmra.mxu1 %v1670_v19  ;;  %v7191_v58 = vpop.permute.xlu1 %984  ;;  %v1201_v19 = vshrl.u32 %v6625_v52, 16  ;;  %v1524_v52 = vsel %vm562_vm0, %v6701_v10, %v7111_v4  ;;  %v1211_v4 = vor.u32 %v1209_v38, %v1207_v26 }
 0x160   : > { %2378 = vmatprep.mubr.bf16.mxu1 %v1509_v35  ;;  %v1674_v35 = vsel %vm562_vm0, %v6904_v57, %v1398_v17  ;;  %v1610_v57 = vsel %vm562_vm0, %v7195_v5, %v7106_v16  ;;  %v1049_v17 = vrot.slane %v6744_v63, 1 }
 0x161   : > { %v1400_v30 = vpop.permute.xlu0 %1399 }
 0x162   : > { %v1678_v36 = vsel %vm562_vm0, %v1200_v11, %v1400_v30  ;;  %v7213_v16 = vsel %vm1019_vm4, %v1047_v43, %v1049_v17  ;;  %v1051_v43 = vrot.slane %v6765_v23, 1 }
 0x163   : > { %2214 = vmatmul.mubr.bf16.gmra.mxu0 %v1518_v42 }
 0x164   : > { %2220 = vmatprep.mubr.bf16.mxu0 %v1606_v32  ;;  %v1203_v32 = vor.u32 %v1201_v19, %v1199_v20  ;;  %v1213_v20 = vshll.u32 %v6685_v60, 16  ;;  %v1530_v60 = vsel %vm562_vm0, %v6744_v63, %v7134_v3 }
 0x165   : > { %v7210_v1 = vpop.permute.xlu0 %986 }
 0x166   : > { %v1208_v22 = vsel %vm749_vm3, %v1203_v32, %v1207_v26  ;;  %v1215_v30 = vrot.slane %v1213_v20, 1 }
 0x167   : > { %2379 = vmatmul.mubr.bf16.gmra.mxu1 %v1674_v35  ;;  %v1614_v35 = vsel %vm562_vm0, %v7213_v16, %v7118_v55  ;;  %v7231_v55 = vsel %vm1019_vm4, %v1049_v17, %v1051_v43  ;;  %v1053_v17 = vrot.slane %v6779_v48, 1 }
 0x168   : > { %2385 = vmatprep.mubr.bf16.mxu1 %v1512_v8  ;;  %v7207_v8 = vpop.permute.xlu1 %1133  ;;  %v1618_v11 = vsel %vm562_vm0, %v7231_v55, %v7129_v13  ;;  %v1216_v19 = vsel %vm749_vm3, %v1211_v4, %v1215_v30  ;;  %v1219_v14 = vor.u32 %v1217_v61, %v1215_v30  ;;  %v8484_v4 = vld [vmem:[#allocation16_spill] sm:$0xff] }
 0x169   : > { %v7225_v34 = vpop.permute.xlu0 %1135  ;;  %v7249_v13 = vsel %vm1019_vm4, %v1051_v43, %v1053_v17  ;;  %v1229_v43 = vshll.u32 %v6730_v46, 16  ;;  %v1055_v30 = vrot.slane %v8484_v4, 1 }
 0x16a   : > { %v1622_v38 = vsel %vm562_vm0, %v7249_v13, %v7141_v47 }
 0x16b   : > { %2221 = vmatmul.mubr.bf16.gmra.mxu0 %v1521_v50 }
 0x16c   : > { %2228 = vmatprep.mubr.bf16.mxu0 %v1610_v57  ;;  %v1402_v56 = vpop.permute.xlu1 %1401 }
 0x16d   : > { %v1404_v57 = vpop.permute.xlu0 %1403 }
 0x16f   : > { %2386 = vmatmul.mubr.bf16.gmra.mxu1 %v1678_v36  ;;  %v1221_v36 = vshll.u32 %v6712_v29, 16 }
 0x170   : > { %2393 = vmatprep.mubr.bf16.mxu1 %v1515_v31  ;;  %v1682_v31 = vsel %vm562_vm0, %v1208_v22, %v1402_v56  ;;  %v7228_v10 = vpop.permute.xlu1 %988  ;;  %v5872_v56 = vld [vmem:[#allocation8 + $0x70] sm:$0xff]  }
 0x171   : > { %v7246_v37 = vpop.permute.xlu0 %990  ;;  %v1223_v26 = vrot.slane %v1221_v36, 1  ;;  %5255 = vmatprep.subr.bf16.mxu1 %v5872_v56  ;;  %v1233_v36 = vshrl.u32 %v6730_v46, 16  ;;  %v1536_v46 = vsel %vm562_vm0, %v6779_v48, %v7159_v18  ;;  %v5874_v48 = vld [vmem:[#allocation8 + $0x68] sm:$0xff]  }
 0x173   : > { %2229 = vmatmul.mubr.bf16.gmra.mxu0 %v1524_v52  ;;  %v1224_v20 = vsel %vm749_vm3, %v1219_v14, %v1223_v26  ;;  %v8485_v14 = vld [vmem:[#allocation18_spill] sm:$0xff] }
 0x174   : > { %2235 = vmatprep.mubr.bf16.mxu0 %v1614_v35  ;;  %v7243_v32 = vpop.permute.xlu1 %1137  ;;  %v5873_v35 = vld [vmem:[#allocation8 + $0x30] sm:$0xff]  }
 0x175   : > { %5256 = vmatpush3.bf16.msra.mxu1 %v5873_v35 }
 0x176   : > { %5257 = vmatprep.subr.bf16.mxu1 %v5874_v48 }
 0x177   : > { %2394 = vmatmul.mubr.bf16.gmra.mxu1 %v1682_v31  ;;  %v1225_v31 = vshrl.u32 %v6712_v29, 16  ;;  %v1533_v29 = vsel %vm562_vm0, %v6765_v23, %v7145_v12 }
 0x178   : > { %2400 = vmatprep.mubr.bf16.mxu1 %v1518_v42  ;;  %v1686_v42 = vsel %vm562_vm0, %v1216_v19, %v1404_v57  ;;  %v1406_v22 = vpop.permute.xlu1 %1405  ;;  %v1231_v57 = vrot.slane %v1229_v43, 1  ;;  %v8487_v43 = vld [vmem:[#allocation19_spill] sm:$0xff] }
 0x179   : > { %v1690_v63 = vsel %vm562_vm0, %v1224_v20, %v1406_v22  ;;  %v1227_v3 = vor.u32 %v1225_v31, %v1223_v26  ;;  %v8486_v20 = vld [vmem:[#allocation14_spill] sm:$0xff] }
 0x17a   : > { %v1235_v23 = vor.u32 %v1233_v36, %v1231_v57  ;;  %v1245_v31 = vshll.u32 %v8486_v20, 16  ;;  %v8488_v36 = vld [vmem:[#allocation15_spill] sm:$0xff] }
 0x17b   : > { %2236 = vmatmul.mubr.bf16.gmra.mxu0 %v1527_v24  ;;  %v1232_v61 = vsel %vm749_vm3, %v1227_v3, %v1231_v57 }
 0x17c   : > { %2242 = vmatprep.mubr.bf16.mxu0 %v1618_v11  ;;  %v7265_v11 = vsel %vm1019_vm4, %v1053_v17, %v1055_v30  ;;  %v1057_v17 = vrot.slane %v8485_v14, 1  ;;  %v7277_v26 = vpop.permute.xlu1 %992  ;;  %v1247_v3 = vrot.slane %v1245_v31, 1  ;;  %v8491_v31 = vld [vmem:[#allocation22_spill] sm:$0xff] }
 0x17d   : > { %v1626_v19 = vsel %vm562_vm0, %v7265_v11, %v7155_v2 }
 0x17e   : > { %v7281_v56 = vsel %vm1019_vm4, %v1055_v30, %v1057_v17  ;;  %v1059_v30 = vrot.slane %v8487_v43, 1 }
 0x17f   : > { %2401 = vmatmul.mubr.bf16.gmra.mxu1 %v1686_v42  ;;  %v1237_v42 = vshll.u32 %v6742_v62, 16  ;;  %v1630_v35 = vsel %vm562_vm0, %v7281_v56, %v7169_v59  ;;  %v5875_v59 = vld [vmem:[#allocation8 + $0x28] sm:$0xff]  }
 0x180   : > { %2407 = vmatprep.mubr.bf16.mxu1 %v1521_v50  ;;  %v7261_v50 = vpop.permute.xlu0 %1139  ;;  %v1410_v2 = vpop.permute.xlu1 %1409  ;;  %v7295_v18 = vsel %vm1019_vm4, %v1057_v17, %v1059_v30  ;;  %v8489_v17 = vld [vmem:[#allocation21_spill] sm:$0xff]  ;;  %5258 = vmatpush3.bf16.msra.mxu1 %v5875_v59 }
 0x181   : > { %v1239_v12 = vrot.slane %v1237_v42, 1  ;;  %v1253_v42 = vshll.u32 %v8488_v36, 16 }
 0x183   : > { %2243 = vmatmul.mubr.bf16.gmra.mxu0 %v1530_v60  ;;  %v1240_v22 = vsel %vm749_vm3, %v1235_v23, %v1239_v12 }
 0x184   : > { %2250 = vmatprep.mubr.bf16.mxu0 %v1622_v38  ;;  %v1408_v47 = vpop.permute.xlu0 %1407  ;;  %v1241_v38 = vshrl.u32 %v6742_v62, 16  ;;  %v1539_v62 = vsel %vm562_vm0, %v8484_v4, %v7173_v40  ;;  %v1255_v4 = vrot.slane %v1253_v42, 1  ;;  %v5877_v42 = vld [vmem:[#allocation8 + $0x20] sm:$0xff]  }
 0x187   : > { %2408 = vmatmul.mubr.bf16.gmra.mxu1 %v1690_v63  ;;  %v1243_v63 = vor.u32 %v1241_v38, %v1239_v12  ;;  %v1414_v12 = vpop.permute.xlu1 %1413  ;;  %v8490_v38 = vld [vmem:[#allocation17_spill] sm:$0xff] }
 0x188   : > { %2415 = vmatprep.mubr.bf16.mxu1 %v1524_v52  ;;  %v1694_v52 = vsel %vm562_vm0, %v1232_v61, %v1408_v47  ;;  %v1412_v57 = vpop.permute.xlu0 %1411  ;;  %v1634_v47 = vsel %vm562_vm0, %v7295_v18, %v7187_v9  ;;  %v1249_v61 = vshrl.u32 %v8486_v20, 16  ;;  %v1542_v9 = vsel %vm562_vm0, %v8485_v14, %v7191_v58 }
 0x189   : > { %v1261_v20 = vshll.u32 %v8490_v38, 16  ;;  %v1265_v59 = vshrl.u32 %v8490_v38, 16 }
 0x18a   : > { %v1251_v40 = vor.u32 %v1249_v61, %v1247_v3 }
 0x18b   : > { %2251 = vmatmul.mubr.bf16.gmra.mxu0 %v1533_v29 }
 0x18c   : > { %2257 = vmatprep.mubr.bf16.mxu0 %v1626_v19  ;;  %v1248_v19 = vsel %vm749_vm3, %v1243_v63, %v1247_v3  ;;  %v1263_v63 = vrot.slane %v1261_v20, 1  ;;  %v1416_v14 = vpop.permute.xlu0 %1415 }
 0x18e   : > { %v1267_v61 = vor.u32 %v1265_v59, %v1263_v63 }
 0x18f   : > { %2416 = vmatmul.mubr.bf16.gmra.mxu1 %v1694_v52  ;;  %v1061_v52 = vrot.slane %v8489_v17, 1 }
 0x190   : > { %2422 = vmatprep.mubr.bf16.mxu1 %v1527_v24  ;;  %v1698_v24 = vsel %vm562_vm0, %v1240_v22, %v1410_v2  ;;  %v1257_v22 = vshrl.u32 %v8488_v36, 16 }
 0x191   : > { %v7309_v23 = vsel %vm1019_vm4, %v1059_v30, %v1061_v52  ;;  %v1063_v30 = vrot.slane %v8491_v31, 1 }
 0x192   : > { %v1638_v2 = vsel %vm562_vm0, %v7309_v23, %v7207_v8  ;;  %v1545_v8 = vsel %vm562_vm0, %v8487_v43, %v7210_v1  ;;  %v5876_v43 = vld [vmem:[#allocation8 + $0x60] sm:$0xff]  }
 0x193   : > { %2258 = vmatmul.mubr.bf16.gmra.mxu0 %v1536_v46  ;;  %v7323_v58 = vsel %vm1019_vm4, %v1061_v52, %v1063_v30  ;;  %5259 = vmatprep.subr.bf16.mxu1 %v5876_v43  ;;  %v1418_v52 = vpop.permute.xlu1 %1417  ;;  %v1301_v43 = vshll.u32 %v6928_v6, 16 }
 0x194   : > { %2264 = vmatprep.mubr.bf16.mxu0 %v1630_v35  ;;  %v1256_v35 = vsel %vm749_vm3, %v1251_v40, %v1255_v4  ;;  %v1642_v3 = vsel %vm562_vm0, %v7323_v58, %v7225_v34  ;;  %v1548_v34 = vsel %vm562_vm0, %v8489_v17, %v7228_v10  ;;  %5260 = vmatpush3.bf16.msra.mxu1 %v5877_v42 }
 0x197   : > { %2423 = vmatmul.mubr.bf16.gmra.mxu1 %v1698_v24  ;;  %v1259_v24 = vor.u32 %v1257_v22, %v1255_v4  ;;  %v1273_v4 = vshrl.u32 %v6847_v45, 16 }
 0x198   : > { %2429 = vmatprep.mubr.bf16.mxu1 %v1530_v60  ;;  %v1702_v60 = vsel %vm562_vm0, %v1248_v19, %v1412_v57  ;;  %v1269_v57 = vshll.u32 %v6847_v45, 16  ;;  %v1551_v45 = vsel %vm562_vm0, %v8491_v31, %v7246_v37  ;;  %v1422_v31 = vpop.permute.xlu1 %1421 }
 0x199   : > { %v1264_v48 = vsel %vm749_vm3, %v1259_v24, %v1263_v63 }
 0x19a   : > { %v1271_v1 = vrot.slane %v1269_v57, 1 }
 0x19b   : > { %2265 = vmatmul.mubr.bf16.gmra.mxu0 %v1539_v62 }
 0x19c   : > { %2272 = vmatprep.mubr.bf16.mxu0 %v1634_v47  ;;  %v8492_v47 = vld [vmem:[#allocation23_spill] sm:$0xff]  ;;  %v1272_v40 = vsel %vm749_vm3, %v1267_v61, %v1271_v1  ;;  %v1275_v10 = vor.u32 %v1273_v4, %v1271_v1  ;;  %v1297_v1 = vshrl.u32 %v6912_v49, 16  ;;  %v1426_v4 = vpop.permute.xlu1 %1425 }
 0x19d   : > { %v7335_v19 = vrot.slane %v8492_v47, 1  ;;  %v1554_v37 = vsel %vm562_vm0, %v8492_v47, %v7277_v26  ;;  %v5879_v26 = vld [vmem:[#allocation8 + $0x18] sm:$0xff]  }
 0x19f   : > { %2430 = vmatmul.mubr.bf16.gmra.mxu1 %v1702_v60  ;;  %v7340_v36 = vsel %vm1019_vm4, %v1063_v30, %v7335_v19  ;;  %v1281_v30 = vshrl.u32 %v6869_v54, 16 }
 0x1a0   : > { %2437 = vmatprep.mubr.bf16.mxu1 %v1533_v29  ;;  %v1706_v29 = vsel %vm562_vm0, %v1256_v35, %v1414_v12  ;;  %v1646_v60 = vsel %vm562_vm0, %v7340_v36, %v7243_v32  ;;  %v1277_v12 = vshll.u32 %v6869_v54, 16  ;;  %v1420_v32 = vpop.permute.xlu0 %1419  ;;  %v1293_v54 = vshll.u32 %v6912_v49, 16 }
 0x1a2   : > { %v1279_v17 = vrot.slane %v1277_v12, 1  ;;  %v1295_v57 = vrot.slane %v1293_v54, 1  ;;  %v5881_v54 = vld [vmem:[#allocation8 + $0x10] sm:$0xff]  }
 0x1a3   : > { %2273 = vmatmul.mubr.bf16.gmra.mxu0 %v1542_v9 }
 0x1a4   : > { %2279 = vmatprep.mubr.bf16.mxu0 %v1638_v2  ;;  %v8493_v2 = vld [vmem:[#allocation25_spill] sm:$0xff]  ;;  %v1280_v20 = vsel %vm749_vm3, %v1275_v10, %v1279_v17 }
 0x1a5   : > { %v1067_v35 = vrot.slane %v8493_v2, 1  ;;  %v1718_v63 = vsel %vm562_vm0, %v1280_v20, %v1420_v32  ;;  %v1305_v2 = vshrl.u32 %v6928_v6, 16  ;;  %v1428_v20 = vpop.permute.xlu1 %1427 }
 0x1a7   : > { %2438 = vmatmul.mubr.bf16.gmra.mxu1 %v1706_v29  ;;  %v1068_v22 = vsel %vm1019_vm4, %v7335_v19, %v1067_v35  ;;  %v8494_v29 = vld [vmem:[#allocation20_spill] sm:$0xff] }
 0x1a8   : > { %2444 = vmatprep.mubr.bf16.mxu1 %v1536_v46  ;;  %v1710_v46 = vsel %vm562_vm0, %v1264_v48, %v1416_v14  ;;  %v1650_v38 = vsel %vm562_vm0, %v1068_v22, %v7261_v50  ;;  %v1285_v24 = vshll.u32 %v8494_v29, 16  ;;  %v1283_v14 = vor.u32 %v1281_v30, %v1279_v17  ;;  %v8495_v35 = vld [vmem:[#allocation24_spill] sm:$0xff] }
 0x1ab   : > { %2280 = vmatmul.mubr.bf16.gmra.mxu0 %v1545_v8 }
 0x1ac   : > { %2286 = vmatprep.mubr.bf16.mxu0 %v1642_v3  ;;  %v1289_v3 = vshrl.u32 %v8494_v29, 16  ;;  %v1317_v29 = vshll.u32 %v6953_v25, 16 }
 0x1af   : > { %2445 = vmatmul.mubr.bf16.gmra.mxu1 %v1710_v46  ;;  %v1424_v46 = vpop.permute.xlu0 %1423 }
 0x1b0   : > { %2451 = vmatprep.mubr.bf16.mxu1 %v1539_v62  ;;  %v1714_v62 = vsel %vm562_vm0, %v1272_v40, %v1418_v52  ;;  %v1299_v52 = vor.u32 %v1297_v1, %v1295_v57 }
 0x1b3   : > { %2287 = vmatmul.mubr.bf16.gmra.mxu0 %v1548_v34 }
 0x1b4   : > { %2294 = vmatprep.mubr.bf16.mxu0 %v1646_v60  ;;  %v1303_v60 = vrot.slane %v1301_v43, 1 }
 0x1b6   : > { %v1304_v12 = vsel %vm749_vm3, %v1299_v52, %v1303_v60 }
 0x1b7   : > { %2452 = vmatmul.mubr.bf16.gmra.mxu1 %v1714_v62  ;;  %v1465_v62 = vpop.permute.xlu0 %1464 }
 0x1b8   : > { %2459 = vmatprep.mubr.bf16.mxu1 %v1542_v9  ;;  %v1287_v9 = vrot.slane %v1285_v24, 1  ;;  %v1749_v22 = vsel %vm562_vm0, %v8492_v47, %v1465_v62 }
 0x1ba   : > { %v1288_v50 = vsel %vm749_vm3, %v1283_v14, %v1287_v9  ;;  %v1291_v59 = vor.u32 %v1289_v3, %v1287_v9  ;;  %v8496_v14 = vld [vmem:[#allocation26_spill] sm:$0xff] }
 0x1bb   : > { %2295 = vmatmul.mubr.bf16.gmra.mxu0 %v1551_v45  ;;  %v1722_v48 = vsel %vm562_vm0, %v1288_v50, %v1422_v31  ;;  %v1467_v24 = vpop.permute.xlu0 %1466  ;;  %v1319_v31 = vrot.slane %v1317_v29, 1  ;;  %v5880_v50 = vld [vmem:[#allocation8 + $0x50] sm:$0xff]  }
 0x1bc   : > { %2301 = vmatprep.mubr.bf16.mxu0 %v1650_v38  ;;  %v1296_v61 = vsel %vm749_vm3, %v1291_v59, %v1295_v57  ;;  %v1752_v9 = vsel %vm562_vm0, %v8496_v14, %v1467_v24  ;;  %v1430_v59 = vpop.permute.xlu1 %1429  ;;  %v1321_v57 = vshrl.u32 %v6953_v25, 16 }
 0x1be   : > { %v1323_v43 = vor.u32 %v1321_v57, %v1319_v31  ;;  %v5888_v57 = vld [vmem:[#allocation8 + $0xe8] sm:$0xff]  }
 0x1bf   : > { %2460 = vmatmul.mubr.bf16.gmra.mxu1 %v1718_v63 }
 0x1c0   : > { %2466 = vmatprep.mubr.bf16.mxu1 %v1545_v8  ;;  %v5878_v8 = vld [vmem:[#allocation8 + $0x58] sm:$0xff]   ;;  %v1432_v52 = vpop.permute.xlu1 %1431 }
 0x1c1   : > { %5261 = vmatprep.subr.bf16.mxu1 %v5878_v8  ;;  %v1469_v8 = vpop.permute.xlu0 %1468 }
 0x1c2   : > { %5262 = vmatpush3.bf16.msra.mxu1 %v5879_v26  ;;  %v1755_v1 = vsel %vm562_vm0, %v7009_v27, %v1469_v8 }
 0x1c3   : > { %2302 = vmatmul.mubr.bf16.gmra.mxu0 %v1554_v37  ;;  %5263 = vmatprep.subr.bf16.mxu1 %v5880_v50 }
 0x1c4   : > { %5645 = vmatprep.mubr.msk.bf16.mxu0 %vm562_vm0, %v7032_v44  ;;  %v1726_v44 = vsel %vm562_vm0, %v1296_v61, %v1424_v46 }
 0x1c6   : > { %5264 = vmatpush3.bf16.msra.mxu1 %v5881_v54 }
 0x1c7   : > { %2467 = vmatmul.mubr.bf16.gmra.mxu1 %v1722_v48 }
 0x1c8   : > { %2473 = vmatprep.mubr.bf16.mxu1 %v1548_v34 }
 0x1cb   : > { %v7376_v42 = vpop.f32.mrf.mxu0  ;;  %5646 = vmatmul.mubr.msk.bf16.vlgmr.msra.gmra.mxu0 %vm562_vm0, %v7057_v21  ;;  %v1309_v21 = vshll.u32 %v8495_v35, 16 }
 0x1cc   : > { %5649 = vmatprep.mubr.msk.bf16.mxu0 %vm562_vm0, %v7077_v15  ;;  %v1730_v15 = vsel %vm562_vm0, %v1304_v12, %v1426_v4  ;;  %v1471_v12 = vpop.permute.xlu0 %1470 }
 0x1cd   : > { %v2136_v34 = vpop.f32.mrf.mxu0  ;;  %v1311_v32 = vrot.slane %v1309_v21, 1  ;;  %v8498_v21 = vld [vmem:[#allocation27_spill] sm:$0xff] }
 0x1ce   : > { %v1758_v62 = vsel %vm562_vm0, %v8498_v21, %v1471_v12 }
 0x1cf   : > { %v7383_v40 = vpop.f32.mrf.mxu0  ;;  %2474 = vmatmul.mubr.bf16.gmra.mxu1 %v1726_v44 }
 0x1d0   : > { %2481 = vmatprep.mubr.bf16.mxu1 %v1551_v45  ;;  %v1307_v45 = vor.u32 %v1305_v2, %v1303_v60 }
 0x1d1   : > { %v2139_v49 = vpop.f32.mrf.mxu0 }
 0x1d2   : > { %v1312_v30 = vsel %vm749_vm3, %v1307_v45, %v1311_v32  ;;  %v8497_v49 = vld [vmem:[#allocation29_spill] sm:$0xff] }
 0x1d3   : > { %v2142_v10 = vpop.f32.mrf.mxu0  ;;  %5650 = vmatmul.mubr.msk.bf16.gmra.mxu0 %vm562_vm0, %v7088_v28  ;;  %v1313_v28 = vshrl.u32 %v8495_v35, 16  ;;  %v1734_v47 = vsel %vm562_vm0, %v1312_v30, %v1428_v20  ;;  %v1333_v4 = vshll.u32 %v8497_v49, 16  ;;  %v5883_v30 = vld [vmem:[#allocation8 + $0x8] sm:$0xff]  }
 0x1d4   : > { %5653 = vmatprep.mubr.msk.bf16.mxu0 %vm562_vm0, %v7100_v51 }
 0x1d5   : > { %v2143_v17 = vpop.f32.mrf.mxu0  ;;  %v1315_v37 = vor.u32 %v1313_v28, %v1311_v32 }
 0x1d7   : > { %v7395_v38 = vpop.f32.mrf.mxu0  ;;  %2482 = vmatmul.mubr.bf16.gmra.mxu1 %v1730_v15  ;;  %v1335_v15 = vrot.slane %v1333_v4, 1  ;;  %v5895_v4 = vld [vmem:[#allocation8 + $0x98] sm:$0xff]  }
 0x1d8   : > { %2488 = vmatprep.mubr.bf16.mxu1 %v1749_v22  ;;  %v1434_v22 = vpop.permute.xlu1 %1433 }
 0x1d9   : > { %v2146_v6 = vpop.f32.mrf.mxu0 }
 0x1da   : > { %v5882_v6 = vld [vmem:[#allocation8 + $0x48] sm:$0xff]  }
 0x1db   : > { %v7400_v51 = vpop.f32.mrf.mxu0  ;;  %5654 = vmatmul.mubr.msk.bf16.gmra.mxu0 %vm562_vm0, %v7116_v53  ;;  %v1320_v53 = vsel %vm749_vm3, %v1315_v37, %v1319_v31  ;;  %5265 = vmatprep.subr.bf16.mxu1 %v5882_v6  ;;  %v5885_v31 = vld [vmem:[#allocation8 + $0xb8] sm:$0xff]   ;;  %v5899_v6 = vld [vmem:[#allocation8 + $0x88] sm:$0xff]  }
 0x1dc   : > { %5657 = vmatprep.mubr.msk.bf16.mxu0 %vm562_vm0, %v7132_v7  ;;  %v1325_v7 = vshll.u32 %v6968_v0, 16  ;;  %v1738_v46 = vsel %vm562_vm0, %v1320_v53, %v1430_v59  ;;  %5266 = vmatpush3.bf16.msra.mxu1 %v5883_v30 }
 0x1dd   : > { %v2151_v63 = vpop.f32.mrf.mxu0 }
 0x1de   : > { %v1327_v25 = vrot.slane %v1325_v7, 1  ;;  %v5884_v63 = vld [vmem:[#allocation8 + $0xf8] sm:$0xff]  }
 0x1df   : > { %v2152_v3 = vpop.f32.mrf.mxu0  ;;  %2489 = vmatmul.mubr.bf16.gmra.mxu1 %v1734_v47  ;;  %5341 = vmatprep.subr.bf16.mxu0 %v5884_v63 }
 0x1e0   : > { %2495 = vmatprep.mubr.bf16.mxu1 %v1752_v9  ;;  %v1328_v60 = vsel %vm749_vm3, %v1323_v43, %v1327_v25  ;;  %5342 = vmatpush3.bf16.msra.mxu0 %v5885_v31 }
 0x1e1   : > { %v2153_v48 = vpop.f32.mrf.mxu0  ;;  %v1742_v2 = vsel %vm562_vm0, %v1328_v60, %v1432_v52 }
 0x1e2   : > { %v5887_v48 = vld [vmem:[#allocation8 + $0xb0] sm:$0xff]  }
 0x1e3   : > { %v7412_v26 = vpop.f32.mrf.mxu0  ;;  %5658 = vmatmul.mubr.msk.bf16.gmra.mxu0 %vm562_vm0, %v7148_v33  ;;  %v1329_v33 = vshrl.u32 %v6968_v0, 16 }
 0x1e4   : > { %5661 = vmatprep.mubr.msk.bf16.mxu0 %vm562_vm0, %v7162_v39 }
 0x1e5   : > { %v2158_v61 = vpop.f32.mrf.mxu0  ;;  %v1331_v10 = vor.u32 %v1329_v33, %v1327_v25  ;;  %v1476_v25 = vrot.slane %v8496_v14, 1  ;;  %v5890_v14 = vld [vmem:[#allocation8 + $0x40] sm:$0xff]  }
 0x1e6   : > { %v5891_v61 = vld [vmem:[#allocation8 + $0xe0] sm:$0xff]   ;;  %5267 = vmatprep.subr.bf16.mxu1 %v5890_v14 }
 0x1e7   : > { %v7421_v44 = vpop.f32.mrf.mxu0  ;;  %2496 = vmatmul.mubr.bf16.gmra.mxu1 %v1738_v46  ;;  %v1336_v45 = vsel %vm749_vm3, %v1331_v10, %v1335_v15  ;;  %v5896_v10 = vld [vmem:[#allocation8 + $0xd0] sm:$0xff]  }
 0x1e8   : > { %2503 = vmatprep.mubr.bf16.mxu1 %v1755_v1  ;;  %v5897_v15 = vld [vmem:[#allocation8 + $0x90] sm:$0xff]  }
 0x1e9   : > { %v2161_v34 = vpop.f32.mrf.mxu0 }
 0x1ea   : > { %v5893_v34 = vld [vmem:[#allocation8 + $0xa0] sm:$0xff]  }
 0x1eb   : > { %v2164_v39 = vpop.f32.mrf.mxu0  ;;  %5662 = vmatmul.mubr.msk.bf16.gmra.mxu0 %vm562_vm0, %v7176_v41 }
 0x1ec   : > { %5665 = vmatprep.mubr.msk.bf16.mxu0 %vm562_vm0, %v7195_v5  ;;  %v1746_v5 = vsel %vm562_vm0, %v1336_v45, %v1434_v22 }
 0x1ed   : > { %v2165_v35 = vpop.f32.mrf.mxu0 }
 0x1ef   : > { %v7433_v17 = vpop.f32.mrf.mxu0  ;;  %2504 = vmatmul.mubr.bf16.gmra.mxu1 %v1742_v2 }
 0x1f0   : > { %2510 = vmatprep.mubr.bf16.mxu1 %v1758_v62  ;;  %v1480_v62 = vrot.slane %v8498_v21, 1  ;;  %v5898_v21 = vld [vmem:[#allocation8 + $0xc8] sm:$0xff]  }
 0x1f1   : > { %v2168_v0 = vpop.f32.mrf.mxu0 }
 0x1f3   : > { %v7436_v41 = vpop.f32.mrf.mxu0  ;;  %5666 = vmatmul.mubr.msk.bf16.gmra.mxu0 %vm562_vm0, %v7213_v16 }
 0x1f4   : > { %5669 = vmatprep.mubr.msk.bf16.mxu0 %vm562_vm0, %v7231_v55 }
 0x1f5   : > { %v2173_v32 = vpop.f32.mrf.mxu0 }
 0x1f7   : > { %v2174_v20 = vpop.f32.mrf.mxu0  ;;  %2511 = vmatmul.mubr.bf16.gmra.mxu1 %v1746_v5 }
 0x1f9   : > { %v2175_v28 = vpop.f32.mrf.mxu0 }
 0x1fb   : > { %v7443_v29 = vpop.f32.mrf.mxu0  ;;  %5670 = vmatmul.mubr.msk.bf16.gmra.mxu0 %vm562_vm0, %v7249_v13 }
 0x1fc   : > { %5673 = vmatprep.mubr.msk.bf16.mxu0 %vm562_vm0, %v7265_v11  ;;  %v5886_v11 = vld [vmem:[#allocation8 + $0xf0] sm:$0xff]  }
 0x1fd   : > { %v2180_v16 = vpop.f32.mrf.mxu0  ;;  %5343 = vmatprep.subr.bf16.mxu0 %v5886_v11 }
 0x1fe   : > { %5344 = vmatpush3.bf16.msra.mxu0 %v5887_v48 }
 0x1ff   : > { %v7449_v24 = vpop.f32.mrf.mxu0  ;;  %v2343_v55 = vpop.f32.mrf.mxu1  ;;  %5345 = vmatprep.subr.bf16.mxu0 %v5888_v57 }
 0x200   : > { %v7452_v47 = vadd.f32 %v2343_v55, %v7376_v42 }
 0x201   : > { %v2183_v9 = vpop.f32.mrf.mxu0  ;;  %v2345_v37 = vpop.f32.mrf.mxu1 }
 0x202   : > { %v5900_v9 = vld [vmem:[#allocation8 + $0xc0] sm:$0xff]  }
 0x203   : > { %v2186_v50 = vpop.f32.mrf.mxu0  ;;  %v2346_v3 = vpop.f32.mrf.mxu1  ;;  %5674 = vmatmul.mubr.msk.bf16.gmra.mxu0 %vm562_vm0, %v7281_v56  ;;  %v5889_v56 = vld [vmem:[#allocation8 + $0xa8] sm:$0xff]   ;;  %v5901_v37 = vld [vmem:[#allocation8 + $0x80] sm:$0xff]  }
 0x204   : > { %v7457_v13 = vadd.f32 %v2346_v3, %v7383_v40  ;;  %5677 = vmatprep.mubr.msk.bf16.mxu0 %vm562_vm0, %v7295_v18  ;;  %5346 = vmatpush3.bf16.msra.mxu0 %v5889_v56 }
 0x205   : > { %v2187_v42 = vpop.f32.mrf.mxu0  ;;  %v2348_v54 = vpop.f32.mrf.mxu1  ;;  %5347 = vmatprep.subr.bf16.mxu0 %v5891_v61 }
 0x207   : > { %v7461_v59 = vpop.f32.mrf.mxu0  ;;  %v2351_v53 = vpop.f32.mrf.mxu1 }
 0x208   : > { %5348 = vmatpush3.bf16.msra.mxu0 %v5893_v34 }
 0x209   : > { %v2190_v7 = vpop.f32.mrf.mxu0  ;;  %v2352_v8 = vpop.f32.mrf.mxu1 }
 0x20b   : > { %v7463_v40 = vpop.f32.mrf.mxu0  ;;  %v2353_v46 = vpop.f32.mrf.mxu1  ;;  %5678 = vmatmul.mubr.msk.bf16.gmra.mxu0 %vm562_vm0, %v7309_v23  ;;  %v5894_v23 = vld [vmem:[#allocation8 + $0xd8] sm:$0xff]  }
 0x20c   : > { %v7468_v18 = vadd.f32 %v2353_v46, %v7395_v38  ;;  %5681 = vmatprep.mubr.msk.bf16.mxu0 %vm562_vm0, %v7323_v58  ;;  %v1477_v58 = vsel %vm1019_vm4, %v7335_v19, %v1476_v25  ;;  %5349 = vmatprep.subr.bf16.mxu0 %v5894_v23  ;;  %v5892_v19 = vld [vmem:[#allocation8] sm:$0xff]  }
 0x20d   : > { %v2195_v1 = vpop.f32.mrf.mxu0  ;;  %v2355_v43 = vpop.f32.mrf.mxu1  ;;  %5350 = vmatpush3.bf16.msra.mxu0 %v5895_v4  ;;  %5268 = vmatpush3.bf16.msra.mxu1 %v5892_v19 }
 0x20e   : > { %5351 = vmatprep.subr.bf16.mxu0 %v5896_v10 }
 0x20f   : > { %v2196_v52 = vpop.f32.mrf.mxu0  ;;  %v2358_v60 = vpop.f32.mrf.mxu1 }
 0x210   : > { %v7474_v33 = vadd.f32 %v2358_v60, %v7400_v51  ;;  %v1478_v51 = vrot.slane %v7009_v27, 1 }
 0x211   : > { %v2197_v38 = vpop.f32.mrf.mxu0  ;;  %v2360_v49 = vpop.f32.mrf.mxu1  ;;  %5352 = vmatpush3.bf16.msra.mxu0 %v5897_v15 }
 0x212   : > { %v1479_v45 = vsel %vm1019_vm4, %v1476_v25, %v1478_v51  ;;  %v1481_v32 = vsel %vm1019_vm4, %v1478_v51, %v1480_v62  ;;  %5353 = vmatprep.subr.bf16.mxu0 %v5898_v21  ;;  %v5902_v25 = vld [vmem:[#allocation8 + $0x178] sm:$0xff]  }
 0x213   : > { %v7478_v12 = vpop.f32.mrf.mxu0  ;;  %v2361_v39 = vpop.f32.mrf.mxu1  ;;  %5682 = vmatmul.mubr.msk.bf16.gmra.mxu0 %vm562_vm0, %v7340_v36  ;;  %5429 = vmatprep.subr.bf16.mxu1 %v5902_v25 }
 0x214   : > { %5685 = vmatprep.mubr.msk.bf16.mxu0 %vm562_vm0, %v1477_v58 }
 0x215   : > { %v2202_v2 = vpop.f32.mrf.mxu0  ;;  %v2362_v35 = vpop.f32.mrf.mxu1  ;;  %5354 = vmatpush3.bf16.msra.mxu0 %v5899_v6 }
 0x216   : > { %5355 = vmatprep.subr.bf16.mxu0 %v5900_v9 }
 0x217   : > { %v7485_v0 = vpop.f32.mrf.mxu0  ;;  %v2365_v22 = vpop.f32.mrf.mxu1 }
 0x218   : > { %v7488_v36 = vadd.f32 %v2365_v22, %v7412_v26  ;;  %v8499_v26 = vld [vmem:[#allocation28_spill] sm:$0xff] }
 0x219   : > { %v2205_v27 = vpop.f32.mrf.mxu0  ;;  %v2367_v5 = vpop.f32.mrf.mxu1  ;;  %v1482_v16 = vrot.slane %v8499_v26, 1  ;;  %5356 = vmatpush3.bf16.msra.mxu0 %v5901_v37 }
 0x21b   : > { %v2208_v20 = vpop.f32.mrf.mxu0  ;;  %v2368_v30 = vpop.f32.mrf.mxu1  ;;  %5686 = vmatmul.mubr.msk.bf16.gmra.mxu0 %vm562_vm0, %v1479_v45  ;;  %v1483_v3 = vsel %vm1019_vm4, %v1480_v62, %v1482_v16 }
 0x21c   : > { %v7494_v28 = vadd.f32 %v2368_v30, %v7421_v44  ;;  %5689 = vmatprep.mubr.msk.bf16.mxu0 %vm562_vm0, %v1481_v32 }
 0x21d   : > { %v2209_v55 = vpop.f32.mrf.mxu0  ;;  %v2370_v63 = vpop.f32.mrf.mxu1 }
 0x21f   : > { %v7498_v31 = vpop.f32.mrf.mxu0  ;;  %v2373_v50 = vpop.f32.mrf.mxu1 }
 0x221   : > { %v2212_v11 = vpop.f32.mrf.mxu0  ;;  %v2374_v42 = vpop.f32.mrf.mxu1 }
 0x223   : > { %v7501_v44 = vpop.f32.mrf.mxu0  ;;  %v2375_v54 = vpop.f32.mrf.mxu1  ;;  %5690 = vmatmul.mubr.msk.bf16.gmra.mxu0 %vm562_vm0, %v1483_v3 }
 0x224   : > { %v7505_v48 = vadd.f32 %v2375_v54, %v7433_v17 }
 0x225   : > { %v2217_v53 = vpop.f32.mrf.mxu0  ;;  %v2377_v57 = vpop.f32.mrf.mxu1 }
 0x227   : > { %v2218_v7 = vpop.f32.mrf.mxu0  ;;  %v2380_v8 = vpop.f32.mrf.mxu1 }
 0x228   : > { %v7508_v56 = vadd.f32 %v2380_v8, %v7436_v41 }
 0x229   : > { %v2219_v46 = vpop.f32.mrf.mxu0  ;;  %v2382_v61 = vpop.f32.mrf.mxu1 }
 0x22b   : > { %v7510_v1 = vpop.f32.mrf.mxu0  ;;  %v2383_v43 = vpop.f32.mrf.mxu1 }
 0x22d   : > { %v2224_v34 = vpop.f32.mrf.mxu0  ;;  %v2384_v52 = vpop.f32.mrf.mxu1 }
 0x22f   : > { %v7512_v60 = vpop.f32.mrf.mxu0  ;;  %v2387_v17 = vpop.f32.mrf.mxu1 }
 0x230   : > { %v7515_v23 = vadd.f32 %v2387_v17, %v7443_v29 }
 0x231   : > { %v2227_v38 = vpop.f32.mrf.mxu0  ;;  %v2389_v49 = vpop.f32.mrf.mxu1 }
 0x233   : > { %v2230_v58 = vpop.f32.mrf.mxu0  ;;  %v2390_v41 = vpop.f32.mrf.mxu1 }
 0x234   : > { %v7518_v4 = vadd.f32 %v2390_v41, %v7449_v24 }
 0x235   : > { %v2231_v39 = vpop.f32.mrf.mxu0  ;;  %v2392_v14 = vpop.f32.mrf.mxu1 }
 0x237   : > { %v7520_v51 = vpop.f32.mrf.mxu0  ;;  %v2395_v2 = vpop.f32.mrf.mxu1 }
 0x239   : > { %v2234_v35 = vpop.f32.mrf.mxu0  ;;  %v2396_v62 = vpop.f32.mrf.mxu1 }
 0x23a   : > { %v5914_v62 = vld [vmem:[#allocation8 + $0x1f8] sm:$0xff]  }
 0x23b   : > { %v7522_v19 = vpop.f32.mrf.mxu0  ;;  %v2397_v10 = vpop.f32.mrf.mxu1  ;;  %5517 = vmatprep.subr.bf16.mxu0 %v5914_v62 }
 0x23c   : > { %v7525_v29 = vadd.f32 %v2397_v10, %v7461_v59 }
 0x23d   : > { %v2239_v15 = vpop.f32.mrf.mxu0  ;;  %v2399_v22 = vpop.f32.mrf.mxu1 }
 0x23f   : > { %v2240_v45 = vpop.f32.mrf.mxu0  ;;  %v2402_v27 = vpop.f32.mrf.mxu1 }
 0x240   : > { %v7528_v24 = vadd.f32 %v2402_v27, %v7463_v40 }
 0x241   : > { %v2241_v5 = vpop.f32.mrf.mxu0  ;;  %v2404_v32 = vpop.f32.mrf.mxu1 }
 0x243   : > { %v7530_v21 = vpop.f32.mrf.mxu0  ;;  %v2405_v6 = vpop.f32.mrf.mxu1 }
 0x245   : > { %v2246_v20 = vpop.f32.mrf.mxu0  ;;  %v2406_v30 = vpop.f32.mrf.mxu1 }
 0x247   : > { %v7532_v26 = vpop.f32.mrf.mxu0  ;;  %v2409_v16 = vpop.f32.mrf.mxu1 }
 0x248   : > { %v7535_v59 = vadd.f32 %v2409_v16, %v7478_v12 }
 0x249   : > { %v2249_v55 = vpop.f32.mrf.mxu0  ;;  %v2411_v63 = vpop.f32.mrf.mxu1 }
 0x24b   : > { %v2252_v9 = vpop.f32.mrf.mxu0  ;;  %v2412_v37 = vpop.f32.mrf.mxu1 }
 0x24c   : > { %v7538_v40 = vadd.f32 %v2412_v37, %v7485_v0 }
 0x24d   : > { %v2253_v50 = vpop.f32.mrf.mxu0  ;;  %v2414_v3 = vpop.f32.mrf.mxu1 }
 0x24f   : > { %v7540_v11 = vpop.f32.mrf.mxu0  ;;  %v2417_v42 = vpop.f32.mrf.mxu1 }
 0x251   : > { %v2256_v54 = vpop.f32.mrf.mxu0  ;;  %v2418_v53 = vpop.f32.mrf.mxu1 }
 0x253   : > { %v7542_v57 = vpop.f32.mrf.mxu0  ;;  %v2419_v7 = vpop.f32.mrf.mxu1 }
 0x254   : > { %v7545_v12 = vadd.f32 %v2419_v7, %v7498_v31 }
 0x255   : > { %v2261_v8 = vpop.f32.mrf.mxu0  ;;  %v2421_v46 = vpop.f32.mrf.mxu1 }
 0x257   : > { %v2262_v61 = vpop.f32.mrf.mxu0  ;;  %v2424_v43 = vpop.f32.mrf.mxu1 }
 0x258   : > { %v7548_v0 = vadd.f32 %v2424_v43, %v7501_v44 }
 0x259   : > { %v2263_v25 = vpop.f32.mrf.mxu0  ;;  %v2426_v34 = vpop.f32.mrf.mxu1 }
 0x25b   : > { %v7550_v52 = vpop.f32.mrf.mxu0  ;;  %v2427_v17 = vpop.f32.mrf.mxu1 }
 0x25d   : > { %v2268_v38 = vpop.f32.mrf.mxu0  ;;  %v2428_v49 = vpop.f32.mrf.mxu1 }
 0x25f   : > { %v7552_v58 = vpop.f32.mrf.mxu0  ;;  %v2431_v41 = vpop.f32.mrf.mxu1 }
 0x260   : > { %v7555_v31 = vadd.f32 %v2431_v41, %v7510_v1 }
 0x261   : > { %v2271_v39 = vpop.f32.mrf.mxu0  ;;  %v2433_v14 = vpop.f32.mrf.mxu1 }
 0x263   : > { %v2274_v2 = vpop.f32.mrf.mxu0  ;;  %v2434_v35 = vpop.f32.mrf.mxu1 }
 0x264   : > { %v7558_v44 = vadd.f32 %v2434_v35, %v7512_v60 }
 0x265   : > { %v2275_v10 = vpop.f32.mrf.mxu0  ;;  %v2436_v15 = vpop.f32.mrf.mxu1 }
 0x267   : > { %v7560_v22 = vpop.f32.mrf.mxu0  ;;  %v2439_v45 = vpop.f32.mrf.mxu1 }
 0x269   : > { %v2278_v27 = vpop.f32.mrf.mxu0  ;;  %v2440_v5 = vpop.f32.mrf.mxu1 }
 0x26b   : > { %v7562_v32 = vpop.f32.mrf.mxu0  ;;  %v2441_v1 = vpop.f32.mrf.mxu1 }
 0x26c   : > { %v7565_v6 = vadd.f32 %v2441_v1, %v7520_v51 }
 0x26d   : > { %v2283_v20 = vpop.f32.mrf.mxu0  ;;  %v2443_v30 = vpop.f32.mrf.mxu1 }
 0x26e   : > { %v7593_v20 = vld [vmem:[%s8410_s4] ss:$0 sm:$0xff] }
 0x26f   : > { %v2284_v16 = vpop.f32.mrf.mxu0  ;;  %v2446_v55 = vpop.f32.mrf.mxu1 }
 0x270   : > { %v7568_v60 = vadd.f32 %v2446_v55, %v7522_v19 }
 0x271   : > { %v2285_v63 = vpop.f32.mrf.mxu0  ;;  %v2448_v9 = vpop.f32.mrf.mxu1 }
 0x273   : > { %v7570_v37 = vpop.f32.mrf.mxu0  ;;  %v2449_v50 = vpop.f32.mrf.mxu1 }
 0x275   : > { %v2290_v3 = vpop.f32.mrf.mxu0  ;;  %v2450_v42 = vpop.f32.mrf.mxu1 }
 0x277   : > { %v7572_v54 = vpop.f32.mrf.mxu0  ;;  %v2453_v53 = vpop.f32.mrf.mxu1 }
 0x278   : > { %v7575_v51 = vadd.f32 %v2453_v53, %v7530_v21 }
 0x279   : > { %v2293_v7 = vpop.f32.mrf.mxu0  ;;  %v2455_v8 = vpop.f32.mrf.mxu1 }
 0x27a   : > { %v5946_v8 = vld [vmem:[#allocation3 + $0x1a0] sm:$0xff] }
 0x27b   : > { %v2296_v46 = vpop.f32.mrf.mxu0  ;;  %v2456_v61 = vpop.f32.mrf.mxu1 }
 0x27c   : > { %v7578_v19 = vadd.f32 %v2456_v61, %v7532_v26  ;;  %v7603_v46 = vpack.c.bf16 %v5946_v8, %v5946_v8 }
 0x27d   : > { %v2297_v43 = vpop.f32.mrf.mxu0  ;;  %v2458_v25 = vpop.f32.mrf.mxu1 }
 0x27f   : > { %v7580_v34 = vpop.f32.mrf.mxu0  ;;  %v2461_v17 = vpop.f32.mrf.mxu1 }
 0x281   : > { %v2300_v38 = vpop.f32.mrf.mxu0  ;;  %v2462_v49 = vpop.f32.mrf.mxu1 }
 0x283   : > { %v7582_v41 = vpop.f32.mrf.mxu0  ;;  %v2463_v39 = vpop.f32.mrf.mxu1 }
 0x284   : > { %v7585_v21 = vadd.f32 %v2463_v39, %v7540_v11 }
 0x285   : > { %v2305_v14 = vpop.f32.mrf.mxu0  ;;  %v2465_v2 = vpop.f32.mrf.mxu1 }
 0x286   : > { %v3009_v2 = vshll.u32 %v7603_v46, 16 }
 0x287   : > { %v2306_v35 = vpop.f32.mrf.mxu0  ;;  %v2468_v62 = vpop.f32.mrf.mxu1 }
 0x288   : > { %v7588_v26 = vadd.f32 %v2468_v62, %v7542_v57 }
 0x289   : > { %v2307_v10 = vpop.f32.mrf.mxu0  ;;  %v2470_v15 = vpop.f32.mrf.mxu1 }
 0x28b   : > { %v2471_v45 = vpop.f32.mrf.mxu1  ;;  %v5647_v27 = vpop.f32.mrf.mxu0 }
 0x28d   : > { %v2472_v5 = vpop.f32.mrf.mxu1  ;;  %v2552_v1 = vpop.f32.mrf.mxu0 }
 0x28e   : > { %v2553_v11 = vadd.f32 %v2552_v1, %v7452_v47  ;;  %v3007_v5 = vshrl.u32 %v7603_v46, 16  ;;  %v3011_v1 = vrot.slane %v3009_v2, 1 }
 0x28f   : > { %v2475_v30 = vpop.f32.mrf.mxu1  ;;  %v5648_v16 = vpop.f32.mrf.mxu0 }
 0x290   : > { %vm2727_vm5 = vcmp.ge.f32.partialorder %v2553_v11, 0.0  ;;  %v2766_v55 = vmul.f32 %v7593_v20, %v2553_v11  ;;  %v7598_v57 = vadd.f32 %v2475_v30, %v7550_v52  ;;  %v2563_v63 = vadd.f32 %v5648_v16, %v7468_v18 }
 0x291   : > { %v2477_v9 = vpop.f32.mrf.mxu1  ;;  %v2555_v50 = vpop.f32.mrf.mxu0 }
 0x292   : > { %v2798_v3 = vsel %vm2727_vm5, %v2553_v11, %v2766_v55  ;;  %vm2729_vm6 = vcmp.ge.f32.partialorder %v2563_v63, 0.0  ;;  %v2768_v42 = vmul.f32 %v7593_v20, %v2563_v63  ;;  %v2556_v53 = vadd.f32 %v2555_v50, %v7457_v13 }
 0x293   : > { %2882 = vst [vmem:[#allocation3 + $0x19] sm:$0xff] %v2798_v3  ;;  %v2478_v47 = vpop.f32.mrf.mxu1  ;;  %v5651_v7 = vpop.f32.mrf.mxu0  ;;  %v3131_v9 = vrot.slane %v7603_v46, 1 }
 0x294   : > { %v2800_v61 = vsel %vm2729_vm6, %v2563_v63, %v2768_v42  ;;  %vm2728_vm7 = vcmp.ge.f32.partialorder %v2556_v53, 0.0  ;;  %v2767_v52 = vmul.f32 %v7593_v20, %v2556_v53  ;;  %v7607_v18 = vadd.f32 %v2478_v47, %v7552_v58 }
 0x295   : > { %2884 = vst [vmem:[#allocation3 + $0x31] sm:$0xff] %v2800_v61  ;;  %v2575_v43 = vadd.f32 %v5651_v7, %v7488_v36  ;;  %v2480_v25 = vpop.f32.mrf.mxu1  ;;  %v2567_v17 = vpop.f32.mrf.mxu0  ;;  %v3012_v61 = vor.u32 %v3011_v1, %v3007_v5  ;;  %v5904_v1 = vld [vmem:[#allocation8 + $0x170] sm:$0xff]  }
 0x296   : > { %v2799_v38 = vsel %vm2728_vm7, %v2556_v53, %v2767_v52  ;;  %v2568_v13 = vadd.f32 %v2567_v17, %v7474_v33 }
 0x297   : > { %2883 = vst [vmem:[#allocation3 + $0x21] sm:$0xff] %v2799_v38  ;;  %vm2731_vm8 = vcmp.ge.f32.partialorder %v2575_v43, 0.0  ;;  %v2770_v49 = vmul.f32 %v7593_v20, %v2575_v43  ;;  %v2483_v39 = vpop.f32.mrf.mxu1  ;;  %v5652_v14 = vpop.f32.mrf.mxu0 }
 0x298   : > { %vm2730_vm9 = vcmp.ge.f32.partialorder %v2568_v13, 0.0  ;;  %v2769_v58 = vmul.f32 %v7593_v20, %v2568_v13  ;;  %v2578_v35 = vadd.f32 %v5652_v14, %v7494_v28  ;;  %v5916_v14 = vld [vmem:[#allocation8 + $0x1f0] sm:$0xff]  }
 0x299   : > { %v2802_v62 = vsel %vm2731_vm8, %v2575_v43, %v2770_v49  ;;  %v2484_v36 = vpop.f32.mrf.mxu1  ;;  %v2570_v10 = vpop.f32.mrf.mxu0  ;;  %v5915_v43 = vld [vmem:[#allocation8 + $0x1b8] sm:$0xff]  }
 0x29a   : > { %2886 = vst [vmem:[#allocation3 + $0x49] sm:$0xff] %v2802_v62  ;;  %v2801_v15 = vsel %vm2730_vm9, %v2568_v13, %v2769_v58  ;;  %vm2732_vm10 = vcmp.ge.f32.partialorder %v2578_v35, 0.0  ;;  %v2771_v33 = vmul.f32 %v7593_v20, %v2578_v35  ;;  %v2917_v3 = vld [vmem:[#allocation3 + $0x18] sm:$0xff] }
 0x29b   : > { %2885 = vst [vmem:[#allocation3 + $0x39] sm:$0xff] %v2801_v15  ;;  %v7616_v45 = vpop.f32.mrf.mxu1  ;;  %v5655_v27 = vpop.f32.mrf.mxu0 }
 0x29c   : > { %v2803_v11 = vsel %vm2732_vm10, %v2578_v35, %v2771_v33  ;;  %v2590_v30 = vadd.f32 %v5655_v27, %v7508_v56  ;;  %v2920_v16 = vld [vmem:[#allocation3 + $0x30] sm:$0xff]  ;;  %v5903_v35 = vld [vmem:[#allocation8 + $0x138] sm:$0xff]  }
 0x29d   : > { %2887 = vst [vmem:[#allocation3 + $0x51] sm:$0xff] %v2803_v11  ;;  %v2487_v28 = vpop.f32.mrf.mxu1  ;;  %v2582_v55 = vpop.f32.mrf.mxu0  ;;  %v7620_v63 = vpack.c.bf16 %v2920_v16, %v5946_v8  ;;  %v5917_v11 = vld [vmem:[#allocation8 + $0x1b0] sm:$0xff]  }
 0x29e   : > { %vm2734_vm11 = vcmp.ge.f32.partialorder %v2590_v30, 0.0  ;;  %v2773_v50 = vmul.f32 %v7593_v20, %v2590_v30  ;;  %v2918_v42 = vld [vmem:[#allocation3 + $0x20] sm:$0xff]  ;;  %v2919_v13 = vld [vmem:[#allocation3 + $0x28] sm:$0xff] }
 0x29f   : > { %v7624_v53 = vpop.f32.mrf.mxu1  ;;  %v5656_v47 = vpop.f32.mrf.mxu0  ;;  %v7626_v7 = vpack.c.bf16 %v2918_v42, %v2917_v3  ;;  %v3132_v56 = vrot.slane %v7620_v63, 1  ;;  %v3014_v52 = vshll.u32 %v7620_v63, 16  ;;  %v3018_v28 = vshrl.u32 %v7620_v63, 16 }
 0x2a0   : > { %v2805_v8 = vsel %vm2734_vm11, %v2590_v30, %v2773_v50  ;;  %v5918_v50 = vld [vmem:[#allocation8 + $0x1e8] sm:$0xff]  }
 0x2a1   : > { %2889 = vst [vmem:[#allocation3 + $0x69] sm:$0xff] %v2805_v8  ;;  %v2492_v25 = vpop.f32.mrf.mxu1  ;;  %v2584_v17 = vpop.f32.mrf.mxu0  ;;  %4221 = vmatprep.mubr.bf16.mxu0 %v7626_v7  ;;  %v3133_v38 = vsel %vm1019_vm4, %v3131_v9, %v3132_v56  ;;  %v2923_v49 = vld [vmem:[#allocation3 + $0x48] sm:$0xff]  ;;  %v3016_v39 = vrot.slane %v3014_v52, 1  ;;  %v3171_v10 = vshll.u32 %v7626_v7, 16  ;;  %v3293_v52 = vrot.slane %v7626_v7, 1 }
 0x2a2   : > { %v2585_v2 = vadd.f32 %v2584_v17, %v7505_v48  ;;  %4222 = vmatmul.mubr.bf16.vlgmr.msra.gmra.mxu0 %v3133_v38  ;;  %v7635_v58 = vpack.c.bf16 %v2923_v49, %v2919_v13  ;;  %v2921_v62 = vld [vmem:[#allocation3 + $0x38] sm:$0xff]  ;;  %v7637_v36 = vld [vmem:[#allocation3 + $0x40] sm:$0xff]  ;;  %v3169_v17 = vshrl.u32 %v7626_v7, 16 }
 0x2a3   : > { %v2493_v15 = vpop.f32.mrf.mxu1  ;;  %v5659_v33 = vpop.f32.mrf.mxu0  ;;  %v3017_v27 = vsel %vm749_vm3, %v3012_v61, %v3016_v39  ;;  %v7642_v5 = vpack.c.bf16 %v7637_v36, %v2921_v62  ;;  %5518 = vmatpush3.bf16.msra.mxu0 %v5915_v43  ;;  %v7644_v48 = vpack.c.bf16 %v2921_v62, %v2920_v16  ;;  %v3173_v43 = vrot.slane %v3171_v10, 1 }
 0x2a4   : > { %vm2733_vm12 = vcmp.ge.f32.partialorder %v2585_v2, 0.0  ;;  %v2772_v30 = vmul.f32 %v7593_v20, %v2585_v2  ;;  %4229 = vmatprep.mubr.bf16.mxu0 %v7635_v58  ;;  %4100 = vmatprep.mubr.bf16.mxu1 %v3017_v27  ;;  %v2924_v55 = vld [vmem:[#allocation3 + $0x50] sm:$0xff]  ;;  %v2925_v9 = vld [vmem:[#allocation3 + $0x58] sm:$0xff]  ;;  %v3294_v3 = vrot.slane %v7635_v58, 1 }
 0x2a5   : > { %v2494_v42 = vpop.f32.mrf.mxu1  ;;  %v2596_v47 = vpop.f32.mrf.mxu0  ;;  %4101 = vmatmul.mubr.bf16.vlgmr.msra.gmra.mxu1 %v7603_v46  ;;  %v3022_v16 = vshll.u32 %v7642_v5, 16  ;;  %v3134_v61 = vrot.slane %v7642_v5, 1  ;;  %5519 = vmatprep.subr.bf16.mxu0 %v5916_v14  ;;  %v3020_v46 = vor.u32 %v3018_v28, %v3016_v39  ;;  %v7661_v62 = vpack.c.bf16 %v2925_v9, %v2924_v55  ;;  %v5905_v14 = vld [vmem:[#allocation8 + $0x130] sm:$0xff]   ;;  %v5919_v39 = vld [vmem:[#allocation8 + $0x1a8] sm:$0xff]  }
 0x2a6   : > { %v2804_v8 = vsel %vm2733_vm12, %v2585_v2, %v2772_v30  ;;  %v2597_v25 = vadd.f32 %v2596_v47, %v7515_v23  ;;  %5430 = vmatpush3.bf16.msra.mxu1 %v5903_v35  ;;  %v7666_v2 = vsel %vm1019_vm4, %v3293_v52, %v3294_v3  ;;  %v5906_v35 = vld [vmem:[#allocation8 + $0x168] sm:$0xff]   ;;  %v3176_v30 = vshll.u32 %v7635_v58, 16 }
 0x2a7   : > { %2888 = vst [vmem:[#allocation3 + $0x61] sm:$0xff] %v2804_v8  ;;  %v7657_v38 = vpop.f32.mrf.mxu1  ;;  %v5660_v13 = vpop.f32.mrf.mxu0  ;;  %v7659_v49 = vrot.slane %v3022_v16, 1  ;;  %5431 = vmatprep.subr.bf16.mxu1 %v5904_v1  ;;  %5520 = vmatpush3.bf16.msra.mxu0 %v5917_v11  ;;  %v3135_v27 = vsel %vm1019_vm4, %v3132_v56, %v3134_v61  ;;  %v5922_v1 = vld [vmem:[#allocation8 + $0x1e0] sm:$0xff]   ;;  %v3174_v11 = vor.u32 %v3173_v43, %v3169_v17  ;;  %v5907_v56 = vld [vmem:[#allocation8 + $0x128] sm:$0xff]   ;;  %v3296_v47 = vrot.slane %v7661_v62, 1 }
 0x2a8   : > { %vm2735_vm13 = vcmp.ge.f32.partialorder %v2597_v25, 0.0  ;;  %v2774_v23 = vmul.f32 %v7593_v20, %v2597_v25  ;;  %v2607_v7 = vadd.f32 %v5660_v13, %v7525_v29  ;;  %5521 = vmatprep.subr.bf16.mxu0 %v5918_v50  ;;  %v7683_v42 = vrot.slane %v3176_v30, 1  ;;  %v5923_v43 = vld [vmem:[#allocation8 + $0x1a0] sm:$0xff]   ;;  %v5924_v13 = vld [vmem:[#allocation8 + $0x1d8] sm:$0xff]  }
 0x2a9   : > { %v2499_v10 = vpop.f32.mrf.mxu1  ;;  %v2599_v15 = vpop.f32.mrf.mxu0  ;;  %v3025_v33 = vsel %vm749_vm3, %v3020_v46, %v7659_v49 }
 0x2aa   : > { %v2806_v28 = vsel %vm2735_vm13, %v2597_v25, %v2774_v23  ;;  %vm2737_vm14 = vcmp.ge.f32.partialorder %v2607_v7, 0.0  ;;  %v2776_v29 = vmul.f32 %v7593_v20, %v2607_v7  ;;  %v2600_v55 = vadd.f32 %v2599_v15, %v7518_v4  ;;  %4108 = vmatprep.mubr.bf16.mxu1 %v3025_v33  ;;  %4230 = vmatmul.mubr.bf16.gmra.mxu0 %v3135_v27  ;;  %v5908_v4 = vld [vmem:[#allocation8 + $0x160] sm:$0xff]  }
 0x2ab   : > { %2890 = vst [vmem:[#allocation3 + $0x79] sm:$0xff] %v2806_v28  ;;  %v7680_v9 = vpop.f32.mrf.mxu1  ;;  %v5663_v50 = vpop.f32.mrf.mxu0  ;;  %4236 = vmatprep.mubr.bf16.mxu0 %v7661_v62  ;;  %5432 = vmatpush3.bf16.msra.mxu1 %v5905_v14  ;;  %v7691_v46 = vsel %vm749_vm3, %v3174_v11, %v7683_v42  ;;  %v7698_v14 = vsel %vm1019_vm4, %v3294_v3, %v3296_v47  ;;  %v2928_v33 = vld [vmem:[#allocation3 + $0x70] sm:$0xff]  ;;  %v5910_v11 = vld [vmem:[#allocation8 + $0x158] sm:$0xff]  }
 0x2ac   : > { %v2808_v16 = vsel %vm2737_vm14, %v2607_v7, %v2776_v29  ;;  %vm2736_vm15 = vcmp.ge.f32.partialorder %v2600_v55, 0.0  ;;  %v2775_v52 = vmul.f32 %v7593_v20, %v2600_v55  ;;  %5433 = vmatprep.subr.bf16.mxu1 %v5906_v35  ;;  %5522 = vmatpush3.bf16.msra.mxu0 %v5919_v39  ;;  %v2619_v8 = vadd.f32 %v5663_v50, %v7535_v59  ;;  %v5909_v27 = vld [vmem:[#allocation8 + $0x120] sm:$0xff]  }
 0x2ad   : > { %2892 = vst [vmem:[#allocation3 + $0x91] sm:$0xff] %v2808_v16  ;;  %v2502_v25 = vpop.f32.mrf.mxu1  ;;  %v2611_v17 = vpop.f32.mrf.mxu0  ;;  %4109 = vmatmul.mubr.bf16.gmra.mxu1 %v7620_v63  ;;  %5523 = vmatprep.subr.bf16.mxu0 %v5922_v1  ;;  %v5925_v16 = vld [vmem:[#allocation8 + $0x198] sm:$0xff]  }
 0x2ae   : > { %v2807_v23 = vsel %vm2736_vm15, %v2600_v55, %v2775_v52  ;;  %v2612_v59 = vadd.f32 %v2611_v17, %v7528_v24  ;;  %v2926_v7 = vld [vmem:[#allocation3 + $0x60] sm:$0xff]  ;;  %v2927_v35 = vld [vmem:[#allocation3 + $0x68] sm:$0xff]  ;;  %vm2739_vm1 = vcmp.ge.f32.partialorder %v2619_v8, 0.0  ;;  %v2778_v63 = vmul.f32 %v7593_v20, %v2619_v8 }
 0x2af   : > { %2891 = vst [vmem:[#allocation3 + $0x81] sm:$0xff] %v2807_v23  ;;  %v2505_v39 = vpop.f32.mrf.mxu1  ;;  %v5664_v10 = vpop.f32.mrf.mxu0  ;;  %v7702_v15 = vpack.c.bf16 %v2927_v35, %v2926_v7  ;;  %5434 = vmatpush3.bf16.msra.mxu1 %v5907_v56  ;;  %v7705_v1 = vpack.c.bf16 %v2926_v7, %v7637_v36  ;;  %v7709_v30 = vpack.c.bf16 %v2928_v33, %v2927_v35  ;;  %v3026_v56 = vshrl.u32 %v7642_v5, 16  ;;  %v5911_v35 = vld [vmem:[#allocation8 + $0x118] sm:$0xff]  }
 0x2b0   : > { %vm2738_vm2 = vcmp.ge.f32.partialorder %v2612_v59, 0.0  ;;  %v2777_v3 = vmul.f32 %v7593_v20, %v2612_v59  ;;  %v2622_v24 = vadd.f32 %v5664_v10, %v7538_v40  ;;  %5435 = vmatprep.subr.bf16.mxu1 %v5908_v4  ;;  %5524 = vmatpush3.bf16.msra.mxu0 %v5923_v43  ;;  %v2810_v28 = vsel %vm2739_vm1, %v2619_v8, %v2778_v63  ;;  %v5926_v4 = vld [vmem:[#allocation8 + $0x1d0] sm:$0xff]  }
 0x2b1   : > { %v2506_v29 = vpop.f32.mrf.mxu1  ;;  %v2614_v55 = vpop.f32.mrf.mxu0  ;;  %v3136_v50 = vrot.slane %v7702_v15, 1  ;;  %v3030_v36 = vshll.u32 %v7702_v15, 16  ;;  %5525 = vmatprep.subr.bf16.mxu0 %v5924_v13  ;;  %2894 = vst [vmem:[#allocation3 + $0xa9] sm:$0xff] %v2810_v28  ;;  %v3028_v17 = vor.u32 %v3026_v56, %v7659_v49  ;;  %v5912_v28 = vld [vmem:[#allocation8 + $0x150] sm:$0xff]   ;;  %v3034_v56 = vshrl.u32 %v7702_v15, 16 }
 0x2b2   : > { %v2809_v40 = vsel %vm2738_vm2, %v2612_v59, %v2777_v3  ;;  %vm2740_vm5 = vcmp.ge.f32.partialorder %v2622_v24, 0.0  ;;  %v2779_v52 = vmul.f32 %v7593_v20, %v2622_v24 }
 0x2b3   : > { %2893 = vst [vmem:[#allocation3 + $0x99] sm:$0xff] %v2809_v40  ;;  %v7717_v43 = vpop.f32.mrf.mxu1  ;;  %v5667_v8 = vpop.f32.mrf.mxu0  ;;  %v3137_v25 = vsel %vm1019_vm4, %v3134_v61, %v3136_v50  ;;  %v3032_v13 = vrot.slane %v3030_v36, 1  ;;  %5436 = vmatpush3.bf16.msra.mxu1 %v5909_v27  ;;  %v3184_v61 = vshll.u32 %v7661_v62, 16  ;;  %v5930_v40 = vld [vmem:[#allocation8 + $0x1c8] sm:$0xff]  }
 0x2b4   : > { %v2811_v23 = vsel %vm2740_vm5, %v2622_v24, %v2779_v52  ;;  %v2634_v59 = vadd.f32 %v5667_v8, %v7548_v0  ;;  %4237 = vmatmul.mubr.bf16.gmra.mxu0 %v3137_v25  ;;  %v2932_v7 = vld [vmem:[#allocation3 + $0x90] sm:$0xff]  ;;  %5437 = vmatprep.subr.bf16.mxu1 %v5910_v11  ;;  %v2929_v0 = vld [vmem:[#allocation3 + $0x78] sm:$0xff]  ;;  %v5927_v24 = vld [vmem:[#allocation8 + $0x190] sm:$0xff]   ;;  %v3180_v11 = vshrl.u32 %v7635_v58, 16 }
 0x2b5   : > { %2895 = vst [vmem:[#allocation3 + $0xb1] sm:$0xff] %v2811_v23  ;;  %v2509_v63 = vpop.f32.mrf.mxu1  ;;  %v2626_v39 = vpop.f32.mrf.mxu0  ;;  %v3033_v10 = vsel %vm749_vm3, %v3028_v17, %v3032_v13  ;;  %v7727_v3 = vpack.c.bf16 %v2932_v7, %v2928_v33  ;;  %5526 = vmatpush3.bf16.msra.mxu0 %v5925_v16 }
 0x2b6   : > { %vm2742_vm6 = vcmp.ge.f32.partialorder %v2634_v59, 0.0  ;;  %v2781_v49 = vmul.f32 %v7593_v20, %v2634_v59  ;;  %4115 = vmatprep.mubr.bf16.mxu1 %v3033_v10  ;;  %v2930_v27 = vld [vmem:[#allocation3 + $0x80] sm:$0xff]  ;;  %5527 = vmatprep.subr.bf16.mxu0 %v5926_v4  ;;  %v3182_v58 = vor.u32 %v3180_v11, %v7683_v42  ;;  %v2931_v17 = vld [vmem:[#allocation3 + $0x88] sm:$0xff]  ;;  %v5920_v63 = vld [vmem:[#allocation8 + $0x148] sm:$0xff]   ;;  %v3186_v39 = vrot.slane %v3184_v61, 1 }
 0x2b7   : > { %v7732_v29 = vpop.f32.mrf.mxu1  ;;  %v5668_v55 = vpop.f32.mrf.mxu0  ;;  %4116 = vmatmul.mubr.bf16.gmra.mxu1 %v7642_v5  ;;  %v7735_v33 = vpack.c.bf16 %v2930_v27, %v2929_v0  ;;  %v3038_v36 = vshll.u32 %v7727_v3, 16  ;;  %v3138_v16 = vrot.slane %v7727_v3, 1  ;;  %v5913_v4 = vld [vmem:[#allocation8 + $0x110] sm:$0xff]   ;;  %v3036_v5 = vor.u32 %v3034_v56, %v3032_v13  ;;  %v5931_v61 = vld [vmem:[#allocation8 + $0x188] sm:$0xff]  }
 0x2b8   : > { %v2813_v52 = vsel %vm2742_vm6, %v2634_v59, %v2781_v49  ;;  %5438 = vmatpush3.bf16.msra.mxu1 %v5911_v35  ;;  %v2935_v23 = vld [vmem:[#allocation3 + $0xa8] sm:$0xff]  ;;  %v5932_v55 = vld [vmem:[#allocation8 + $0x1c0] sm:$0xff]  }
 0x2b9   : > { %2897 = vst [vmem:[#allocation3 + $0xc9] sm:$0xff] %v2813_v52  ;;  %v2628_v8 = vpop.f32.mrf.mxu0  ;;  %4243 = vmatprep.mubr.bf16.mxu0 %v7735_v33  ;;  %v3040_v25 = vrot.slane %v3038_v36, 1  ;;  %5439 = vmatprep.subr.bf16.mxu1 %v5912_v28  ;;  %v3298_v10 = vrot.slane %v7735_v33, 1  ;;  %v2514_v0 = vpop.f32.mrf.mxu1  ;;  %v3139_v42 = vsel %vm1019_vm4, %v3136_v50, %v3138_v16  ;;  %v7750_v35 = vpack.c.bf16 %v2935_v23, %v2931_v17 }
 0x2ba   : > { %v2629_v59 = vadd.f32 %v2628_v8, %v7545_v12  ;;  %v2933_v13 = vld [vmem:[#allocation3 + $0x98] sm:$0xff]  ;;  %v7752_v49 = vld [vmem:[#allocation3 + $0xa0] sm:$0xff]  ;;  %v3042_v28 = vshrl.u32 %v7727_v3, 16  ;;  %5528 = vmatpush3.bf16.msra.mxu0 %v5927_v24  ;;  %v3192_v50 = vshll.u32 %v7735_v33, 16  ;;  %v7764_v24 = vsel %vm749_vm3, %v3182_v58, %v3186_v39 }
 0x2bb   : > { %v5671_v27 = vpop.f32.mrf.mxu0  ;;  %v3041_v11 = vsel %vm749_vm3, %v3036_v5, %v3040_v25  ;;  %v7757_v12 = vpack.c.bf16 %v7752_v49, %v2933_v13  ;;  %5529 = vmatprep.subr.bf16.mxu0 %v5930_v40  ;;  %v7759_v56 = vpack.c.bf16 %v2933_v13, %v2932_v7  ;;  %v2515_v36 = vpop.f32.mrf.mxu1  ;;  %v7771_v40 = vsel %vm1019_vm4, %v3296_v47, %v3298_v10  ;;  %v5921_v5 = vld [vmem:[#allocation8 + $0x108] sm:$0xff]  }
 0x2bc   : > { %vm2741_vm7 = vcmp.ge.f32.partialorder %v2629_v59, 0.0  ;;  %v2780_v52 = vmul.f32 %v7593_v20, %v2629_v59  ;;  %4122 = vmatprep.mubr.bf16.mxu1 %v3041_v11  ;;  %4244 = vmatmul.mubr.bf16.gmra.mxu0 %v3139_v42  ;;  %v3188_v17 = vshrl.u32 %v7661_v62, 16  ;;  %v3044_v42 = vor.u32 %v3042_v28, %v3040_v25  ;;  %v2936_v13 = vld [vmem:[#allocation3 + $0xb0] sm:$0xff]  ;;  %v2937_v27 = vld [vmem:[#allocation3 + $0xb8] sm:$0xff] }
 0x2bd   : > { %v2640_v7 = vpop.f32.mrf.mxu0  ;;  %4251 = vmatprep.mubr.bf16.mxu0 %v7750_v35  ;;  %v3046_v8 = vshll.u32 %v7757_v12, 16  ;;  %5440 = vmatpush3.bf16.msra.mxu1 %v5913_v4  ;;  %v2516_v23 = vpop.f32.mrf.mxu1  ;;  %v5928_v11 = vld [vmem:[#allocation8 + $0x140] sm:$0xff]   ;;  %v3140_v4 = vrot.slane %v7757_v12, 1 }
 0x2be   : > { %v2812_v0 = vsel %vm2741_vm7, %v2629_v59, %v2780_v52  ;;  %v2641_v58 = vadd.f32 %v2640_v7, %v7555_v31  ;;  %5441 = vmatprep.subr.bf16.mxu1 %v5920_v63  ;;  %5530 = vmatpush3.bf16.msra.mxu0 %v5931_v61  ;;  %v5933_v62 = vld [vmem:[#allocation8 + $0x180] sm:$0xff]   ;;  %v3190_v23 = vor.u32 %v3188_v17, %v3186_v39  ;;  %v3194_v59 = vrot.slane %v3192_v50, 1 }
 0x2bf   : > { %2896 = vst [vmem:[#allocation3 + $0xc1] sm:$0xff] %v2812_v0  ;;  %v5672_v47 = vpop.f32.mrf.mxu0  ;;  %4123 = vmatmul.mubr.bf16.gmra.mxu1 %v7702_v15  ;;  %v7778_v36 = vrot.slane %v3046_v8, 1  ;;  %5531 = vmatprep.subr.bf16.mxu0 %v5932_v55  ;;  %v7785_v61 = vpack.c.bf16 %v2937_v27, %v2936_v13  ;;  %v5929_v15 = vld [vmem:[#allocation8 + $0x100] sm:$0xff]   ;;  %v3300_v55 = vrot.slane %v7750_v35, 1  ;;  %v3200_v27 = vshll.u32 %v7750_v35, 16 }
 0x2c0   : > { %vm2743_vm8 = vcmp.ge.f32.partialorder %v2641_v58, 0.0  ;;  %v2782_v31 = vmul.f32 %v7593_v20, %v2641_v58  ;;  %v2651_v25 = vadd.f32 %v5672_v47, %v7565_v6  ;;  %v7788_v52 = vsel %vm749_vm3, %v3190_v23, %v3194_v59  ;;  %v7793_v6 = vld [vmem:[#allocation8 + $0x238] sm:$0xff]  }
 0x2c1   : > { %v2643_v63 = vpop.f32.mrf.mxu0  ;;  %v3049_v28 = vsel %vm749_vm3, %v3044_v42, %v7778_v36  ;;  %5442 = vmatpush3.bf16.msra.mxu1 %v5921_v5  ;;  %v3141_v5 = vsel %vm1019_vm4, %v3138_v16, %v3140_v4  ;;  %v7805_v17 = vsel %vm1019_vm4, %v3298_v10, %v3300_v55  ;;  %v3302_v10 = vrot.slane %v7785_v61, 1 }
 0x2c2   : > { %v2814_v39 = vsel %vm2743_vm8, %v2641_v58, %v2782_v31  ;;  %vm2745_vm9 = vcmp.ge.f32.partialorder %v2651_v25, 0.0  ;;  %v2784_v50 = vmul.f32 %v7593_v20, %v2651_v25  ;;  %v2644_v7 = vadd.f32 %v2643_v63, %v7558_v44  ;;  %4130 = vmatprep.mubr.bf16.mxu1 %v3049_v28  ;;  %5443 = vmatprep.subr.bf16.mxu1 %v5928_v11 }
 0x2c3   : > { %2898 = vst [vmem:[#allocation3 + $0xd9] sm:$0xff] %v2814_v39  ;;  %v5675_v8 = vpop.f32.mrf.mxu0  ;;  %5532 = vmatpush3.bf16.msra.mxu0 %v5933_v62  ;;  %v3196_v44 = vshrl.u32 %v7735_v33, 16  ;;  %v3202_v28 = vrot.slane %v3200_v27, 1 }
 0x2c4   : > { %v2816_v0 = vsel %vm2745_vm9, %v2651_v25, %v2784_v50  ;;  %vm2744_vm10 = vcmp.ge.f32.partialorder %v2644_v7, 0.0  ;;  %v2783_v58 = vmul.f32 %v7593_v20, %v2644_v7  ;;  %v2663_v42 = vadd.f32 %v5675_v8, %v7575_v51  ;;  %4252 = vmatmul.mubr.bf16.gmra.mxu0 %v3141_v5  ;;  %v2940_v51 = vld [vmem:[#allocation3 + $0xd0] sm:$0xff] }
 0x2c5   : > { %2900 = vst [vmem:[#allocation3 + $0xf1] sm:$0xff] %v2816_v0  ;;  %v2655_v13 = vpop.f32.mrf.mxu0  ;;  %4258 = vmatprep.mubr.bf16.mxu0 %v7785_v61  ;;  %5444 = vmatpush3.bf16.msra.mxu1 %v5929_v15  ;;  %v3198_v16 = vor.u32 %v3196_v44, %v3194_v59 }
 0x2c6   : > { %v2815_v11 = vsel %vm2744_vm10, %v2644_v7, %v2783_v58  ;;  %vm2747_vm11 = vcmp.ge.f32.partialorder %v2663_v42, 0.0  ;;  %v2786_v33 = vmul.f32 %v7593_v20, %v2663_v42  ;;  %v2656_v47 = vadd.f32 %v2655_v13, %v7568_v60  ;;  %v2938_v62 = vld [vmem:[#allocation3 + $0xc0] sm:$0xff]  ;;  %v2939_v23 = vld [vmem:[#allocation3 + $0xc8] sm:$0xff]  ;;  %5693 = vmatprep.subr.bf16.mxu1 %v7793_v6 }
 0x2c7   : > { %2899 = vst [vmem:[#allocation3 + $0xe1] sm:$0xff] %v2815_v11  ;;  %v5676_v31 = vpop.f32.mrf.mxu0  ;;  %4131 = vmatmul.mubr.bf16.gmra.mxu1 %v7727_v3  ;;  %v7817_v59 = vpack.c.bf16 %v2939_v23, %v2938_v62  ;;  %v7820_v25 = vpack.c.bf16 %v2938_v62, %v7752_v49  ;;  %v7822_v63 = vpack.c.bf16 %v2940_v51, %v2939_v23  ;;  %v3050_v3 = vshrl.u32 %v7757_v12, 16 }
 0x2c8   : > { %v2818_v15 = vsel %vm2747_vm11, %v2663_v42, %v2786_v33  ;;  %vm2746_vm12 = vcmp.ge.f32.partialorder %v2656_v47, 0.0  ;;  %v2785_v60 = vmul.f32 %v7593_v20, %v2656_v47  ;;  %v2666_v39 = vadd.f32 %v5676_v31, %v7578_v19 }
 0x2c9   : > { %2902 = vst [vmem:[#allocation3 + $0x109] sm:$0xff] %v2818_v15  ;;  %v2658_v50 = vpop.f32.mrf.mxu0  ;;  %v3142_v7 = vrot.slane %v7817_v59, 1  ;;  %v3054_v8 = vshll.u32 %v7817_v59, 16  ;;  %v3052_v19 = vor.u32 %v3050_v3, %v7778_v36  ;;  %v7836_v11 = vsel %vm749_vm3, %v3198_v16, %v3202_v28 }
 0x2ca   : > { %v2817_v5 = vsel %vm2746_vm12, %v2656_v47, %v2785_v60  ;;  %vm2748_vm13 = vcmp.ge.f32.partialorder %v2666_v39, 0.0  ;;  %v2787_v49 = vmul.f32 %v7593_v20, %v2666_v39  ;;  %v7843_v33 = vsel %vm1019_vm4, %v3300_v55, %v3302_v10  ;;  %v2941_v62 = vld [vmem:[#allocation3 + $0xd8] sm:$0xff] }
 0x2cb   : > { %2901 = vst [vmem:[#allocation3 + $0xf9] sm:$0xff] %v2817_v5  ;;  %v5679_v44 = vpop.f32.mrf.mxu0  ;;  %v3143_v0 = vsel %vm1019_vm4, %v3140_v4, %v3142_v7  ;;  %v3056_v58 = vrot.slane %v3054_v8, 1  ;;  %v3058_v55 = vshrl.u32 %v7817_v59, 16  ;;  %v3204_v50 = vshrl.u32 %v7750_v35, 16 }
 0x2cc   : > { %v2819_v42 = vsel %vm2748_vm13, %v2666_v39, %v2787_v49  ;;  %v2678_v13 = vadd.f32 %v5679_v44, %v7588_v26  ;;  %4259 = vmatmul.mubr.bf16.gmra.mxu0 %v3143_v0  ;;  %v2944_v27 = vld [vmem:[#allocation3 + $0xf0] sm:$0xff] }
 0x2cd   : > { %2903 = vst [vmem:[#allocation3 + $0x111] sm:$0xff] %v2819_v42  ;;  %v2670_v4 = vpop.f32.mrf.mxu0  ;;  %v3057_v36 = vsel %vm749_vm3, %v3052_v19, %v3056_v58  ;;  %v7846_v47 = vpack.c.bf16 %v2944_v27, %v2940_v51  ;;  %v3060_v8 = vor.u32 %v3058_v55, %v3056_v58 }
 0x2ce   : > { %vm2750_vm14 = vcmp.ge.f32.partialorder %v2678_v13, 0.0  ;;  %v2789_v26 = vmul.f32 %v7593_v20, %v2678_v13  ;;  %4137 = vmatprep.mubr.bf16.mxu1 %v3057_v36  ;;  %v2942_v16 = vld [vmem:[#allocation3 + $0xe0] sm:$0xff]  ;;  %v2943_v0 = vld [vmem:[#allocation3 + $0xe8] sm:$0xff] }
 0x2cf   : > { %v5680_v23 = vpop.f32.mrf.mxu0  ;;  %4138 = vmatmul.mubr.bf16.gmra.mxu1 %v7757_v12  ;;  %v7850_v31 = vpack.c.bf16 %v2942_v16, %v2941_v62  ;;  %v3062_v15 = vshll.u32 %v7846_v47, 16  ;;  %v3144_v60 = vrot.slane %v7846_v47, 1  ;;  %v3208_v12 = vshll.u32 %v7785_v61, 16 }
 0x2d0   : > { %v2821_v39 = vsel %vm2750_vm14, %v2678_v13, %v2789_v26  ;;  %v2947_v51 = vld [vmem:[#allocation3 + $0x108] sm:$0xff]  ;;  %v3206_v13 = vor.u32 %v3204_v50, %v3202_v28  ;;  %v2486_v16 = vadd.f32 %v7616_v45, %v7560_v22  ;;  %v2498_v22 = vadd.f32 %v7657_v38, %v7570_v37 }
 0x2d1   : > { %2905 = vst [vmem:[#allocation3 + $0x129] sm:$0xff] %v2821_v39  ;;  %v2672_v3 = vpop.f32.mrf.mxu0  ;;  %4265 = vmatprep.mubr.bf16.mxu0 %v7850_v31  ;;  %v3064_v5 = vrot.slane %v3062_v15, 1  ;;  %v3145_v44 = vsel %vm1019_vm4, %v3142_v7, %v3144_v60  ;;  %v3304_v35 = vrot.slane %v7850_v31, 1  ;;  %v7866_v58 = vpack.c.bf16 %v2947_v51, %v2943_v0 }
 0x2d2   : > { %v2673_v49 = vadd.f32 %v2672_v3, %v7585_v21  ;;  %v2945_v19 = vld [vmem:[#allocation3 + $0xf8] sm:$0xff]  ;;  %v7862_v42 = vld [vmem:[#allocation3 + $0x100] sm:$0xff]  ;;  %v3210_v62 = vrot.slane %v3208_v12, 1  ;;  %v2491_v15 = vadd.f32 %v7624_v53, %v7562_v32  ;;  %v3216_v38 = vshll.u32 %v7850_v31, 16 }
 0x2d3   : > { %v5683_v4 = vpop.f32.mrf.mxu0  ;;  %v3065_v36 = vsel %vm749_vm3, %v3060_v8, %v3064_v5  ;;  %v7869_v26 = vpack.c.bf16 %v7862_v42, %v2945_v19  ;;  %v7871_v21 = vpack.c.bf16 %v2945_v19, %v2944_v27  ;;  %v7877_v28 = vsel %vm1019_vm4, %v3302_v10, %v3304_v35 }
 0x2d4   : > { %vm2749_vm15 = vcmp.ge.f32.partialorder %v2673_v49, 0.0  ;;  %v2788_v7 = vmul.f32 %v7593_v20, %v2673_v49  ;;  %4144 = vmatprep.mubr.bf16.mxu1 %v3065_v36  ;;  %4266 = vmatmul.mubr.bf16.gmra.mxu0 %v3145_v44  ;;  %v3066_v27 = vshrl.u32 %v7846_v47, 16  ;;  %v2948_v50 = vld [vmem:[#allocation3 + $0x110] sm:$0xff]  ;;  %v2949_v3 = vld [vmem:[#allocation3 + $0x118] sm:$0xff]  ;;  %v7888_v10 = vsel %vm749_vm3, %v3206_v13, %v3210_v62 }
 0x2d5   : > { %v2684_v23 = vpop.f32.mrf.mxu0  ;;  %4273 = vmatprep.mubr.bf16.mxu0 %v7866_v58  ;;  %v3070_v55 = vshll.u32 %v7869_v26, 16  ;;  %v3146_v32 = vrot.slane %v7869_v26, 1  ;;  %v7900_v37 = vpack.c.bf16 %v2949_v3, %v2948_v50 }
 0x2d6   : > { %v2820_v39 = vsel %vm2749_vm15, %v2673_v49, %v2788_v7  ;;  %v2685_v51 = vadd.f32 %v2684_v23, %v7598_v57  ;;  %v3068_v8 = vor.u32 %v3066_v27, %v3064_v5  ;;  %v3212_v49 = vshrl.u32 %v7785_v61, 16 }
 0x2d7   : > { %2904 = vst [vmem:[#allocation3 + $0x121] sm:$0xff] %v2820_v39  ;;  %v5684_v45 = vpop.f32.mrf.mxu0  ;;  %4145 = vmatmul.mubr.bf16.gmra.mxu1 %v7817_v59  ;;  %v7893_v12 = vrot.slane %v3070_v55, 1  ;;  %v3306_v59 = vrot.slane %v7866_v58, 1  ;;  %v3147_v61 = vsel %vm1019_vm4, %v3144_v60, %v3146_v32  ;;  %v3218_v7 = vrot.slane %v3216_v38, 1 }
 0x2d8   : > { %vm2751_vm1 = vcmp.ge.f32.partialorder %v2685_v51, 0.0  ;;  %v2790_v57 = vmul.f32 %v7593_v20, %v2685_v51  ;;  %v2695_v53 = vadd.f32 %v5684_v45, %v2486_v16  ;;  %v3214_v36 = vor.u32 %v3212_v49, %v3210_v62  ;;  %v2952_v45 = vld [vmem:[#allocation3 + $0x130] sm:$0xff] }
 0x2d9   : > { %v2687_v44 = vpop.f32.mrf.mxu0  ;;  %v3073_v0 = vsel %vm749_vm3, %v3068_v8, %v7893_v12  ;;  %v7914_v16 = vsel %vm1019_vm4, %v3304_v35, %v3306_v59  ;;  %v2501_v55 = vadd.f32 %v7680_v9, %v7572_v54  ;;  %v3224_v62 = vshll.u32 %v7866_v58, 16 }
 0x2da   : > { %v2822_v5 = vsel %vm2751_vm1, %v2685_v51, %v2790_v57  ;;  %vm2753_vm2 = vcmp.ge.f32.partialorder %v2695_v53, 0.0  ;;  %v2792_v19 = vmul.f32 %v7593_v20, %v2695_v53  ;;  %v2688_v13 = vadd.f32 %v2687_v44, %v7607_v18  ;;  %4152 = vmatprep.mubr.bf16.mxu1 %v3073_v0 }
 0x2db   : > { %2906 = vst [vmem:[#allocation3 + $0x139] sm:$0xff] %v2822_v5  ;;  %v5687_v4 = vpop.f32.mrf.mxu0  ;;  %v7921_v60 = vsel %vm749_vm3, %v3214_v36, %v3218_v7 }
 0x2dc   : > { %v2824_v23 = vsel %vm2753_vm2, %v2695_v53, %v2792_v19  ;;  %vm2752_vm5 = vcmp.ge.f32.partialorder %v2688_v13, 0.0  ;;  %v2791_v18 = vmul.f32 %v7593_v20, %v2688_v13  ;;  %v2707_v27 = vadd.f32 %v5687_v4, %v2498_v22  ;;  %4274 = vmatmul.mubr.bf16.gmra.mxu0 %v3147_v61 }
 0x2dd   : > { %2908 = vst [vmem:[#allocation3 + $0x151] sm:$0xff] %v2824_v23  ;;  %v2699_v39 = vpop.f32.mrf.mxu0  ;;  %4280 = vmatprep.mubr.bf16.mxu0 %v7900_v37  ;;  %v3308_v53 = vrot.slane %v7900_v37, 1  ;;  %v2513_v19 = vadd.f32 %v7732_v29, %v7582_v41 }
 0x2de   : > { %v2823_v35 = vsel %vm2752_vm5, %v2688_v13, %v2791_v18  ;;  %vm2755_vm6 = vcmp.ge.f32.partialorder %v2707_v27, 0.0  ;;  %v2794_v51 = vmul.f32 %v7593_v20, %v2707_v27  ;;  %v2700_v50 = vadd.f32 %v2699_v39, %v2491_v15  ;;  %v2950_v3 = vld [vmem:[#allocation3 + $0x120] sm:$0xff]  ;;  %v2951_v22 = vld [vmem:[#allocation3 + $0x128] sm:$0xff] }
 0x2df   : > { %2907 = vst [vmem:[#allocation3 + $0x141] sm:$0xff] %v2823_v35  ;;  %v5688_v8 = vpop.f32.mrf.mxu0  ;;  %4153 = vmatmul.mubr.bf16.gmra.mxu1 %v7846_v47  ;;  %v7926_v54 = vpack.c.bf16 %v2951_v22, %v2950_v3  ;;  %v7929_v9 = vpack.c.bf16 %v2950_v3, %v7862_v42  ;;  %v7931_v57 = vpack.c.bf16 %v2952_v45, %v2951_v22  ;;  %v3074_v47 = vshrl.u32 %v7869_v26, 16 }
 0x2e0   : > { %v2826_v49 = vsel %vm2755_vm6, %v2707_v27, %v2794_v51  ;;  %vm2754_vm7 = vcmp.ge.f32.partialorder %v2700_v50, 0.0  ;;  %v2793_v15 = vmul.f32 %v7593_v20, %v2700_v50  ;;  %v2710_v44 = vadd.f32 %v5688_v8, %v2501_v55 }
 0x2e1   : > { %2910 = vst [vmem:[#allocation3 + $0x169] sm:$0xff] %v2826_v49  ;;  %v2702_v0 = vpop.f32.mrf.mxu0  ;;  %v3148_v38 = vrot.slane %v7926_v54, 1  ;;  %v3078_v5 = vshll.u32 %v7926_v54, 16  ;;  %v3220_v42 = vshrl.u32 %v7850_v31, 16  ;;  %v3076_v23 = vor.u32 %v3074_v47, %v7893_v12 }
 0x2e2   : > { %v2825_v13 = vsel %vm2754_vm7, %v2700_v50, %v2793_v15  ;;  %vm2756_vm8 = vcmp.ge.f32.partialorder %v2710_v44, 0.0  ;;  %v2795_v4 = vmul.f32 %v7593_v20, %v2710_v44  ;;  %v3226_v35 = vrot.slane %v3224_v62, 1 }
 0x2e3   : > { %2909 = vst [vmem:[#allocation3 + $0x159] sm:$0xff] %v2825_v13  ;;  %v5691_v61 = vpop.f32.mrf.mxu0  ;;  %v3149_v36 = vsel %vm1019_vm4, %v3146_v32, %v3148_v38  ;;  %v3080_v18 = vrot.slane %v3078_v5, 1  ;;  %v3222_v27 = vor.u32 %v3220_v42, %v3218_v7  ;;  %v7951_v41 = vsel %vm1019_vm4, %v3306_v59, %v3308_v53  ;;  %v2953_v7 = vld [vmem:[#allocation3 + $0x138] sm:$0xff] }
 0x2e4   : > { %v2827_v55 = vsel %vm2756_vm8, %v2710_v44, %v2795_v4  ;;  %v2722_v39 = vadd.f32 %v5691_v61, %v2513_v19  ;;  %4281 = vmatmul.mubr.bf16.gmra.mxu0 %v3149_v36  ;;  %v2956_v31 = vld [vmem:[#allocation3 + $0x150] sm:$0xff]  ;;  %v3082_v59 = vshrl.u32 %v7926_v54, 16  ;;  %v3228_v4 = vshrl.u32 %v7866_v58, 16 }
 0x2e5   : > { %2911 = vst [vmem:[#allocation3 + $0x171] sm:$0xff] %v2827_v55  ;;  %v2714_v29 = vpop.f32.mrf.mxu0  ;;  %v3081_v32 = vsel %vm749_vm3, %v3076_v23, %v3080_v18  ;;  %v7954_v51 = vpack.c.bf16 %v2956_v31, %v2952_v45  ;;  %v2508_v45 = vadd.f32 %v7717_v43, %v7580_v34  ;;  %v3232_v34 = vshll.u32 %v7900_v37, 16 }
 0x2e6   : > { %vm2758_vm9 = vcmp.ge.f32.partialorder %v2722_v39, 0.0  ;;  %v2797_v12 = vmul.f32 %v7593_v20, %v2722_v39  ;;  %4159 = vmatprep.mubr.bf16.mxu1 %v3081_v32  ;;  %v2954_v50 = vld [vmem:[#allocation3 + $0x140] sm:$0xff]  ;;  %v7966_v20 = vsel %vm749_vm3, %v3222_v27, %v3226_v35  ;;  %v2955_v42 = vld [vmem:[#allocation3 + $0x148] sm:$0xff] }
 0x2e7   : > { %v5692_v62 = vpop.f32.mrf.mxu0  ;;  %4160 = vmatmul.mubr.bf16.gmra.mxu1 %v7869_v26  ;;  %v7958_v3 = vpack.c.bf16 %v2954_v50, %v2953_v7  ;;  %v3086_v22 = vshll.u32 %v7954_v51, 16  ;;  %v3150_v8 = vrot.slane %v7954_v51, 1  ;;  %v3084_v26 = vor.u32 %v3082_v59, %v3080_v18 }
 0x2e8   : > { %v2829_v49 = vsel %vm2758_vm9, %v2722_v39, %v2797_v12  ;;  %v2959_v15 = vld [vmem:[#allocation3 + $0x168] sm:$0xff]  ;;  %v3230_v39 = vor.u32 %v3228_v4, %v3226_v35  ;;  %v3234_v29 = vrot.slane %v3232_v34, 1  ;;  %v3090_v32 = vshrl.u32 %v7954_v51, 16 }
 0x2e9   : > { %2913 = vst [vmem:[#allocation3 + $0x189] sm:$0xff] %v2829_v49  ;;  %v2716_v44 = vpop.f32.mrf.mxu0  ;;  %4287 = vmatprep.mubr.bf16.mxu0 %v7958_v3  ;;  %v3088_v0 = vrot.slane %v3086_v22, 1  ;;  %v3151_v47 = vsel %vm1019_vm4, %v3148_v38, %v3150_v8  ;;  %v3310_v43 = vrot.slane %v7958_v3, 1  ;;  %v2990_v36 = vpack.c.bf16 %v2959_v15, %v2955_v42  ;;  %v5947_v38 = vld [vmem:[%s8410_s4] ss:$0 sm:$0xff] }
 0x2ea   : > { %v2717_v5 = vadd.f32 %v2716_v44, %v2508_v45  ;;  %v2957_v19 = vld [vmem:[#allocation3 + $0x158] sm:$0xff]  ;;  %v2958_v13 = vld [vmem:[#allocation3 + $0x160] sm:$0xff]  ;;  %v7985_v50 = vsel %vm749_vm3, %v3230_v39, %v3234_v29  ;;  %v3236_v45 = vshrl.u32 %v7900_v37, 16  ;;  %v3240_v49 = vshll.u32 %v7958_v3, 16 }
 0x2eb   : > { %v3089_v61 = vsel %vm749_vm3, %v3084_v26, %v3088_v0  ;;  %v7974_v23 = vpack.c.bf16 %v2958_v13, %v2957_v19  ;;  %v7976_v27 = vpack.c.bf16 %v2957_v19, %v2956_v31  ;;  %v7990_v62 = vsel %vm1019_vm4, %v3308_v53, %v3310_v43 }
 0x2ec   : > { %vm2757_vm10 = vcmp.ge.f32.partialorder %v2717_v5, 0.0  ;;  %v2796_v18 = vmul.f32 %v5947_v38, %v2717_v5  ;;  %4166 = vmatprep.mubr.bf16.mxu1 %v3089_v61  ;;  %4288 = vmatmul.mubr.bf16.gmra.mxu0 %v3151_v47  ;;  %v2960_v58 = vld [vmem:[#allocation3 + $0x170] sm:$0xff]  ;;  %v2961_v55 = vld [vmem:[#allocation3 + $0x178] sm:$0xff]  ;;  %v3092_v35 = vor.u32 %v3090_v32, %v3088_v0  ;;  %v3312_v15 = vrot.slane %v2990_v36, 1 }
 0x2ed   : > { %4295 = vmatprep.mubr.bf16.mxu0 %v2990_v36  ;;  %v3094_v12 = vshll.u32 %v7974_v23, 16  ;;  %v3152_v31 = vrot.slane %v7974_v23, 1  ;;  %v7993_v22 = vpack.c.bf16 %v2961_v55, %v2960_v58  ;;  %v3333_v47 = vshll.u32 %v7644_v48, 16 }
 0x2ee   : > { %v2828_v7 = vsel %vm2757_vm10, %v2717_v5, %v2796_v18  ;;  %v3248_v53 = vshll.u32 %v2990_v36, 16  ;;  %v3238_v5 = vor.u32 %v3236_v45, %v3234_v29  ;;  %v3242_v42 = vrot.slane %v3240_v49, 1 }
 0x2ef   : > { %2912 = vst [vmem:[#allocation3 + $0x181] sm:$0xff] %v2828_v7  ;;  %4167 = vmatmul.mubr.bf16.gmra.mxu1 %v7926_v54  ;;  %v3096_v59 = vrot.slane %v3094_v12, 1  ;;  %v3153_v26 = vsel %vm1019_vm4, %v3150_v8, %v3152_v31  ;;  %v8001_v54 = vsel %vm1019_vm4, %v3310_v43, %v3312_v15  ;;  %v3244_v0 = vshrl.u32 %v7958_v3, 16 }
 0x2f0   : > { %v3250_v19 = vrot.slane %v3248_v53, 1  ;;  %v3314_v37 = vrot.slane %v7993_v22, 1  ;;  %v3252_v4 = vshrl.u32 %v2990_v36, 16  ;;  %v3256_v34 = vshll.u32 %v7993_v22, 16 }
 0x2f1   : > { %v3097_v44 = vsel %vm749_vm3, %v3092_v35, %v3096_v59  ;;  %v3338_v8 = vshll.u32 %v7705_v1, 16  ;;  %v8008_v61 = vsel %vm749_vm3, %v3238_v5, %v3242_v42  ;;  %v3246_v38 = vor.u32 %v3244_v0, %v3242_v42 }
 0x2f2   : > { %4174 = vmatprep.mubr.bf16.mxu1 %v3097_v44  ;;  %v8014_v43 = vsel %vm1019_vm4, %v3312_v15, %v3314_v37  ;;  %v3254_v3 = vor.u32 %v3252_v4, %v3250_v19  ;;  %v8016_v18 = vrot.slane %v3256_v34, 1  ;;  %v3335_v58 = vrot.slane %v3333_v47, 1 }
 0x2f3   : > { %v8019_v55 = vsel %vm749_vm3, %v3246_v38, %v3250_v19  ;;  %v3331_v12 = vshrl.u32 %v7644_v48, 16  ;;  %v3340_v7 = vrot.slane %v3338_v8, 1  ;;  %v3098_v45 = vshrl.u32 %v7974_v23, 16  ;;  %v5935_v19 = vld [vmem:[#allocation8 + $0x230] sm:$0xff]  }
 0x2f4   : > { %4296 = vmatmul.mubr.bf16.gmra.mxu0 %v3153_v26  ;;  %v8026_v32 = vsel %vm749_vm3, %v3254_v3, %v8016_v18  ;;  %v3342_v53 = vshrl.u32 %v7705_v1, 16  ;;  %v3346_v5 = vshll.u32 %v7709_v30, 16  ;;  %v3362_v38 = vshll.u32 %v7820_v25, 16  ;;  %v5938_v3 = vld [vmem:[#allocation8 + $0x218] sm:$0xff]  }
 0x2f5   : > { %4302 = vmatprep.mubr.bf16.mxu0 %v7993_v22  ;;  %v3336_v15 = vor.u32 %v3335_v58, %v3331_v12  ;;  %v3100_v26 = vor.u32 %v3098_v45, %v3096_v59  ;;  %v3354_v59 = vshll.u32 %v7759_v56, 16  ;;  %v3366_v12 = vshrl.u32 %v7820_v25, 16 }
 0x2f6   : > { %v2962_v36 = vld [vmem:[#allocation3 + $0x180] sm:$0xff]  ;;  %v3344_v42 = vor.u32 %v3342_v53, %v3340_v7  ;;  %v3348_v0 = vrot.slane %v3346_v5, 1  ;;  %v3390_v5 = vshrl.u32 %v7929_v9, 16 }
 0x2f7   : > { %4175 = vmatmul.mubr.bf16.gmra.mxu1 %v7954_v51  ;;  %v2979_v39 = vpack.c.bf16 %v2962_v36, %v2962_v36  ;;  %v8022_v29 = vpack.c.bf16 %v2962_v36, %v2958_v13  ;;  %v3341_v51 = vsel %vm749_vm3, %v3336_v15, %v3340_v7  ;;  %v3356_v4 = vrot.slane %v3354_v59, 1  ;;  %v5940_v7 = vld [vmem:[#allocation8 + $0x208] sm:$0xff]   ;;  %v5941_v15 = vld [vmem:[#allocation8 + $0x200] sm:$0xff]  }
 0x2f8   : > { %v3398_v59 = vshrl.u32 %v7931_v57, 16 }
 0x2f9   : > { %v3154_v35 = vrot.slane %v2979_v39, 1  ;;  %v3102_v49 = vshll.u32 %v2979_v39, 16  ;;  %v5939_v39 = vld [vmem:[#allocation8 + $0x210] sm:$0xff]  }
 0x2fb   : > { %v3155_v44 = vsel %vm1019_vm4, %v3152_v31, %v3154_v35  ;;  %v3104_v47 = vrot.slane %v3102_v49, 1  ;;  %v3349_v31 = vsel %vm749_vm3, %v3344_v42, %v3348_v0  ;;  %v3378_v49 = vshll.u32 %v7871_v21, 16 }
 0x2fc   : > { %4303 = vmatmul.mubr.bf16.gmra.mxu0 %v3155_v44  ;;  %v8062_v44 = vld [vmem:[#allocation9 + $0x18] sm:$0xff]   ;;  %v3394_v42 = vshll.u32 %v7931_v57, 16 }
 0x2fd   : > { %4463 = vmatprep.mubr.bf16.mxu0 %v3341_v51  ;;  %v3105_v13 = vsel %vm749_vm3, %v3100_v26, %v3104_v47  ;;  %v3386_v51 = vshll.u32 %v7929_v9, 16 }
 0x2fe   : > { %4181 = vmatprep.mubr.bf16.mxu1 %v3105_v13 }
 0x2ff   : > { %4182 = vmatmul.mubr.bf16.gmra.mxu1 %v7974_v23  ;;  %v3350_v23 = vshrl.u32 %v7709_v30, 16 }
 0x300   : > { %4342 = vmatprep.mubr.bf16.mxu1 %v7666_v2  ;;  %v5936_v2 = vld [vmem:[#allocation8 + $0x228] sm:$0xff]  }
 0x301   : > { %v3352_v34 = vor.u32 %v3350_v23, %v3348_v0  ;;  %v3396_v0 = vrot.slane %v3394_v42, 1 }
 0x303   : > { %v3357_v8 = vsel %vm749_vm3, %v3352_v34, %v3356_v4  ;;  %v3400_v23 = vor.u32 %v3398_v59, %v3396_v0 }
 0x304   : > { %4464 = vmatmul.mubr.bf16.vlgmr.msra.gmra.mxu0 %v7644_v48 }
 0x305   : > { %4471 = vmatprep.mubr.bf16.mxu0 %v3349_v31  ;;  %v3402_v31 = vshll.u32 %v7976_v27, 16 }
 0x307   : > { %4343 = vmatmul.mubr.bf16.vlgmr.msra.gmra.mxu1 %v7691_v46  ;;  %v5937_v46 = vld [vmem:[#allocation8 + $0x220] sm:$0xff]  }
 0x308   : > { %5694 = vmatpush3.bf16.msra.mxu1 %v7793_v6  ;;  %4350 = vmatprep.mubr.bf16.mxu1 %v7698_v14  ;;  %v3358_v14 = vshrl.u32 %v7759_v56, 16  ;;  %v3364_v6 = vrot.slane %v3362_v38, 1 }
 0x309   : > { %5695 = vmatprep.subr.bf16.mxu1 %v5935_v19 }
 0x30a   : > { %v3360_v36 = vor.u32 %v3358_v14, %v3356_v4  ;;  %v2963_v4 = vld [vmem:[#allocation3 + $0x188] sm:$0xff] }
 0x30c   : > { %4472 = vmatmul.mubr.bf16.gmra.mxu0 %v7705_v1  ;;  %5696 = vmatpush3.bf16.msra.mxu1 %v5935_v19  ;;  %v3365_v58 = vsel %vm749_vm3, %v3360_v36, %v3364_v6  ;;  %v3404_v19 = vrot.slane %v3402_v31, 1 }
 0x30d   : > { %4478 = vmatprep.mubr.bf16.mxu0 %v3357_v8  ;;  %5697 = vmatprep.subr.bf16.mxu1 %v5936_v2 }
 0x30f   : > { %4351 = vmatmul.mubr.bf16.gmra.mxu1 %v7764_v24  ;;  %v3370_v24 = vshll.u32 %v7822_v63, 16 }
 0x310   : > { %4357 = vmatprep.mubr.bf16.mxu1 %v7771_v40  ;;  %5698 = vmatpush3.bf16.msra.mxu1 %v5936_v2  ;;  %v3368_v40 = vor.u32 %v3366_v12, %v3364_v6 }
 0x311   : > { %5699 = vmatprep.subr.bf16.mxu1 %v5937_v46  ;;  %v3372_v35 = vrot.slane %v3370_v24, 1 }
 0x313   : > { %v3373_v45 = vsel %vm749_vm3, %v3368_v40, %v3372_v35 }
 0x314   : > { %4479 = vmatmul.mubr.bf16.gmra.mxu0 %v7709_v30  ;;  %5700 = vmatpush3.bf16.msra.mxu1 %v5937_v46  ;;  %v3414_v46 = vshrl.u32 %v8022_v29, 16 }
 0x315   : > { %4485 = vmatprep.mubr.bf16.mxu0 %v3365_v58  ;;  %5701 = vmatprep.subr.bf16.mxu1 %v5938_v3 }
 0x317   : > { %4358 = vmatmul.mubr.bf16.gmra.mxu1 %v7788_v52  ;;  %v3374_v52 = vshrl.u32 %v7822_v63, 16 }
 0x318   : > { %4364 = vmatprep.mubr.bf16.mxu1 %v7805_v17  ;;  %5702 = vmatpush3.bf16.msra.mxu1 %v5938_v3  ;;  %v3380_v17 = vrot.slane %v3378_v49, 1  ;;  %v5948_v3 = vld [vmem:[#allocation3 + $0x1a0] sm:$0xff] }
 0x319   : > { %5703 = vmatprep.subr.bf16.mxu1 %v5939_v39  ;;  %v3376_v26 = vor.u32 %v3374_v52, %v3372_v35  ;;  %v8099_v36 = vpack.c.bf16 %v5948_v3, %v5948_v3  ;;  %v3455_v35 = vrot.slane %v7644_v48, 1 }
 0x31b   : > { %v3381_v47 = vsel %vm749_vm3, %v3376_v26, %v3380_v17  ;;  %v3316_v12 = vrot.slane %v8099_v36, 1 }
 0x31c   : > { %4486 = vmatmul.mubr.bf16.gmra.mxu0 %v7759_v56  ;;  %5704 = vmatpush3.bf16.msra.mxu1 %v5939_v39  ;;  %v3426_v39 = vshll.u32 %v8099_v36, 16 }
 0x31d   : > { %4493 = vmatprep.mubr.bf16.mxu0 %v3373_v45  ;;  %5705 = vmatprep.subr.bf16.mxu1 %v5940_v7  ;;  %v3317_v40 = vsel %vm1019_vm4, %v3314_v37, %v3316_v12  ;;  %v3458_v37 = vrot.slane %v7709_v30, 1 }
 0x31f   : > { %4365 = vmatmul.mubr.bf16.gmra.mxu1 %v7836_v11  ;;  %v3382_v11 = vshrl.u32 %v7871_v21, 16 }
 0x320   : > { %4372 = vmatprep.mubr.bf16.mxu1 %v7843_v33  ;;  %5706 = vmatpush3.bf16.msra.mxu1 %v5940_v7  ;;  %v3388_v33 = vrot.slane %v3386_v51, 1  ;;  %v3456_v7 = vrot.slane %v7705_v1, 1 }
 0x321   : > { %5707 = vmatprep.subr.bf16.mxu1 %v5941_v15  ;;  %v3384_v13 = vor.u32 %v3382_v11, %v3380_v17  ;;  %v5943_v17 = vld [vmem:[#allocation9 + $0x10] sm:$0xff]  }
 0x322   : > { %v3459_v26 = vsel %vm1019_vm4, %v3456_v7, %v3458_v37 }
 0x323   : > { %v3389_v53 = vsel %vm749_vm3, %v3384_v13, %v3388_v33 }
 0x324   : > { %4494 = vmatmul.mubr.bf16.gmra.mxu0 %v7820_v25  ;;  %5708 = vmatpush3.bf16.msra.mxu1 %v5941_v15  ;;  %v3460_v15 = vrot.slane %v7759_v56, 1  ;;  %v5944_v56 = vld [vmem:[#allocation9 + $0x8] sm:$0xff]  }
 0x325   : > { %4500 = vmatprep.mubr.bf16.mxu0 %v3381_v47  ;;  %5733 = vmatprep.subr.bf16.mxu1 %v8062_v44 }
 0x326   : > { %v3461_v48 = vsel %vm1019_vm4, %v3458_v37, %v3460_v15 }
 0x327   : > { %4373 = vmatmul.mubr.bf16.gmra.mxu1 %v7888_v10  ;;  %v3392_v10 = vor.u32 %v3390_v5, %v3388_v33  ;;  %v3462_v5 = vrot.slane %v7820_v25, 1 }
 0x328   : > { %4379 = vmatprep.mubr.bf16.mxu1 %v7877_v28 }
 0x329   : > { %v3397_v28 = vsel %vm749_vm3, %v3392_v10, %v3396_v0  ;;  %v3464_v10 = vrot.slane %v7822_v63, 1 }
 0x32c   : > { %4501 = vmatmul.mubr.bf16.gmra.mxu0 %v7822_v63 }
 0x32d   : > { %4507 = vmatprep.mubr.bf16.mxu0 %v3389_v53 }
 0x32f   : > { %4380 = vmatmul.mubr.bf16.gmra.mxu1 %v7921_v60  ;;  %v3410_v60 = vshll.u32 %v8022_v29, 16 }
 0x330   : > { %4386 = vmatprep.mubr.bf16.mxu1 %v7914_v16  ;;  %v3405_v16 = vsel %vm749_vm3, %v3400_v23, %v3404_v19  ;;  %v3463_v23 = vsel %vm1019_vm4, %v3460_v15, %v3462_v5 }
 0x331   : > { %v3412_v2 = vrot.slane %v3410_v60, 1  ;;  %v3465_v60 = vsel %vm1019_vm4, %v3462_v5, %v3464_v10 }
 0x334   : > { %4508 = vmatmul.mubr.bf16.gmra.mxu0 %v7871_v21 }
 0x335   : > { %4515 = vmatprep.mubr.bf16.mxu0 %v3397_v28 }
 0x337   : > { %4387 = vmatmul.mubr.bf16.gmra.mxu1 %v7966_v20  ;;  %v3406_v20 = vshrl.u32 %v7976_v27, 16 }
 0x338   : > { %4394 = vmatprep.mubr.bf16.mxu1 %v7951_v41  ;;  %v2964_v41 = vld [vmem:[#allocation3 + $0x190] sm:$0xff] }
 0x339   : > { %v3408_v34 = vor.u32 %v3406_v20, %v3404_v19  ;;  %v8089_v8 = vpack.c.bf16 %v2964_v41, %v2963_v4  ;;  %v3466_v20 = vrot.slane %v7871_v21, 1  ;;  %v3468_v41 = vrot.slane %v7929_v9, 1 }
 0x33b   : > { %v3413_v38 = vsel %vm749_vm3, %v3408_v34, %v3412_v2  ;;  %v3418_v14 = vshll.u32 %v8089_v8, 16  ;;  %v3422_v58 = vshrl.u32 %v8089_v8, 16  ;;  %v3469_v3 = vsel %vm1019_vm4, %v3466_v20, %v3468_v41 }
 0x33c   : > { %4516 = vmatmul.mubr.bf16.gmra.mxu0 %v7929_v9  ;;  %v3470_v9 = vrot.slane %v7931_v57, 1 }
 0x33d   : > { %4522 = vmatprep.mubr.bf16.mxu0 %v3405_v16 }
 0x33f   : > { %4395 = vmatmul.mubr.bf16.gmra.mxu1 %v7985_v50  ;;  %v3416_v50 = vor.u32 %v3414_v46, %v3412_v2 }
 0x340   : > { %4401 = vmatprep.mubr.bf16.mxu1 %v7990_v62  ;;  %v3420_v62 = vrot.slane %v3418_v14, 1 }
 0x342   : > { %v3421_v6 = vsel %vm749_vm3, %v3416_v50, %v3420_v62  ;;  %v3467_v50 = vsel %vm1019_vm4, %v3464_v10, %v3466_v20 }
 0x344   : > { %4523 = vmatmul.mubr.bf16.gmra.mxu0 %v7931_v57 }
 0x345   : > { %4529 = vmatprep.mubr.bf16.mxu0 %v3413_v38 }
 0x347   : > { %4402 = vmatmul.mubr.bf16.gmra.mxu1 %v8008_v61  ;;  %v3424_v61 = vor.u32 %v3422_v58, %v3420_v62 }
 0x348   : > { %4408 = vmatprep.mubr.bf16.mxu1 %v8001_v54  ;;  %v3428_v54 = vrot.slane %v3426_v39, 1 }
 0x34a   : > { %v3429_v24 = vsel %vm749_vm3, %v3424_v61, %v3428_v54 }
 0x34c   : > { %4530 = vmatmul.mubr.bf16.gmra.mxu0 %v7976_v27 }
 0x34d   : > { %4537 = vmatprep.mubr.bf16.mxu0 %v3421_v6 }
 0x34f   : > { %4409 = vmatmul.mubr.bf16.gmra.mxu1 %v8019_v55 }
 0x350   : > { %4416 = vmatprep.mubr.bf16.mxu1 %v8014_v43  ;;  %v3260_v43 = vshrl.u32 %v7993_v22, 16 }
 0x352   : > { %v3262_v55 = vor.u32 %v3260_v43, %v8016_v18 }
 0x354   : > { %4538 = vmatmul.mubr.bf16.gmra.mxu0 %v8022_v29  ;;  %v3267_v45 = vsel %vm749_vm3, %v3262_v55, %v3428_v54 }
 0x355   : > { %4544 = vmatprep.mubr.bf16.mxu0 %v3429_v24  ;;  %v3472_v24 = vrot.slane %v7976_v27, 1 }
 0x357   : > { %4417 = vmatmul.mubr.bf16.gmra.mxu1 %v8026_v32  ;;  %v3457_v32 = vsel %vm1019_vm4, %v3455_v35, %v3456_v7  ;;  %v3471_v35 = vsel %vm1019_vm4, %v3468_v41, %v3470_v9 }
 0x358   : > { %4423 = vmatprep.mubr.bf16.mxu1 %v3317_v40 }
 0x35c   : > { %4545 = vmatmul.mubr.bf16.gmra.mxu0 %v8089_v8 }
 0x35f   : > { %4424 = vmatmul.mubr.bf16.gmra.mxu1 %v3267_v45 }
 0x360   : > { %5709 = vmatprep.mubr.bf16.mxu1 %v3457_v32 }
 0x362   : > { %v5357_v49 = vpop.f32.mrf.mxu0 }
 0x364   : > { %v5358_v22 = vpop.f32.mrf.mxu0 }
 0x365   : > { %v5359_v52 = vadd.f32 %v5358_v22, %v5357_v49  ;;  %v5269_v18 = vpop.f32.mrf.mxu1  ;;  %v3473_v49 = vsel %vm1019_vm4, %v3470_v9, %v3472_v24 }
 0x366   : > { %v5360_v1 = vpop.f32.mrf.mxu0 }
 0x367   : > { %v5270_v47 = vpop.f32.mrf.mxu1  ;;  %5710 = vmatmul.mubr.bf16.vlgmr.msra.gmra.mxu1 %v3459_v26 }
 0x368   : > { %v5271_v51 = vadd.f32 %v5270_v47, %v5269_v18  ;;  %5734 = vmatpush3.bf16.msra.mxu1 %v8062_v44  ;;  %v5361_v11 = vpop.f32.mrf.mxu0  ;;  %5713 = vmatprep.mubr.bf16.mxu1 %v3461_v48  ;;  %v5945_v44 = vld [vmem:[#allocation9] sm:$0xff]  }
 0x369   : > { %v5362_v33 = vadd.f32 %v5361_v11, %v5360_v1  ;;  %v5272_v30 = vpop.f32.mrf.mxu1  ;;  %5735 = vmatprep.subr.bf16.mxu1 %v5943_v17 }
 0x36a   : > { %v8126_v13 = vadd.f32 %v5359_v52, %v5271_v51  ;;  %v5363_v53 = vpop.f32.mrf.mxu0  ;;  %v3474_v52 = vrot.slane %v8022_v29, 1 }
 0x36b   : > { %v5273_v42 = vpop.f32.mrf.mxu1 }
 0x36c   : > { %v5274_v0 = vadd.f32 %v5273_v42, %v5272_v30  ;;  %v5364_v28 = vpop.f32.mrf.mxu0  ;;  %5736 = vmatpush3.bf16.msra.mxu1 %v5943_v17  ;;  %v3476_v17 = vrot.slane %v8089_v8, 1  ;;  %v3475_v11 = vsel %vm1019_vm4, %v3472_v24, %v3474_v52 }
 0x36d   : > { %v5275_v31 = vpop.f32.mrf.mxu1  ;;  %5737 = vmatprep.subr.bf16.mxu1 %v5944_v56  ;;  %v5950_v28 = vld [vmem:[%s6305_s29 + $0x8] sm:$0xff] }
 0x36e   : > { %v8130_v59 = vadd.f32 %v5362_v33, %v5274_v0  ;;  %v5366_v19 = vpop.f32.mrf.mxu0  ;;  %v3477_v30 = vsel %vm1019_vm4, %v3474_v52, %v3476_v17  ;;  %v5949_v0 = vld [vmem:[%s6305_s29] sm:$0xff] }
 0x36f   : > { %v5276_v16 = vpop.f32.mrf.mxu1  ;;  %5714 = vmatmul.mubr.bf16.gmra.mxu1 %v3463_v23  ;;  %v4719_v31 = vpack.c.bf16 %v5950_v28, %v5949_v0 }
 0x370   : > { %v5367_v4 = vpop.f32.mrf.mxu0  ;;  %5717 = vmatprep.mubr.bf16.mxu1 %v3465_v60  ;;  %5738 = vmatpush3.bf16.msra.mxu1 %v5944_v56  ;;  %v3479_v16 = vsel %vm1019_vm4, %v3476_v17, %v3316_v12 }
 0x371   : > { %v5368_v25 = vadd.f32 %v5367_v4, %v5366_v19  ;;  %v5278_v63 = vpop.f32.mrf.mxu1  ;;  %5739 = vmatprep.subr.bf16.mxu1 %v5945_v44 }
 0x373   : > { %v5279_v2 = vpop.f32.mrf.mxu1 }
 0x374   : > { %v5280_v34 = vadd.f32 %v5279_v2, %v5278_v63  ;;  %v5369_v38 = vpop.f32.mrf.mxu0  ;;  %5740 = vmatpush3.bf16.msra.mxu1 %v5945_v44 }
 0x376   : > { %v8136_v46 = vadd.f32 %v5368_v25, %v5280_v34  ;;  %v5370_v14 = vpop.f32.mrf.mxu0 }
 0x377   : > { %v5371_v62 = vadd.f32 %v5370_v14, %v5369_v38  ;;  %v5281_v6 = vpop.f32.mrf.mxu1  ;;  %5718 = vmatmul.mubr.bf16.gmra.mxu1 %v3467_v50  ;;  %v5951_v38 = vld [vmem:[%s6305_s29 + $0x20] sm:$0xff]  ;;  %v5952_v14 = vld [vmem:[%s6305_s29 + $0x28] sm:$0xff] }
 0x378   : > { %v5372_v58 = vpop.f32.mrf.mxu0  ;;  %5721 = vmatprep.mubr.bf16.mxu1 %v3469_v3  ;;  %v4720_v50 = vpack.c.bf16 %v5952_v14, %v5951_v38 }
 0x379   : > { %v5282_v39 = vpop.f32.mrf.mxu1 }
 0x37a   : > { %v5283_v21 = vadd.f32 %v5282_v39, %v5281_v6  ;;  %v5373_v61 = vpop.f32.mrf.mxu0  ;;  %v5954_v6 = vld [vmem:[%s6305_s29 + $0x48] sm:$0xff] }
 0x37b   : > { %v5284_v54 = vpop.f32.mrf.mxu1 }
 0x37c   : > { %v8142_v40 = vadd.f32 %v5371_v62, %v5283_v21  ;;  %v5375_v43 = vpop.f32.mrf.mxu0  ;;  %v5953_v62 = vld [vmem:[%s6305_s29 + $0x40] sm:$0xff] }
 0x37d   : > { %v5285_v55 = vpop.f32.mrf.mxu1  ;;  %v4721_v3 = vpack.c.bf16 %v5954_v6, %v5953_v62 }
 0x37e   : > { %v5376_v7 = vpop.f32.mrf.mxu0 }
 0x37f   : > { %v5377_v45 = vadd.f32 %v5376_v7, %v5375_v43  ;;  %v5287_v32 = vpop.f32.mrf.mxu1  ;;  %5722 = vmatmul.mubr.bf16.gmra.mxu1 %v3471_v35  ;;  %v5955_v35 = vld [vmem:[%s6305_s29 + $0x60] sm:$0xff] }
 0x380   : > { %v5378_v37 = vpop.f32.mrf.mxu0  ;;  %5725 = vmatprep.mubr.bf16.mxu1 %v3473_v49 }
 0x381   : > { %v5288_v15 = vpop.f32.mrf.mxu1 }
 0x382   : > { %v5289_v22 = vadd.f32 %v5288_v15, %v5287_v32  ;;  %v5379_v57 = vpop.f32.mrf.mxu0  ;;  %v5957_v15 = vld [vmem:[%s6305_s29 + $0x80] sm:$0xff] }
 0x383   : > { %v5380_v27 = vadd.f32 %v5379_v57, %v5378_v37  ;;  %v5290_v18 = vpop.f32.mrf.mxu1 }
 0x384   : > { %v8148_v1 = vadd.f32 %v5377_v45, %v5289_v22  ;;  %v5381_v26 = vpop.f32.mrf.mxu0  ;;  %v5956_v45 = vld [vmem:[%s6305_s29 + $0x68] sm:$0xff] }
 0x385   : > { %v5291_v47 = vpop.f32.mrf.mxu1  ;;  %v4722_v32 = vpack.c.bf16 %v5956_v45, %v5955_v35  ;;  %v5958_v22 = vld [vmem:[%s6305_s29 + $0x88] sm:$0xff] }
 0x386   : > { %v5292_v48 = vadd.f32 %v5291_v47, %v5290_v18  ;;  %v5382_v51 = vpop.f32.mrf.mxu0  ;;  %v4723_v57 = vpack.c.bf16 %v5958_v22, %v5957_v15 }
 0x387   : > { %v5293_v33 = vpop.f32.mrf.mxu1  ;;  %5726 = vmatmul.mubr.bf16.gmra.mxu1 %v3475_v11 }
 0x388   : > { %v8152_v56 = vadd.f32 %v5380_v27, %v5292_v48  ;;  %v5384_v29 = vpop.f32.mrf.mxu0  ;;  %5729 = vmatprep.mubr.bf16.mxu1 %v3477_v30  ;;  %v5959_v30 = vld [vmem:[%s6305_s29 + $0xa0] sm:$0xff] }
 0x389   : > { %v5294_v53 = vpop.f32.mrf.mxu1 }
 0x38a   : > { %v5385_v8 = vpop.f32.mrf.mxu0 }
 0x38b   : > { %v5386_v5 = vadd.f32 %v5385_v8, %v5384_v29  ;;  %v5296_v42 = vpop.f32.mrf.mxu1  ;;  %v5960_v29 = vld [vmem:[%s6305_s29 + $0xa8] sm:$0xff] }
 0x38c   : > { %v5387_v10 = vpop.f32.mrf.mxu0  ;;  %v4724_v53 = vpack.c.bf16 %v5960_v29, %v5959_v30 }
 0x38d   : > { %v5297_v44 = vpop.f32.mrf.mxu1 }
 0x38e   : > { %v5298_v19 = vadd.f32 %v5297_v44, %v5296_v42  ;;  %v5388_v23 = vpop.f32.mrf.mxu0  ;;  %v5962_v42 = vld [vmem:[%s6305_s29 + $0xc8] sm:$0xff] }
 0x38f   : > { %v5389_v60 = vadd.f32 %v5388_v23, %v5387_v10  ;;  %v5299_v4 = vpop.f32.mrf.mxu1  ;;  %5730 = vmatmul.mubr.bf16.gmra.mxu1 %v3479_v16 }
 0x390   : > { %v8159_v25 = vadd.f32 %v5386_v5, %v5298_v19  ;;  %v5390_v63 = vpop.f32.mrf.mxu0  ;;  %5741 = vmatprep.mubr.msk.bf16.mxu1 %vm562_vm0, %v4719_v31  ;;  %v5961_v5 = vld [vmem:[%s6305_s29 + $0xc0] sm:$0xff] }
 0x391   : > { %v5300_v20 = vpop.f32.mrf.mxu1  ;;  %v4725_v10 = vpack.c.bf16 %v5962_v42, %v5961_v5 }
 0x392   : > { %v5301_v2 = vadd.f32 %v5300_v20, %v5299_v4  ;;  %v5391_v41 = vpop.f32.mrf.mxu0 }
 0x393   : > { %v5302_v34 = vpop.f32.mrf.mxu1  ;;  %v5964_v41 = vld [vmem:[%s6305_s29 + $0xe8] sm:$0xff] }
 0x394   : > { %v8164_v36 = vadd.f32 %v5389_v60, %v5301_v2  ;;  %v5393_v12 = vpop.f32.mrf.mxu0  ;;  %v5963_v2 = vld [vmem:[%s6305_s29 + $0xe0] sm:$0xff] }
 0x395   : > { %v5303_v58 = vpop.f32.mrf.mxu1  ;;  %v4726_v34 = vpack.c.bf16 %v5964_v41, %v5963_v2 }
 0x396   : > { %v5394_v39 = vpop.f32.mrf.mxu0 }
 0x397   : > { %v5395_v21 = vadd.f32 %v5394_v39, %v5393_v12  ;;  %v5305_v61 = vpop.f32.mrf.mxu1  ;;  %5742 = vmatmul.mubr.msk.bf16.vlgmr.msra.gmra.mxu1 %vm562_vm0, %v4720_v50 }
 0x398   : > { %v5396_v9 = vpop.f32.mrf.mxu0  ;;  %5745 = vmatprep.mubr.msk.bf16.mxu1 %vm562_vm0, %v4721_v3 }
 0x399   : > { %v5306_v54 = vpop.f32.mrf.mxu1 }
 0x39a   : > { %v5307_v24 = vadd.f32 %v5306_v54, %v5305_v61  ;;  %v5397_v43 = vpop.f32.mrf.mxu0 }
 0x39b   : > { %v5398_v55 = vadd.f32 %v5397_v43, %v5396_v9  ;;  %v5308_v7 = vpop.f32.mrf.mxu1 }
 0x39c   : > { %v8172_v49 = vadd.f32 %v5395_v21, %v5307_v24  ;;  %v5399_v37 = vpop.f32.mrf.mxu0 }
 0x39d   : > { %v5309_v52 = vpop.f32.mrf.mxu1 }
 0x39e   : > { %v5310_v27 = vadd.f32 %v5309_v52, %v5308_v7  ;;  %v5400_v18 = vpop.f32.mrf.mxu0 }
 0x39f   : > { %v5311_v17 = vpop.f32.mrf.mxu1  ;;  %5746 = vmatmul.mubr.msk.bf16.gmra.mxu1 %vm562_vm0, %v4722_v32 }
 0x3a0   : > { %v8177_v26 = vadd.f32 %v5398_v55, %v5310_v27  ;;  %v5402_v47 = vpop.f32.mrf.mxu0  ;;  %5749 = vmatprep.mubr.msk.bf16.mxu1 %vm562_vm0, %v4723_v57 }
 0x3a1   : > { %v5312_v48 = vpop.f32.mrf.mxu1 }
 0x3a2   : > { %v5403_v51 = vpop.f32.mrf.mxu0 }
 0x3a3   : > { %v5404_v11 = vadd.f32 %v5403_v51, %v5402_v47  ;;  %v5314_v33 = vpop.f32.mrf.mxu1 }
 0x3a4   : > { %v5405_v8 = vpop.f32.mrf.mxu0 }
 0x3a5   : > { %v5315_v0 = vpop.f32.mrf.mxu1 }
 0x3a6   : > { %v5316_v28 = vadd.f32 %v5315_v0, %v5314_v33  ;;  %v5406_v31 = vpop.f32.mrf.mxu0 }
 0x3a7   : > { %v5407_v44 = vadd.f32 %v5406_v31, %v5405_v8  ;;  %v5317_v19 = vpop.f32.mrf.mxu1  ;;  %5750 = vmatmul.mubr.msk.bf16.gmra.mxu1 %vm562_vm0, %v4724_v53 }
 0x3a8   : > { %v8185_v23 = vadd.f32 %v5404_v11, %v5316_v28  ;;  %v5408_v16 = vpop.f32.mrf.mxu0  ;;  %5753 = vmatprep.mubr.msk.bf16.mxu1 %vm562_vm0, %v4725_v10 }
 0x3a9   : > { %v5318_v60 = vpop.f32.mrf.mxu1 }
 0x3aa   : > { %v5319_v4 = vadd.f32 %v5318_v60, %v5317_v19  ;;  %v5409_v63 = vpop.f32.mrf.mxu0 }
 0x3ab   : > { %v5320_v20 = vpop.f32.mrf.mxu1 }
 0x3ac   : > { %v8190_v38 = vadd.f32 %v5407_v44, %v5319_v4  ;;  %v5411_v14 = vpop.f32.mrf.mxu0 }
 0x3ad   : > { %v5321_v50 = vpop.f32.mrf.mxu1 }
 0x3ae   : > { %v5412_v12 = vpop.f32.mrf.mxu0 }
 0x3af   : > { %v5413_v62 = vadd.f32 %v5412_v12, %v5411_v14  ;;  %v5323_v6 = vpop.f32.mrf.mxu1  ;;  %5754 = vmatmul.mubr.msk.bf16.gmra.mxu1 %vm562_vm0, %v4726_v34 }
 0x3b0   : > { %v5414_v3 = vpop.f32.mrf.mxu0 }
 0x3b1   : > { %v5324_v58 = vpop.f32.mrf.mxu1 }
 0x3b2   : > { %v5325_v39 = vadd.f32 %v5324_v58, %v5323_v6  ;;  %v5415_v21 = vpop.f32.mrf.mxu0 }
 0x3b3   : > { %v5416_v61 = vadd.f32 %v5415_v21, %v5414_v3  ;;  %v5326_v9 = vpop.f32.mrf.mxu1 }
 0x3b4   : > { %v8193_v54 = vadd.f32 %v5413_v62, %v5325_v39  ;;  %v5417_v24 = vpop.f32.mrf.mxu0 }
 0x3b5   : > { %v5327_v43 = vpop.f32.mrf.mxu1 }
 0x3b6   : > { %v5328_v55 = vadd.f32 %v5327_v43, %v5326_v9  ;;  %v5418_v7 = vpop.f32.mrf.mxu0 }
 0x3b7   : > { %v5329_v35 = vpop.f32.mrf.mxu1 }
 0x3b8   : > { %v8195_v45 = vadd.f32 %v5416_v61, %v5328_v55  ;;  %v5420_v32 = vpop.f32.mrf.mxu0 }
 0x3b9   : > { %v5330_v37 = vpop.f32.mrf.mxu1 }
 0x3ba   : > { %v5421_v15 = vpop.f32.mrf.mxu0 }
 0x3bb   : > { %v5422_v22 = vadd.f32 %v5421_v15, %v5420_v32  ;;  %v5332_v57 = vpop.f32.mrf.mxu1 }
 0x3bc   : > { %v5423_v52 = vpop.f32.mrf.mxu0 }
 0x3bd   : > { %v5333_v27 = vpop.f32.mrf.mxu1 }
 0x3be   : > { %v5334_v18 = vadd.f32 %v5333_v27, %v5332_v57  ;;  %v5424_v17 = vpop.f32.mrf.mxu0 }
 0x3bf   : > { %v5425_v47 = vadd.f32 %v5424_v17, %v5423_v52  ;;  %v5335_v48 = vpop.f32.mrf.mxu1 }
 0x3c0   : > { %v8197_v51 = vadd.f32 %v5422_v22, %v5334_v18  ;;  %v5426_v11 = vpop.f32.mrf.mxu0 }
 0x3c1   : > { %v5336_v33 = vpop.f32.mrf.mxu1 }
 0x3c2   : > { %v5337_v30 = vadd.f32 %v5336_v33, %v5335_v48  ;;  %v5427_v29 = vpop.f32.mrf.mxu0 }
 0x3c3   : > { %v5338_v53 = vpop.f32.mrf.mxu1 }
 0x3c4   : > { %v8199_v8 = vadd.f32 %v5425_v47, %v5337_v30  ;;  %v5533_v5 = vpop.f32.mrf.mxu0 }
 0x3c5   : > { %v5339_v42 = vpop.f32.mrf.mxu1 }
 0x3c6   : > { %v5534_v10 = vpop.f32.mrf.mxu0 }
 0x3c7   : > { %v5535_v0 = vadd.f32 %v5534_v10, %v5533_v5  ;;  %v5445_v28 = vpop.f32.mrf.mxu1 }
 0x3c8   : > { %v5536_v31 = vpop.f32.mrf.mxu0 }
 0x3c9   : > { %v5446_v44 = vpop.f32.mrf.mxu1 }
 0x3ca   : > { %v5447_v19 = vadd.f32 %v5446_v44, %v5445_v28  ;;  %v5537_v16 = vpop.f32.mrf.mxu0 }
 0x3cb   : > { %v5538_v60 = vadd.f32 %v5537_v16, %v5536_v31  ;;  %v5448_v4 = vpop.f32.mrf.mxu1 }
 0x3cc   : > { %v4345_v63 = vadd.f32 %v5447_v19, %v8126_v13  ;;  %v5539_v20 = vpop.f32.mrf.mxu0 }
 0x3cd   : > { %v5449_v2 = vpop.f32.mrf.mxu1 }
 0x3ce   : > { %v5450_v41 = vadd.f32 %v5449_v2, %v5448_v4  ;;  %v5540_v34 = vpop.f32.mrf.mxu0  ;;  %v8202_v14 = vadd.f32 %v5535_v0, %v4345_v63 }
 0x3cf   : > { %v5451_v50 = vpop.f32.mrf.mxu1 }
 0x3d0   : > { %v4348_v12 = vadd.f32 %v5450_v41, %v8130_v59  ;;  %v5542_v62 = vpop.f32.mrf.mxu0 }
 0x3d1   : > { %v5452_v6 = vpop.f32.mrf.mxu1 }
 0x3d2   : > { %v5543_v3 = vpop.f32.mrf.mxu0  ;;  %v8205_v58 = vadd.f32 %v5538_v60, %v4348_v12 }
 0x3d3   : > { %v5544_v39 = vadd.f32 %v5543_v3, %v5542_v62  ;;  %v5454_v21 = vpop.f32.mrf.mxu1 }
 0x3d4   : > { %v5545_v61 = vpop.f32.mrf.mxu0 }
 0x3d5   : > { %v5455_v9 = vpop.f32.mrf.mxu1 }
 0x3d6   : > { %v5456_v24 = vadd.f32 %v5455_v9, %v5454_v21  ;;  %v5546_v13 = vpop.f32.mrf.mxu0 }
 0x3d7   : > { %v5547_v43 = vadd.f32 %v5546_v13, %v5545_v61  ;;  %v5457_v55 = vpop.f32.mrf.mxu1 }
 0x3d8   : > { %v4355_v7 = vadd.f32 %v5456_v24, %v8136_v46  ;;  %v5548_v35 = vpop.f32.mrf.mxu0 }
 0x3d9   : > { %v5458_v32 = vpop.f32.mrf.mxu1 }
 0x3da   : > { %v5459_v37 = vadd.f32 %v5458_v32, %v5457_v55  ;;  %v5549_v15 = vpop.f32.mrf.mxu0  ;;  %v8208_v59 = vadd.f32 %v5544_v39, %v4355_v7 }
 0x3db   : > { %v5460_v22 = vpop.f32.mrf.mxu1 }
 0x3dc   : > { %v4360_v57 = vadd.f32 %v5459_v37, %v8142_v40  ;;  %v5551_v52 = vpop.f32.mrf.mxu0 }
 0x3dd   : > { %v5461_v27 = vpop.f32.mrf.mxu1 }
 0x3de   : > { %v5552_v18 = vpop.f32.mrf.mxu0  ;;  %v8211_v17 = vadd.f32 %v5547_v43, %v4360_v57 }
 0x3df   : > { %v5553_v47 = vadd.f32 %v5552_v18, %v5551_v52  ;;  %v5463_v48 = vpop.f32.mrf.mxu1 }
 0x3e0   : > { %v5554_v11 = vpop.f32.mrf.mxu0 }
 0x3e1   : > { %v5464_v33 = vpop.f32.mrf.mxu1 }
 0x3e2   : > { %v5465_v30 = vadd.f32 %v5464_v33, %v5463_v48  ;;  %v5555_v46 = vpop.f32.mrf.mxu0 }
 0x3e3   : > { %v5556_v29 = vadd.f32 %v5555_v46, %v5554_v11  ;;  %v5466_v53 = vpop.f32.mrf.mxu1 }
 0x3e4   : > { %v4367_v5 = vadd.f32 %v5465_v30, %v8148_v1  ;;  %v5557_v42 = vpop.f32.mrf.mxu0 }
 0x3e5   : > { %v5467_v10 = vpop.f32.mrf.mxu1 }
 0x3e6   : > { %v5468_v0 = vadd.f32 %v5467_v10, %v5466_v53  ;;  %v5558_v28 = vpop.f32.mrf.mxu0  ;;  %v8214_v40 = vadd.f32 %v5553_v47, %v4367_v5 }
 0x3e7   : > { %v5469_v31 = vpop.f32.mrf.mxu1 }
 0x3e8   : > { %v4370_v44 = vadd.f32 %v5468_v0, %v8152_v56  ;;  %v5560_v19 = vpop.f32.mrf.mxu0 }
 0x3e9   : > { %v5470_v16 = vpop.f32.mrf.mxu1 }
 0x3ea   : > { %v5561_v60 = vpop.f32.mrf.mxu0  ;;  %v8217_v4 = vadd.f32 %v5556_v29, %v4370_v44 }
 0x3eb   : > { %v5562_v63 = vadd.f32 %v5561_v60, %v5560_v19  ;;  %v5472_v20 = vpop.f32.mrf.mxu1 }
 0x3ec   : > { %v5563_v2 = vpop.f32.mrf.mxu0 }
 0x3ed   : > { %v5473_v41 = vpop.f32.mrf.mxu1 }
 0x3ee   : > { %v5474_v34 = vadd.f32 %v5473_v41, %v5472_v20  ;;  %v5564_v1 = vpop.f32.mrf.mxu0 }
 0x3ef   : > { %v5565_v50 = vadd.f32 %v5564_v1, %v5563_v2  ;;  %v5475_v12 = vpop.f32.mrf.mxu1 }
 0x3f0   : > { %v4377_v62 = vadd.f32 %v5474_v34, %v8159_v25  ;;  %v5566_v6 = vpop.f32.mrf.mxu0 }
 0x3f1   : > { %v5476_v3 = vpop.f32.mrf.mxu1 }
 0x3f2   : > { %v5477_v39 = vadd.f32 %v5476_v3, %v5475_v12  ;;  %v5567_v21 = vpop.f32.mrf.mxu0  ;;  %v8220_v56 = vadd.f32 %v5562_v63, %v4377_v62 }
 0x3f3   : > { %v5478_v61 = vpop.f32.mrf.mxu1 }
 0x3f4   : > { %v4382_v9 = vadd.f32 %v5477_v39, %v8164_v36  ;;  %v5569_v24 = vpop.f32.mrf.mxu0 }
 0x3f5   : > { %v5479_v13 = vpop.f32.mrf.mxu1 }
 0x3f6   : > { %v5570_v43 = vpop.f32.mrf.mxu0  ;;  %v8223_v55 = vadd.f32 %v5565_v50, %v4382_v9 }
 0x3f7   : > { %v5571_v7 = vadd.f32 %v5570_v43, %v5569_v24  ;;  %v5481_v35 = vpop.f32.mrf.mxu1 }
 0x3f8   : > { %v5572_v32 = vpop.f32.mrf.mxu0 }
 0x3f9   : > { %v5482_v37 = vpop.f32.mrf.mxu1 }
 0x3fa   : > { %v5483_v15 = vadd.f32 %v5482_v37, %v5481_v35  ;;  %v5573_v25 = vpop.f32.mrf.mxu0 }
 0x3fb   : > { %v5574_v22 = vadd.f32 %v5573_v25, %v5572_v32  ;;  %v5484_v57 = vpop.f32.mrf.mxu1 }
 0x3fc   : > { %v4389_v52 = vadd.f32 %v5483_v15, %v8172_v49  ;;  %v5575_v27 = vpop.f32.mrf.mxu0 }
 0x3fd   : > { %v5485_v18 = vpop.f32.mrf.mxu1 }
 0x3fe   : > { %v5486_v47 = vadd.f32 %v5485_v18, %v5484_v57  ;;  %v5576_v48 = vpop.f32.mrf.mxu0  ;;  %v8226_v36 = vadd.f32 %v5571_v7, %v4389_v52 }
 0x3ff   : > { %v5487_v11 = vpop.f32.mrf.mxu1 }
 0x400   : > { %v4392_v33 = vadd.f32 %v5486_v47, %v8177_v26  ;;  %v5578_v30 = vpop.f32.mrf.mxu0 }
 0x401   : > { %v5488_v46 = vpop.f32.mrf.mxu1 }
 0x402   : > { %v5579_v29 = vpop.f32.mrf.mxu0  ;;  %v8229_v53 = vadd.f32 %v5574_v22, %v4392_v33 }
 0x403   : > { %v5580_v5 = vadd.f32 %v5579_v29, %v5578_v30  ;;  %v5490_v42 = vpop.f32.mrf.mxu1 }
 0x404   : > { %v5581_v10 = vpop.f32.mrf.mxu0 }
 0x405   : > { %v5491_v0 = vpop.f32.mrf.mxu1 }
 0x406   : > { %v5492_v28 = vadd.f32 %v5491_v0, %v5490_v42  ;;  %v5582_v49 = vpop.f32.mrf.mxu0 }
 0x407   : > { %v5583_v31 = vadd.f32 %v5582_v49, %v5581_v10  ;;  %v5493_v44 = vpop.f32.mrf.mxu1 }
 0x408   : > { %v4399_v19 = vadd.f32 %v5492_v28, %v8185_v23  ;;  %v5584_v16 = vpop.f32.mrf.mxu0 }
 0x409   : > { %v5494_v60 = vpop.f32.mrf.mxu1 }
 0x40a   : > { %v5495_v63 = vadd.f32 %v5494_v60, %v5493_v44  ;;  %v5585_v20 = vpop.f32.mrf.mxu0  ;;  %v8232_v26 = vadd.f32 %v5580_v5, %v4399_v19 }
 0x40b   : > { %v5496_v2 = vpop.f32.mrf.mxu1 }
 0x40c   : > { %v4404_v41 = vadd.f32 %v5495_v63, %v8190_v38  ;;  %v5587_v34 = vpop.f32.mrf.mxu0 }
 0x40d   : > { %v5497_v1 = vpop.f32.mrf.mxu1 }
 0x40e   : > { %v5588_v50 = vpop.f32.mrf.mxu0  ;;  %v8235_v12 = vadd.f32 %v5583_v31, %v4404_v41 }
 0x40f   : > { %v5589_v62 = vadd.f32 %v5588_v50, %v5587_v34  ;;  %v5499_v6 = vpop.f32.mrf.mxu1 }
 0x410   : > { %v5590_v3 = vpop.f32.mrf.mxu0 }
 0x411   : > { %v5500_v39 = vpop.f32.mrf.mxu1 }
 0x412   : > { %v5501_v21 = vadd.f32 %v5500_v39, %v5499_v6  ;;  %v5591_v23 = vpop.f32.mrf.mxu0 }
 0x413   : > { %v5592_v61 = vadd.f32 %v5591_v23, %v5590_v3  ;;  %v5502_v9 = vpop.f32.mrf.mxu1 }
 0x414   : > { %v4411_v24 = vadd.f32 %v5501_v21, %v8193_v54  ;;  %v5593_v13 = vpop.f32.mrf.mxu0 }
 0x415   : > { %v5503_v43 = vpop.f32.mrf.mxu1 }
 0x416   : > { %v5504_v7 = vadd.f32 %v5503_v43, %v5502_v9  ;;  %v5594_v35 = vpop.f32.mrf.mxu0  ;;  %v8238_v38 = vadd.f32 %v5589_v62, %v4411_v24 }
 0x417   : > { %v5505_v32 = vpop.f32.mrf.mxu1 }
 0x418   : > { %v4414_v37 = vadd.f32 %v5504_v7, %v8195_v45  ;;  %v5596_v15 = vpop.f32.mrf.mxu0  ;;  %v8267_v7 = vld [vmem:[%s8412_s6] ss:$0 sm:$0xff] }
 0x419   : > { %v5506_v25 = vpop.f32.mrf.mxu1 }
 0x41a   : > { %v5597_v22 = vpop.f32.mrf.mxu0  ;;  %v8241_v57 = vadd.f32 %v5592_v61, %v4414_v37  ;;  %v8276_v37 = vld [vmem:[%s8415_s9] ss:$0 sm:$0xff] }
 0x41b   : > { %v5598_v52 = vadd.f32 %v5597_v22, %v5596_v15  ;;  %v5508_v27 = vpop.f32.mrf.mxu1  ;;  %v8283_v25 = vld [vmem:[%s8416_s10] ss:$0 sm:$0xff] }
 0x41c   : > { %v5599_v18 = vpop.f32.mrf.mxu0 }
 0x41d   : > { %v5509_v47 = vpop.f32.mrf.mxu1 }
 0x41e   : > { %v5510_v48 = vadd.f32 %v5509_v47, %v5508_v27  ;;  %v5600_v54 = vpop.f32.mrf.mxu0 }
 0x41f   : > { %v5601_v11 = vadd.f32 %v5600_v54, %v5599_v18  ;;  %v5511_v33 = vpop.f32.mrf.mxu1 }
 0x420   : > { %v4421_v30 = vadd.f32 %v5510_v48, %v8197_v51  ;;  %v5602_v46 = vpop.f32.mrf.mxu0 }
 0x421   : > { %v5512_v29 = vpop.f32.mrf.mxu1 }
 0x422   : > { %v5513_v5 = vadd.f32 %v5512_v29, %v5511_v33  ;;  %v5603_v42 = vpop.f32.mrf.mxu0  ;;  %v8244_v45 = vadd.f32 %v5598_v52, %v4421_v30 }
 0x423   : > { %v5514_v10 = vpop.f32.mrf.mxu1 }
 0x424   : > { %v4426_v0 = vadd.f32 %v5513_v5, %v8199_v8 }
 0x425   : > { %v5515_v28 = vpop.f32.mrf.mxu1 }
 0x426   : > { %v8247_v49 = vadd.f32 %v5601_v11, %v4426_v0 }
 0x427   : > { %v5711_v31 = vpop.f32.mrf.mxu1 }
 0x429   : > { %v4586_v44 = vpop.f32.mrf.mxu1 }
 0x42a   : > { %v4587_v13 = vadd.f32 %v4586_v44, %v8202_v14 }
 0x42b   : > { %v5712_v19 = vpop.f32.mrf.mxu1 }
 0x42c   : > { %v4597_v24 = vadd.f32 %v5712_v19, %v8208_v59  ;;  %v4680_v14 = vmul.f32 %v8267_v7, %v4587_v13 }
 0x42d   : > { %v4589_v16 = vpop.f32.mrf.mxu1 }
 0x42e   : > { %v4682_v59 = vmul.f32 %v8267_v7, %v4597_v24  ;;  %v4590_v22 = vadd.f32 %v4589_v16, %v8205_v58 }
 0x42f   : > { %v5715_v60 = vpop.f32.mrf.mxu1 }
 0x430   : > { %v4609_v30 = vadd.f32 %v5715_v60, %v8214_v40  ;;  %v4681_v46 = vmul.f32 %v8267_v7, %v4590_v22 }
 0x431   : > { %v4601_v63 = vpop.f32.mrf.mxu1 }
 0x432   : > { %v4602_v35 = vadd.f32 %v4601_v63, %v8211_v17  ;;  %v8288_v17 = vld [vmem:[%s8413_s7] ss:$0 sm:$0xff]  ;;  %v4684_v19 = vmul.f32 %v8267_v7, %v4609_v30 }
 0x433   : > { %v5716_v51 = vpop.f32.mrf.mxu1  ;;  %v4705_v47 = vadd.f32 %v8288_v17, %v4682_v59  ;;  %v4703_v33 = vadd.f32 %v8288_v17, %v4680_v14  ;;  %v4704_v63 = vadd.f32 %v8288_v17, %v4681_v46 }
 0x434   : > { %v4683_v27 = vmul.f32 %v8267_v7, %v4602_v35  ;;  %v4612_v16 = vadd.f32 %v5716_v51, %v8217_v4 }
 0x435   : > { %v4604_v20 = vpop.f32.mrf.mxu1 }
 0x436   : > { %v4706_v42 = vadd.f32 %v8288_v17, %v4683_v27  ;;  %v4685_v24 = vmul.f32 %v8267_v7, %v4612_v16 }
 0x437   : > { %v5719_v2 = vpop.f32.mrf.mxu1 }
 0x438   : > { %v4624_v10 = vadd.f32 %v5719_v2, %v8223_v55  ;;  %v4708_v27 = vadd.f32 %v8288_v17, %v4685_v24 }
 0x439   : > { %v4616_v41 = vpop.f32.mrf.mxu1 }
 0x43a   : > { %v4687_v41 = vmul.f32 %v8267_v7, %v4624_v10 }
 0x43b   : > { %v5720_v34 = vpop.f32.mrf.mxu1 }
 0x43c   : > { %v4710_v22 = vadd.f32 %v8288_v17, %v4687_v41 }
 0x43d   : > { %v4618_v1 = vpop.f32.mrf.mxu1 }
 0x43e   : > { %v4619_v48 = vadd.f32 %v4618_v1, %v8220_v56 }
 0x43f   : > { %v5723_v50 = vpop.f32.mrf.mxu1 }
 0x440   : > { %v4686_v0 = vmul.f32 %v8267_v7, %v4619_v48 }
 0x441   : > { %v8249_v62 = vpop.f32.mrf.mxu1 }
 0x442   : > { %v4709_v50 = vadd.f32 %v8288_v17, %v4686_v0 }
 0x443   : > { %v5724_v8 = vpop.f32.mrf.mxu1 }
 0x444   : > { %v4641_v34 = vadd.f32 %v5724_v8, %v8232_v26 }
 0x445   : > { %v8251_v6 = vpop.f32.mrf.mxu1 }
 0x446   : > { %v4690_v59 = vmul.f32 %v8267_v7, %v4641_v34 }
 0x447   : > { %v8253_v3 = vpop.f32.mrf.mxu1 }
 0x449   : > { %v8255_v39 = vpop.f32.mrf.mxu1 }
 0x44a   : > { %v4646_v14 = vadd.f32 %v8255_v39, %v8235_v12 }
 0x44b   : > { %v8257_v21 = vpop.f32.mrf.mxu1 }
 0x44d   : > { %v4648_v23 = vpop.f32.mrf.mxu1 }
 0x44f   : > { %v8259_v61 = vpop.f32.mrf.mxu1 }
 0x450   : > { %v4668_v0 = vadd.f32 %v8259_v61, %v8247_v49 }
 0x451   : > { %v4660_v9 = vpop.f32.mrf.mxu1 }
 0x452   : > { %v4707_v9 = vadd.f32 %v8288_v17, %v4684_v19 }
 0x453   : > { %v5732_v43 = vpop.f32.mrf.mxu1 }
 0x454   : > { %v4631_v43 = vadd.f32 %v8249_v62, %v8226_v36 }
 0x455   : > { %v8271_v32 = vpop.f32.mrf.mxu1 }
 0x456   : > { %v4688_v48 = vmul.f32 %v8267_v7, %v4631_v43 }
 0x457   : > { %v5743_v15 = vpop.f32.mrf.mxu1 }
 0x458   : > { %v4889_v52 = vmul.f32 %v5743_v15, %v8276_v37 }
 0x459   : > { %v4817_v18 = vpop.f32.mrf.mxu1 }
 0x45a   : > { %v4912_v54 = vadd.f32 %v8283_v25, %v4889_v52  ;;  %v4887_v11 = vmul.f32 %v8276_v37, %v4817_v18  ;;  %v4634_v18 = vadd.f32 %v8251_v6, %v8229_v53 }
 0x45b   : > { %v5744_v58 = vpop.f32.mrf.mxu1 }
 0x45c   : > { %v4928_v29 = vadd.f32 %v4912_v54, %v4705_v47  ;;  %v4910_v56 = vadd.f32 %v8283_v25, %v4887_v11  ;;  %v4890_v5 = vmul.f32 %v5744_v58, %v8276_v37  ;;  %v4713_v11 = vadd.f32 %v8288_v17, %v4690_v59 }
 0x45d   : > { %v4820_v40 = vpop.f32.mrf.mxu1  ;;  %v4663_v58 = vadd.f32 %v8271_v32, %v8244_v45 }
 0x45e   : > { %4944 = vst [vmem:[%s8302_s21 + $0x10] sm:$0xff] %v4928_v29  ;;  %v4926_v28 = vadd.f32 %v4910_v56, %v4703_v33  ;;  %v4913_v31 = vadd.f32 %v8283_v25, %v4890_v5  ;;  %v4888_v44 = vmul.f32 %v8276_v37, %v4820_v40  ;;  %v4691_v33 = vmul.f32 %v8267_v7, %v4646_v14 }
 0x45f   : > { %v5747_v60 = vpop.f32.mrf.mxu1  ;;  %v4689_v29 = vmul.f32 %v8267_v7, %v4634_v18  ;;  %v4653_v56 = vadd.f32 %v8253_v3, %v8238_v38 }
 0x460   : > { %4942 = vst [vmem:[%s8302_s21] sm:$0xff] %v4926_v28  ;;  %v4929_v55 = vadd.f32 %v4913_v31, %v4706_v42  ;;  %v4911_v20 = vadd.f32 %v8283_v25, %v4888_v44  ;;  %v4893_v2 = vmul.f32 %v5747_v60, %v8276_v37  ;;  %v4711_v42 = vadd.f32 %v8288_v17, %v4688_v48 }
 0x461   : > { %v4833_v1 = vpop.f32.mrf.mxu1  ;;  %v4714_v40 = vadd.f32 %v8288_v17, %v4691_v33  ;;  %v4694_v31 = vmul.f32 %v8267_v7, %v4663_v58  ;;  %v4712_v19 = vadd.f32 %v8288_v17, %v4689_v29  ;;  %v4692_v16 = vmul.f32 %v8267_v7, %v4653_v56 }
 0x462   : > { %4945 = vst [vmem:[%s8302_s21 + $0x18] sm:$0xff] %v4929_v55  ;;  %v4927_v4 = vadd.f32 %v4911_v20, %v4704_v63  ;;  %v4916_v51 = vadd.f32 %v8283_v25, %v4893_v2  ;;  %v4891_v23 = vmul.f32 %v8276_v37, %v4833_v1  ;;  %v4656_v63 = vadd.f32 %v8257_v21, %v8241_v57 }
 0x463   : > { %v5748_v13 = vpop.f32.mrf.mxu1  ;;  %v4695_v20 = vmul.f32 %v8267_v7, %v4668_v0  ;;  %v4717_v41 = vadd.f32 %v8288_v17, %v4694_v31  ;;  %v4715_v57 = vadd.f32 %v8288_v17, %v4692_v16 }
 0x464   : > { %4943 = vst [vmem:[%s8302_s21 + $0x8] sm:$0xff] %v4927_v4  ;;  %v4932_v26 = vadd.f32 %v4916_v51, %v4709_v50  ;;  %v4914_v8 = vadd.f32 %v8283_v25, %v4891_v23  ;;  %v4894_v35 = vmul.f32 %v5748_v13, %v8276_v37  ;;  %v4693_v4 = vmul.f32 %v8267_v7, %v4656_v63 }
 0x465   : > { %v4836_v15 = vpop.f32.mrf.mxu1  ;;  %v4718_v13 = vadd.f32 %v8288_v17, %v4695_v20 }
 0x466   : > { %4948 = vst [vmem:[%s8302_s21 + $0x30] sm:$0xff] %v4932_v26  ;;  %v4930_v52 = vadd.f32 %v4914_v8, %v4707_v9  ;;  %v4917_v36 = vadd.f32 %v8283_v25, %v4894_v35  ;;  %v4892_v62 = vmul.f32 %v8276_v37, %v4836_v15  ;;  %v4716_v35 = vadd.f32 %v8288_v17, %v4693_v4 }
 0x467   : > { %v5751_v47 = vpop.f32.mrf.mxu1 }
 0x468   : > { %4946 = vst [vmem:[%s8302_s21 + $0x20] sm:$0xff] %v4930_v52  ;;  %v4933_v12 = vadd.f32 %v4917_v36, %v4710_v22  ;;  %v4915_v39 = vadd.f32 %v8283_v25, %v4892_v62  ;;  %v4897_v54 = vmul.f32 %v5751_v47, %v8276_v37 }
 0x469   : > { %v4849_v30 = vpop.f32.mrf.mxu1 }
 0x46a   : > { %4949 = vst [vmem:[%s8302_s21 + $0x38] sm:$0xff] %v4933_v12  ;;  %v4931_v53 = vadd.f32 %v4915_v39, %v4708_v27  ;;  %v4920_v6 = vadd.f32 %v8283_v25, %v4897_v54  ;;  %v4895_v46 = vmul.f32 %v8276_v37, %v4849_v30 }
 0x46b   : > { %v5752_v5 = vpop.f32.mrf.mxu1 }
 0x46c   : > { %4947 = vst [vmem:[%s8302_s21 + $0x28] sm:$0xff] %v4931_v53  ;;  %v4936_v10 = vadd.f32 %v4920_v6, %v4713_v11  ;;  %v4918_v45 = vadd.f32 %v8283_v25, %v4895_v46  ;;  %v4898_v32 = vmul.f32 %v5752_v5, %v8276_v37 }
 0x46d   : > { %v4852_v28 = vpop.f32.mrf.mxu1 }
 0x46e   : > { %4952 = vst [vmem:[%s8302_s21 + $0x50] sm:$0xff] %v4936_v10  ;;  %v4934_v38 = vadd.f32 %v4918_v45, %v4711_v42  ;;  %v4921_v3 = vadd.f32 %v8283_v25, %v4898_v32  ;;  %v4896_v44 = vmul.f32 %v8276_v37, %v4852_v28 }
 0x46f   : > { %v5755_v60 = vpop.f32.mrf.mxu1 }
 0x470   : > { %4950 = vst [vmem:[%s8302_s21 + $0x40] sm:$0xff] %v4934_v38  ;;  %v4937_v49 = vadd.f32 %v4921_v3, %v4714_v40  ;;  %v4919_v61 = vadd.f32 %v8283_v25, %v4896_v44  ;;  %v4901_v55 = vmul.f32 %v5755_v60, %v8276_v37 }
 0x471   : > { %v4865_v2 = vpop.f32.mrf.mxu1 }
 0x472   : > { %4953 = vst [vmem:[%s8302_s21 + $0x58] sm:$0xff] %v4937_v49  ;;  %v4935_v34 = vadd.f32 %v4919_v61, %v4712_v19  ;;  %v4924_v1 = vadd.f32 %v8283_v25, %v4901_v55  ;;  %v4899_v50 = vmul.f32 %v8276_v37, %v4865_v2 }
 0x473   : > { %v5756_v21 = vpop.f32.mrf.mxu1 }
 0x474   : > { %4951 = vst [vmem:[%s8302_s21 + $0x48] sm:$0xff] %v4935_v34  ;;  %v4940_v51 = vadd.f32 %v4924_v1, %v4717_v41  ;;  %v4922_v23 = vadd.f32 %v8283_v25, %v4899_v50  ;;  %v4902_v9 = vmul.f32 %v5756_v21, %v8276_v37 }
 0x475   : > { %v4868_v24 = vpop.f32.mrf.mxu1 }
 0x476   : > { %4956 = vst [vmem:[%s8302_s21 + $0x70] sm:$0xff] %v4940_v51  ;;  %v4938_v43 = vadd.f32 %v4922_v23, %v4715_v57  ;;  %v4925_v26 = vadd.f32 %v8283_v25, %v4902_v9  ;;  %v4900_v8 = vmul.f32 %v8276_v37, %v4868_v24 }
 0x478   : > { %4954 = vst [vmem:[%s8302_s21 + $0x60] sm:$0xff] %v4938_v43  ;;  %v4941_v7 = vadd.f32 %v4925_v26, %v4718_v13  ;;  %v4923_v59 = vadd.f32 %v8283_v25, %v4900_v8 }
 0x47a   : > { %4957 = vst [vmem:[%s8302_s21 + $0x78] sm:$0xff] %v4941_v7  ;;  %v4939_v14 = vadd.f32 %v4923_v59, %v4716_v35 }
 0x47c   : > { %4955 = vst [vmem:[%s8302_s21 + $0x68] sm:$0xff] %v4939_v14 }
 0x47d PF: > { %p23_p4 = scmp.ge.s32.totalorder %s6256_s28, 4   ;;  %s8500_s17 = smov %s6105_s18 }
 0x47e   : > { %s8501_s18 = smov %s6109_s19  ;;  %s8502_s19 = smov %s6266_s26 }
 0x47f   : > { %s8503_s20 = smov %s6256_s28  ;;  %25 = sbr.rel (!%p23_p4) target bundleno = 7 (0x7), region = 120 }
 0x484   :  { %4979 = vsyncpa [#allocation5], 1 }
 0x485   :  { %4981 = vsyncpa [#allocation5 + $0x1], 1 }
 0x486   :  { %4982 = vsyncpa [#allocation7], 1 }
 0x487   :  { %4983 = vsyncpa [#allocation10], 1 }

</bundles_post_ra>
